<compile_context>
chip_gen: v6e
topology: v6e:2x2x1
jax: 0.10.0
libtpu: 0.0.40
codegen_flags: <defaults>
</compile_context>

<pallas_src>
import jax
import jax.numpy as jnp
from jax import lax
from jax.experimental import pallas as pl
from jax.experimental.pallas import tpu as pltpu

SEQ = 24          # fixed by x.view(B, 24, -1)
HID = 32          # LSTM hidden size
MID = 8           # hidden width of the MLP head
G = 4 * HID       # gate width per layer (128)
PG = 2 * G        # packed gate width for both layers (256)
H2 = 2 * HID      # packed state width (64)


def lstm_head_kernel(x_ref,        # (SEQ*B, 1)  time-major, flattened (t, b)
                     wih1p_ref,    # (1, PG)  packed layer-1 W_ih^T (l2 cols zero)
                     biasp_ref,    # (1, PG)  packed biases (b1 | b2 per gate)
                     wfused_ref,   # (H2, PG) packed fused recurrent weight
                     wl2ep_ref,    # (H2, G)  epilogue layer-2-only weight
                     b2ep_ref,     # (1, G)   epilogue layer-2 bias
                     wl1_ref,      # (HID, MID) head Linear(32,8) weight^T
                     bl1_ref,      # (1, MID)
                     wl2_ref,      # (1, MID)   head Linear(8,1) weight (row)
                     bl2_ref,      # (1, 1)
                     out_ref,      # (B, 1)
                     gin_ref):     # scratch (SEQ*B, PG): hoisted inputs + biases
    B = out_ref.shape[0]

    # ---- hoisted input projection + bias slab (off the serial chain) ------
    # l1 gate columns: x[t,b]*W_ih1 + (b_ih1+b_hh1); l2 gate columns: b_ih2+b_hh2.
    gin_ref[...] = x_ref[...] * wih1p_ref[...] + biasp_ref[...]

    def packed_cell(gates, c_prev):
        # gates (B, PG) in paired-gate layout [i1 i2 | f1 f2 | o1 o2 | 2g1 2g2].
        # One sigmoid over all 256 lanes; g recovered via tanh(z)=2*sigmoid(2z)-1.
        s = jax.nn.sigmoid(gates)
        i = s[:, 0 * H2:1 * H2]
        f = s[:, 1 * H2:2 * H2]
        o = s[:, 2 * H2:3 * H2]
        g = 2.0 * s[:, 3 * H2:4 * H2] - 1.0
        c_new = f * c_prev + i * g
        h_new = o * jnp.tanh(c_new)
        return h_new, c_new                    # both already packed [l1 | l2]

    # ---- prologue: layer-1 at t=0 (all initial state is zero) -------------
    # Zeroing the g2 columns keeps the layer-2 half of (h, c) exactly zero:
    # c2 = f2*0 + i2*0 = 0, h2 = o2*tanh(0) = 0.
    col = lax.broadcasted_iota(jnp.int32, (B, PG), 1)
    gates0 = jnp.where(col < 7 * HID, gin_ref[pl.ds(0, B), :], 0.0)
    h, c = packed_cell(gates0, jnp.zeros((B, H2), jnp.float32))

    # ---- skewed, fully unrolled recurrence ---------------------------------
    # Iteration t computes layer-1 at time t and layer-2 at time t-1 with a
    # single (B,2H)@(2H,8H) matmul; the packed cell finishes both layers at once.
    for t in range(1, SEQ):
        rec = jnp.dot(h, wfused_ref[...], preferred_element_type=jnp.float32)
        h, c = packed_cell(gin_ref[pl.ds(t * B, B), :] + rec, c)

    # ---- epilogue: layer-2 at the last timestep (layer-2 columns only) -----
    gates2 = (jnp.dot(h, wl2ep_ref[...], preferred_element_type=jnp.float32)
              + b2ep_ref[...])                      # (B, G) order [i f o 2g]
    s2 = jax.nn.sigmoid(gates2)
    i2 = s2[:, 0 * HID:1 * HID]
    f2 = s2[:, 1 * HID:2 * HID]
    o2 = s2[:, 2 * HID:3 * HID]
    g2 = 2.0 * s2[:, 3 * HID:4 * HID] - 1.0
    c2 = f2 * c[:, HID:] + i2 * g2
    h2 = o2 * jnp.tanh(c2)

    # ---- MLP head on the last hidden state ---------------------------------
    # Three dropout branches are identity in eval => res = 3 * linear(h_last).
    z = jnp.tanh(jnp.dot(h2, wl1_ref[...], preferred_element_type=jnp.float32)
                 + bl1_ref[...])
    # N=1 matmul replaced by a VPU multiply + cross-lane reduce.
    y = jnp.sum(z * wl2_ref[...], axis=-1, keepdims=True) + bl2_ref[...]
    out_ref[...] = 3.0 * y


def prepare_kernel_params(p):
    """Build the packed paired-gate weights consumed by the kernel.

    PyTorch gate order is [i, f, g, o]; the kernel uses the paired layout
    [i1 i2 | f1 f2 | o1 o2 | 2*g1 2*g2] so both layers share vregs and the g
    tanh folds into the single packed sigmoid (columns pre-scaled by 2)."""
    f32 = jnp.float32

    def split_gates(w):          # last axis in PyTorch order [i f g o]
        return (w[..., 0 * HID:1 * HID], w[..., 1 * HID:2 * HID],
                w[..., 2 * HID:3 * HID], w[..., 3 * HID:4 * HID])

    def pack_pair(l1, l2):       # -> [i1 i2 | f1 f2 | o1 o2 | 2g1 2g2]
        i1, f1, g1, o1 = split_gates(l1)
        i2, f2, g2, o2 = split_gates(l2)
        return jnp.concatenate([i1, i2, f1, f2, o1, o2, 2.0 * g1, 2.0 * g2],
                               axis=-1)

    def pack_single(w):          # [i f g o] -> [i f o 2g]
        i, f, g, o = split_gates(w)
        return jnp.concatenate([i, f, o, 2.0 * g], axis=-1)

    wih1_T = p["w_ih_l0"].astype(f32).T                      # (1, 4H)
    whh1_T = p["w_hh_l0"].astype(f32).T                      # (H, 4H)
    wih2_T = p["w_ih_l1"].astype(f32).T                      # (H, 4H)
    whh2_T = p["w_hh_l1"].astype(f32).T                      # (H, 4H)
    b1 = (p["b_ih_l0"] + p["b_hh_l0"]).astype(f32)[None]     # (1, 4H)
    b2 = (p["b_ih_l1"] + p["b_hh_l1"]).astype(f32)[None]     # (1, 4H)

    # input-projection / bias slab sources
    wih1p = pack_pair(wih1_T, jnp.zeros_like(wih1_T))        # (1, PG)
    biasp = pack_pair(b1, b2)                                # (1, PG)

    # fused recurrent weight:  [h1 | h2] @ w_fused
    #   l1 gate columns: rows 0:H = Whh1^T, rows H:2H = 0
    #   l2 gate columns: rows 0:H = Wih2^T, rows H:2H = Whh2^T
    l1_stack = jnp.concatenate([whh1_T, jnp.zeros((HID, G), f32)], axis=0)
    l2_stack = jnp.concatenate([wih2_T, whh2_T], axis=0)
    w_fused = pack_pair(l1_stack, l2_stack)                  # (2H, PG)

    # epilogue: layer-2 columns only
    w_l2ep = pack_single(l2_stack)                           # (2H, 4H)
    b2ep = pack_single(b2)                                   # (1, 4H)

    return dict(
        wih1p=wih1p, biasp=biasp, w_fused=w_fused, w_l2ep=w_l2ep, b2ep=b2ep,
        wl1_T=p["w_fc1"].astype(f32).T,        # (H, MID)
        bl1=p["b_fc1"].astype(f32)[None],      # (1, MID)
        wl2_row=p["w_fc2"].astype(f32),        # (1, MID)
        bl2=p["b_fc2"].astype(f32)[None],      # (1, 1)
    )


def model_forward(x, p):
    """x: (B, 24, 1) float32 -> (B,) float32  (eval-mode forward)."""
    B = x.shape[0]
    kp = prepare_kernel_params(p)
    # Time-major, flattened (t, b): each timestep is an aligned 8-sublane slice.
    x_flat = jnp.transpose(x.reshape(B, SEQ).astype(jnp.float32),
                           (1, 0)).reshape(SEQ * B, 1)

    vmem = pl.BlockSpec(memory_space=pltpu.MemorySpace.VMEM)
    out = pl.pallas_call(
        lstm_head_kernel,
        out_shape=jax.ShapeDtypeStruct((B, 1), jnp.float32),
        in_specs=[vmem] * 10,
        out_specs=vmem,
        scratch_shapes=[pltpu.VMEM((SEQ * B, PG), jnp.float32)],
    )(x_flat, kp["wih1p"], kp["biasp"], kp["w_fused"], kp["w_l2ep"], kp["b2ep"],
      kp["wl1_T"], kp["bl1"], kp["wl2_row"], kp["bl2"])
    return out.reshape(B)


def make_params(key):
    """Deterministic synthetic parameters in native PyTorch layout."""
    ks = jax.random.split(key, 12)
    u = lambda k, shape, s=0.15: jax.random.uniform(k, shape, jnp.float32, -s, s)
    return {
        # LSTM layer 0: weight_ih (4H,1), weight_hh (4H,H), biases (4H,)
        "w_ih_l0": u(ks[0], (G, 1)),
        "w_hh_l0": u(ks[1], (G, HID)),
        "b_ih_l0": u(ks[2], (G,)),
        "b_hh_l0": u(ks[3], (G,)),
        # LSTM layer 1: weight_ih (4H,H), weight_hh (4H,H), biases (4H,)
        "w_ih_l1": u(ks[4], (G, HID)),
        "w_hh_l1": u(ks[5], (G, HID)),
        "b_ih_l1": u(ks[6], (G,)),
        "b_hh_l1": u(ks[7], (G,)),
        # Head: Linear(32,8) -> Dropout -> Tanh -> Linear(8,1)
        "w_fc1": u(ks[8], (MID, HID)),
        "b_fc1": u(ks[9], (MID,)),
        "w_fc2": u(ks[10], (1, MID)),
        "b_fc2": u(ks[11], (1,)),
    }


def reference_forward(x, p):
    """Pure-JAX reference with PyTorch LSTM semantics (gate order i,f,g,o)."""
    B = x.shape[0]
    xs = x.reshape(B, SEQ, 1).astype(jnp.float32)

    def lstm_layer(inp, w_ih, w_hh, b_ih, b_hh):
        wih_T, whh_T = w_ih.T, w_hh.T
        b = (b_ih + b_hh)[None, :]

        def step(carry, x_t):
            h, c = carry
            gates = x_t @ wih_T + h @ whh_T + b
            i = jax.nn.sigmoid(gates[:, :HID])
            f = jax.nn.sigmoid(gates[:, HID:2 * HID])
            g = jnp.tanh(gates[:, 2 * HID:3 * HID])
            o = jax.nn.sigmoid(gates[:, 3 * HID:])
            c = f * c + i * g
            h = o * jnp.tanh(c)
            return (h, c), h

        init = (jnp.zeros((B, HID), jnp.float32), jnp.zeros((B, HID), jnp.float32))
        _, hs = lax.scan(step, init, jnp.transpose(inp, (1, 0, 2)))
        return jnp.transpose(hs, (1, 0, 2))

    out1 = lstm_layer(xs, p["w_ih_l0"], p["w_hh_l0"], p["b_ih_l0"], p["b_hh_l0"])
    out2 = lstm_layer(out1, p["w_ih_l1"], p["w_hh_l1"], p["b_ih_l1"], p["b_hh_l1"])
    h_last = out2[:, -1, :]
    z = jnp.tanh(h_last @ p["w_fc1"].T + p["b_fc1"])
    y = z @ p["w_fc2"].T + p["b_fc2"]
    return (3.0 * y).reshape(B)


if __name__ == "__main__":
    key = jax.random.PRNGKey(0)
    kx, kparam = jax.random.split(key)

    B = 8
    x = jax.random.normal(kx, (B, SEQ, 1), dtype=jnp.float32)
    params = make_params(kparam)

    y = jax.block_until_ready(model_forward(x, params))
    y_ref = reference_forward(x, params)

    assert y.shape == (B,)
    assert jnp.allclose(y, y_ref, atol=1e-4, rtol=1e-4), (y, y_ref)

    print("KERNEL_OK")
</pallas_src>

<mosaic_0001>
module attributes {stable_mosaic.version = 11 : i64} {
  func.func @lstm_head_kernel(%arg0: memref<192x1xf32, #tpu.memory_space<vmem>>, %arg1: memref<1x256xf32, #tpu.memory_space<vmem>>, %arg2: memref<1x256xf32, #tpu.memory_space<vmem>>, %arg3: memref<64x256xf32, #tpu.memory_space<vmem>>, %arg4: memref<64x128xf32, #tpu.memory_space<vmem>>, %arg5: memref<1x128xf32, #tpu.memory_space<vmem>>, %arg6: memref<32x8xf32, #tpu.memory_space<vmem>>, %arg7: memref<1x8xf32, #tpu.memory_space<vmem>>, %arg8: memref<1x8xf32, #tpu.memory_space<vmem>>, %arg9: memref<1x1xf32, #tpu.memory_space<vmem>>, %arg10: memref<8x1xf32, #tpu.memory_space<vmem>>, %arg11: memref<192x256xf32, #tpu.memory_space<vmem>>) attributes {dimension_semantics = [], scalar_prefetch = 0 : i64, scratch_operands = 1 : i64, tpu.core_type = #tpu.core_type<tc>} {
    %c0 = arith.constant 0 : index
    %c0_0 = arith.constant 0 : index
    %0 = vector.load %arg0[%c0, %c0_0] : memref<192x1xf32, #tpu.memory_space<vmem>>, vector<192x1xf32>
    %c0_1 = arith.constant 0 : index
    %c0_2 = arith.constant 0 : index
    %1 = vector.load %arg1[%c0_1, %c0_2] : memref<1x256xf32, #tpu.memory_space<vmem>>, vector<1x256xf32>
    %2 = vector.broadcast %0 : vector<192x1xf32> to vector<192x256xf32>
    %3 = vector.broadcast %1 : vector<1x256xf32> to vector<192x256xf32>
    %4 = arith.mulf %2, %3 : vector<192x256xf32>
    %c0_3 = arith.constant 0 : index
    %c0_4 = arith.constant 0 : index
    %5 = vector.load %arg2[%c0_3, %c0_4] : memref<1x256xf32, #tpu.memory_space<vmem>>, vector<1x256xf32>
    %6 = vector.broadcast %5 : vector<1x256xf32> to vector<192x256xf32>
    %7 = arith.addf %4, %6 : vector<192x256xf32>
    %c0_5 = arith.constant 0 : index
    %c0_6 = arith.constant 0 : index
    %8 = vector.load %arg11[%c0_5, %c0_6] : memref<192x256xf32, #tpu.memory_space<vmem>>, vector<192x256xf32>
    tpu.vector_store %arg11[%c0_5, %c0_6], %7 {strides = array<i32>} : memref<192x256xf32, #tpu.memory_space<vmem>>, vector<192x256xf32>,
    %9 = tpu.iota {dimensions = array<i32: 1>} : vector<8x256xi32>
    %c224_i32 = arith.constant 224 : i32
    %10 = vector.broadcast %c224_i32 : i32 to vector<8x256xi32>
    %11 = arith.cmpi slt, %9, %10 : vector<8x256xi32>
    %c0_7 = arith.constant 0 : index
    %c0_8 = arith.constant 0 : index
    %12 = vector.load %arg11[%c0_7, %c0_8] : memref<192x256xf32, #tpu.memory_space<vmem>>, vector<8x256xf32>
    %cst = arith.constant 0.000000e+00 : f32
    %13 = vector.broadcast %cst : f32 to vector<8x256xf32>
    %14 = arith.select %11, %12, %13 : vector<8x256xi1>, vector<8x256xf32>
    %cst_9 = arith.constant 0.000000e+00 : f32
    %15 = vector.broadcast %cst_9 : f32 to vector<8x64xf32>
    %16 = arith.negf %14 : vector<8x256xf32>
    %17 = math.exp %16 : vector<8x256xf32>
    %cst_10 = arith.constant 1.000000e+00 : f32
    %18 = vector.broadcast %cst_10 : f32 to vector<8x256xf32>
    %19 = arith.addf %18, %17 : vector<8x256xf32>
    %20 = arith.divf %18, %19 : vector<8x256xf32>
    %21 = vector.extract_strided_slice %20 {offsets = [0, 0], sizes = [8, 64], strides = [1, 1]} : vector<8x256xf32> to vector<8x64xf32>
    %22 = vector.extract_strided_slice %20 {offsets = [0, 64], sizes = [8, 64], strides = [1, 1]} : vector<8x256xf32> to vector<8x64xf32>
    %23 = vector.extract_strided_slice %20 {offsets = [0, 128], sizes = [8, 64], strides = [1, 1]} : vector<8x256xf32> to vector<8x64xf32>
    %24 = vector.extract_strided_slice %20 {offsets = [0, 192], sizes = [8, 64], strides = [1, 1]} : vector<8x256xf32> to vector<8x64xf32>
    %cst_11 = arith.constant 2.000000e+00 : f32
    %25 = vector.broadcast %cst_11 : f32 to vector<8x64xf32>
    %26 = arith.mulf %25, %24 : vector<8x64xf32>
    %cst_12 = arith.constant 1.000000e+00 : f32
    %27 = vector.broadcast %cst_12 : f32 to vector<8x64xf32>
    %28 = arith.subf %26, %27 : vector<8x64xf32>
    %29 = arith.mulf %22, %15 : vector<8x64xf32>
    %30 = arith.mulf %21, %28 : vector<8x64xf32>
    %31 = arith.addf %29, %30 : vector<8x64xf32>
    %32 = math.tanh %31 : vector<8x64xf32>
    %33 = arith.mulf %23, %32 : vector<8x64xf32>
    %c0_13 = arith.constant 0 : index
    %c0_14 = arith.constant 0 : index
    %34 = vector.load %arg3[%c0_13, %c0_14] : memref<64x256xf32, #tpu.memory_space<vmem>>, vector<64x256xf32>
    %cst_15 = arith.constant dense<0.000000e+00> : vector<8x256xf32>
    %35 = tpu.matmul %33, %34, %cst_15 {dimension_numbers = #tpu.dot_dimension_numbers<[1], [0], [0], [1], [0, 0, 1, 1], [], []>} : vector<8x64xf32>, vector<64x256xf32>, vector<8x256xf32> -> vector<8x256xf32>
    %c8 = arith.constant 8 : index
    %c0_16 = arith.constant 0 : index
    %36 = vector.load %arg11[%c8, %c0_16] : memref<192x256xf32, #tpu.memory_space<vmem>>, vector<8x256xf32>
    %37 = arith.addf %36, %35 : vector<8x256xf32>
    %38 = arith.negf %37 : vector<8x256xf32>
    %39 = math.exp %38 : vector<8x256xf32>
    %cst_17 = arith.constant 1.000000e+00 : f32
    %40 = vector.broadcast %cst_17 : f32 to vector<8x256xf32>
    %41 = arith.addf %40, %39 : vector<8x256xf32>
    %42 = arith.divf %40, %41 : vector<8x256xf32>
    %43 = vector.extract_strided_slice %42 {offsets = [0, 0], sizes = [8, 64], strides = [1, 1]} : vector<8x256xf32> to vector<8x64xf32>
    %44 = vector.extract_strided_slice %42 {offsets = [0, 64], sizes = [8, 64], strides = [1, 1]} : vector<8x256xf32> to vector<8x64xf32>
    %45 = vector.extract_strided_slice %42 {offsets = [0, 128], sizes = [8, 64], strides = [1, 1]} : vector<8x256xf32> to vector<8x64xf32>
    %46 = vector.extract_strided_slice %42 {offsets = [0, 192], sizes = [8, 64], strides = [1, 1]} : vector<8x256xf32> to vector<8x64xf32>
    %cst_18 = arith.constant 2.000000e+00 : f32
    %47 = vector.broadcast %cst_18 : f32 to vector<8x64xf32>
    %48 = arith.mulf %47, %46 : vector<8x64xf32>
    %cst_19 = arith.constant 1.000000e+00 : f32
    %49 = vector.broadcast %cst_19 : f32 to vector<8x64xf32>
    %50 = arith.subf %48, %49 : vector<8x64xf32>
    %51 = arith.mulf %44, %31 : vector<8x64xf32>
    %52 = arith.mulf %43, %50 : vector<8x64xf32>
    %53 = arith.addf %51, %52 : vector<8x64xf32>
    %54 = math.tanh %53 : vector<8x64xf32>
    %55 = arith.mulf %45, %54 : vector<8x64xf32>
    %c0_20 = arith.constant 0 : index
    %c0_21 = arith.constant 0 : index
    %56 = vector.load %arg3[%c0_20, %c0_21] : memref<64x256xf32, #tpu.memory_space<vmem>>, vector<64x256xf32>
    %cst_22 = arith.constant dense<0.000000e+00> : vector<8x256xf32>
    %57 = tpu.matmul %55, %56, %cst_22 {dimension_numbers = #tpu.dot_dimension_numbers<[1], [0], [0], [1], [0, 0, 1, 1], [], []>} : vector<8x64xf32>, vector<64x256xf32>, vector<8x256xf32> -> vector<8x256xf32>
    %c16 = arith.constant 16 : index
    %c0_23 = arith.constant 0 : index
    %58 = vector.load %arg11[%c16, %c0_23] : memref<192x256xf32, #tpu.memory_space<vmem>>, vector<8x256xf32>
    %59 = arith.addf %58, %57 : vector<8x256xf32>
    %60 = arith.negf %59 : vector<8x256xf32>
    %61 = math.exp %60 : vector<8x256xf32>
    %cst_24 = arith.constant 1.000000e+00 : f32
    %62 = vector.broadcast %cst_24 : f32 to vector<8x256xf32>
    %63 = arith.addf %62, %61 : vector<8x256xf32>
    %64 = arith.divf %62, %63 : vector<8x256xf32>
    %65 = vector.extract_strided_slice %64 {offsets = [0, 0], sizes = [8, 64], strides = [1, 1]} : vector<8x256xf32> to vector<8x64xf32>
    %66 = vector.extract_strided_slice %64 {offsets = [0, 64], sizes = [8, 64], strides = [1, 1]} : vector<8x256xf32> to vector<8x64xf32>
    %67 = vector.extract_strided_slice %64 {offsets = [0, 128], sizes = [8, 64], strides = [1, 1]} : vector<8x256xf32> to vector<8x64xf32>
    %68 = vector.extract_strided_slice %64 {offsets = [0, 192], sizes = [8, 64], strides = [1, 1]} : vector<8x256xf32> to vector<8x64xf32>
    %cst_25 = arith.constant 2.000000e+00 : f32
    %69 = vector.broadcast %cst_25 : f32 to vector<8x64xf32>
    %70 = arith.mulf %69, %68 : vector<8x64xf32>
    %cst_26 = arith.constant 1.000000e+00 : f32
    %71 = vector.broadcast %cst_26 : f32 to vector<8x64xf32>
    %72 = arith.subf %70, %71 : vector<8x64xf32>
    %73 = arith.mulf %66, %53 : vector<8x64xf32>
    %74 = arith.mulf %65, %72 : vector<8x64xf32>
    %75 = arith.addf %73, %74 : vector<8x64xf32>
    %76 = math.tanh %75 : vector<8x64xf32>
    %77 = arith.mulf %67, %76 : vector<8x64xf32>
    %c0_27 = arith.constant 0 : index
    %c0_28 = arith.constant 0 : index
    %78 = vector.load %arg3[%c0_27, %c0_28] : memref<64x256xf32, #tpu.memory_space<vmem>>, vector<64x256xf32>
    %cst_29 = arith.constant dense<0.000000e+00> : vector<8x256xf32>
    %79 = tpu.matmul %77, %78, %cst_29 {dimension_numbers = #tpu.dot_dimension_numbers<[1], [0], [0], [1], [0, 0, 1, 1], [], []>} : vector<8x64xf32>, vector<64x256xf32>, vector<8x256xf32> -> vector<8x256xf32>
    %c24 = arith.constant 24 : index
    %c0_30 = arith.constant 0 : index
    %80 = vector.load %arg11[%c24, %c0_30] : memref<192x256xf32, #tpu.memory_space<vmem>>, vector<8x256xf32>
    %81 = arith.addf %80, %79 : vector<8x256xf32>
    %82 = arith.negf %81 : vector<8x256xf32>
    %83 = math.exp %82 : vector<8x256xf32>
    %cst_31 = arith.constant 1.000000e+00 : f32
    %84 = vector.broadcast %cst_31 : f32 to vector<8x256xf32>
    %85 = arith.addf %84, %83 : vector<8x256xf32>
    %86 = arith.divf %84, %85 : vector<8x256xf32>
    %87 = vector.extract_strided_slice %86 {offsets = [0, 0], sizes = [8, 64], strides = [1, 1]} : vector<8x256xf32> to vector<8x64xf32>
    %88 = vector.extract_strided_slice %86 {offsets = [0, 64], sizes = [8, 64], strides = [1, 1]} : vector<8x256xf32> to vector<8x64xf32>
    %89 = vector.extract_strided_slice %86 {offsets = [0, 128], sizes = [8, 64], strides = [1, 1]} : vector<8x256xf32> to vector<8x64xf32>
    %90 = vector.extract_strided_slice %86 {offsets = [0, 192], sizes = [8, 64], strides = [1, 1]} : vector<8x256xf32> to vector<8x64xf32>
    %cst_32 = arith.constant 2.000000e+00 : f32
    %91 = vector.broadcast %cst_32 : f32 to vector<8x64xf32>
    %92 = arith.mulf %91, %90 : vector<8x64xf32>
    %cst_33 = arith.constant 1.000000e+00 : f32
    %93 = vector.broadcast %cst_33 : f32 to vector<8x64xf32>
    %94 = arith.subf %92, %93 : vector<8x64xf32>
    %95 = arith.mulf %88, %75 : vector<8x64xf32>
    %96 = arith.mulf %87, %94 : vector<8x64xf32>
    %97 = arith.addf %95, %96 : vector<8x64xf32>
    %98 = math.tanh %97 : vector<8x64xf32>
    %99 = arith.mulf %89, %98 : vector<8x64xf32>
    %c0_34 = arith.constant 0 : index
    %c0_35 = arith.constant 0 : index
    %100 = vector.load %arg3[%c0_34, %c0_35] : memref<64x256xf32, #tpu.memory_space<vmem>>, vector<64x256xf32>
    %cst_36 = arith.constant dense<0.000000e+00> : vector<8x256xf32>
    %101 = tpu.matmul %99, %100, %cst_36 {dimension_numbers = #tpu.dot_dimension_numbers<[1], [0], [0], [1], [0, 0, 1, 1], [], []>} : vector<8x64xf32>, vector<64x256xf32>, vector<8x256xf32> -> vector<8x256xf32>
    %c32 = arith.constant 32 : index
    %c0_37 = arith.constant 0 : index
    %102 = vector.load %arg11[%c32, %c0_37] : memref<192x256xf32, #tpu.memory_space<vmem>>, vector<8x256xf32>
    %103 = arith.addf %102, %101 : vector<8x256xf32>
    %104 = arith.negf %103 : vector<8x256xf32>
    %105 = math.exp %104 : vector<8x256xf32>
    %cst_38 = arith.constant 1.000000e+00 : f32
    %106 = vector.broadcast %cst_38 : f32 to vector<8x256xf32>
    %107 = arith.addf %106, %105 : vector<8x256xf32>
    %108 = arith.divf %106, %107 : vector<8x256xf32>
    %109 = vector.extract_strided_slice %108 {offsets = [0, 0], sizes = [8, 64], strides = [1, 1]} : vector<8x256xf32> to vector<8x64xf32>
    %110 = vector.extract_strided_slice %108 {offsets = [0, 64], sizes = [8, 64], strides = [1, 1]} : vector<8x256xf32> to vector<8x64xf32>
    %111 = vector.extract_strided_slice %108 {offsets = [0, 128], sizes = [8, 64], strides = [1, 1]} : vector<8x256xf32> to vector<8x64xf32>
    %112 = vector.extract_strided_slice %108 {offsets = [0, 192], sizes = [8, 64], strides = [1, 1]} : vector<8x256xf32> to vector<8x64xf32>
    %cst_39 = arith.constant 2.000000e+00 : f32
    %113 = vector.broadcast %cst_39 : f32 to vector<8x64xf32>
    %114 = arith.mulf %113, %112 : vector<8x64xf32>
    %cst_40 = arith.constant 1.000000e+00 : f32
    %115 = vector.broadcast %cst_40 : f32 to vector<8x64xf32>
    %116 = arith.subf %114, %115 : vector<8x64xf32>
    %117 = arith.mulf %110, %97 : vector<8x64xf32>
    %118 = arith.mulf %109, %116 : vector<8x64xf32>
    %119 = arith.addf %117, %118 : vector<8x64xf32>
    %120 = math.tanh %119 : vector<8x64xf32>
    %121 = arith.mulf %111, %120 : vector<8x64xf32>
    %c0_41 = arith.constant 0 : index
    %c0_42 = arith.constant 0 : index
    %122 = vector.load %arg3[%c0_41, %c0_42] : memref<64x256xf32, #tpu.memory_space<vmem>>, vector<64x256xf32>
    %cst_43 = arith.constant dense<0.000000e+00> : vector<8x256xf32>
    %123 = tpu.matmul %121, %122, %cst_43 {dimension_numbers = #tpu.dot_dimension_numbers<[1], [0], [0], [1], [0, 0, 1, 1], [], []>} : vector<8x64xf32>, vector<64x256xf32>, vector<8x256xf32> -> vector<8x256xf32>
    %c40 = arith.constant 40 : index
    %c0_44 = arith.constant 0 : index
    %124 = vector.load %arg11[%c40, %c0_44] : memref<192x256xf32, #tpu.memory_space<vmem>>, vector<8x256xf32>
    %125 = arith.addf %124, %123 : vector<8x256xf32>
    %126 = arith.negf %125 : vector<8x256xf32>
    %127 = math.exp %126 : vector<8x256xf32>
    %cst_45 = arith.constant 1.000000e+00 : f32
    %128 = vector.broadcast %cst_45 : f32 to vector<8x256xf32>
    %129 = arith.addf %128, %127 : vector<8x256xf32>
    %130 = arith.divf %128, %129 : vector<8x256xf32>
    %131 = vector.extract_strided_slice %130 {offsets = [0, 0], sizes = [8, 64], strides = [1, 1]} : vector<8x256xf32> to vector<8x64xf32>
    %132 = vector.extract_strided_slice %130 {offsets = [0, 64], sizes = [8, 64], strides = [1, 1]} : vector<8x256xf32> to vector<8x64xf32>
    %133 = vector.extract_strided_slice %130 {offsets = [0, 128], sizes = [8, 64], strides = [1, 1]} : vector<8x256xf32> to vector<8x64xf32>
    %134 = vector.extract_strided_slice %130 {offsets = [0, 192], sizes = [8, 64], strides = [1, 1]} : vector<8x256xf32> to vector<8x64xf32>
    %cst_46 = arith.constant 2.000000e+00 : f32
    %135 = vector.broadcast %cst_46 : f32 to vector<8x64xf32>
    %136 = arith.mulf %135, %134 : vector<8x64xf32>
    %cst_47 = arith.constant 1.000000e+00 : f32
    %137 = vector.broadcast %cst_47 : f32 to vector<8x64xf32>
    %138 = arith.subf %136, %137 : vector<8x64xf32>
    %139 = arith.mulf %132, %119 : vector<8x64xf32>
    %140 = arith.mulf %131, %138 : vector<8x64xf32>
    %141 = arith.addf %139, %140 : vector<8x64xf32>
    %142 = math.tanh %141 : vector<8x64xf32>
    %143 = arith.mulf %133, %142 : vector<8x64xf32>
    %c0_48 = arith.constant 0 : index
    %c0_49 = arith.constant 0 : index
    %144 = vector.load %arg3[%c0_48, %c0_49] : memref<64x256xf32, #tpu.memory_space<vmem>>, vector<64x256xf32>
    %cst_50 = arith.constant dense<0.000000e+00> : vector<8x256xf32>
    %145 = tpu.matmul %143, %144, %cst_50 {dimension_numbers = #tpu.dot_dimension_numbers<[1], [0], [0], [1], [0, 0, 1, 1], [], []>} : vector<8x64xf32>, vector<64x256xf32>, vector<8x256xf32> -> vector<8x256xf32>
    %c48 = arith.constant 48 : index
    %c0_51 = arith.constant 0 : index
    %146 = vector.load %arg11[%c48, %c0_51] : memref<192x256xf32, #tpu.memory_space<vmem>>, vector<8x256xf32>
    %147 = arith.addf %146, %145 : vector<8x256xf32>
    %148 = arith.negf %147 : vector<8x256xf32>
    %149 = math.exp %148 : vector<8x256xf32>
    %cst_52 = arith.constant 1.000000e+00 : f32
    %150 = vector.broadcast %cst_52 : f32 to vector<8x256xf32>
    %151 = arith.addf %150, %149 : vector<8x256xf32>
    %152 = arith.divf %150, %151 : vector<8x256xf32>
    %153 = vector.extract_strided_slice %152 {offsets = [0, 0], sizes = [8, 64], strides = [1, 1]} : vector<8x256xf32> to vector<8x64xf32>
    %154 = vector.extract_strided_slice %152 {offsets = [0, 64], sizes = [8, 64], strides = [1, 1]} : vector<8x256xf32> to vector<8x64xf32>
    %155 = vector.extract_strided_slice %152 {offsets = [0, 128], sizes = [8, 64], strides = [1, 1]} : vector<8x256xf32> to vector<8x64xf32>
    %156 = vector.extract_strided_slice %152 {offsets = [0, 192], sizes = [8, 64], strides = [1, 1]} : vector<8x256xf32> to vector<8x64xf32>
    %cst_53 = arith.constant 2.000000e+00 : f32
    %157 = vector.broadcast %cst_53 : f32 to vector<8x64xf32>
    %158 = arith.mulf %157, %156 : vector<8x64xf32>
    %cst_54 = arith.constant 1.000000e+00 : f32
    %159 = vector.broadcast %cst_54 : f32 to vector<8x64xf32>
    %160 = arith.subf %158, %159 : vector<8x64xf32>
    %161 = arith.mulf %154, %141 : vector<8x64xf32>
    %162 = arith.mulf %153, %160 : vector<8x64xf32>
    %163 = arith.addf %161, %162 : vector<8x64xf32>
    %164 = math.tanh %163 : vector<8x64xf32>
    %165 = arith.mulf %155, %164 : vector<8x64xf32>
    %c0_55 = arith.constant 0 : index
    %c0_56 = arith.constant 0 : index
    %166 = vector.load %arg3[%c0_55, %c0_56] : memref<64x256xf32, #tpu.memory_space<vmem>>, vector<64x256xf32>
    %cst_57 = arith.constant dense<0.000000e+00> : vector<8x256xf32>
    %167 = tpu.matmul %165, %166, %cst_57 {dimension_numbers = #tpu.dot_dimension_numbers<[1], [0], [0], [1], [0, 0, 1, 1], [], []>} : vector<8x64xf32>, vector<64x256xf32>, vector<8x256xf32> -> vector<8x256xf32>
    %c56 = arith.constant 56 : index
    %c0_58 = arith.constant 0 : index
    %168 = vector.load %arg11[%c56, %c0_58] : memref<192x256xf32, #tpu.memory_space<vmem>>, vector<8x256xf32>
    %169 = arith.addf %168, %167 : vector<8x256xf32>
    %170 = arith.negf %169 : vector<8x256xf32>
    %171 = math.exp %170 : vector<8x256xf32>
    %cst_59 = arith.constant 1.000000e+00 : f32
    %172 = vector.broadcast %cst_59 : f32 to vector<8x256xf32>
    %173 = arith.addf %172, %171 : vector<8x256xf32>
    %174 = arith.divf %172, %173 : vector<8x256xf32>
    %175 = vector.extract_strided_slice %174 {offsets = [0, 0], sizes = [8, 64], strides = [1, 1]} : vector<8x256xf32> to vector<8x64xf32>
    %176 = vector.extract_strided_slice %174 {offsets = [0, 64], sizes = [8, 64], strides = [1, 1]} : vector<8x256xf32> to vector<8x64xf32>
    %177 = vector.extract_strided_slice %174 {offsets = [0, 128], sizes = [8, 64], strides = [1, 1]} : vector<8x256xf32> to vector<8x64xf32>
    %178 = vector.extract_strided_slice %174 {offsets = [0, 192], sizes = [8, 64], strides = [1, 1]} : vector<8x256xf32> to vector<8x64xf32>
    %cst_60 = arith.constant 2.000000e+00 : f32
    %179 = vector.broadcast %cst_60 : f32 to vector<8x64xf32>
    %180 = arith.mulf %179, %178 : vector<8x64xf32>
    %cst_61 = arith.constant 1.000000e+00 : f32
    %181 = vector.broadcast %cst_61 : f32 to vector<8x64xf32>
    %182 = arith.subf %180, %181 : vector<8x64xf32>
    %183 = arith.mulf %176, %163 : vector<8x64xf32>
    %184 = arith.mulf %175, %182 : vector<8x64xf32>
    %185 = arith.addf %183, %184 : vector<8x64xf32>
    %186 = math.tanh %185 : vector<8x64xf32>
    %187 = arith.mulf %177, %186 : vector<8x64xf32>
    %c0_62 = arith.constant 0 : index
    %c0_63 = arith.constant 0 : index
    %188 = vector.load %arg3[%c0_62, %c0_63] : memref<64x256xf32, #tpu.memory_space<vmem>>, vector<64x256xf32>
    %cst_64 = arith.constant dense<0.000000e+00> : vector<8x256xf32>
    %189 = tpu.matmul %187, %188, %cst_64 {dimension_numbers = #tpu.dot_dimension_numbers<[1], [0], [0], [1], [0, 0, 1, 1], [], []>} : vector<8x64xf32>, vector<64x256xf32>, vector<8x256xf32> -> vector<8x256xf32>
    %c64 = arith.constant 64 : index
    %c0_65 = arith.constant 0 : index
    %190 = vector.load %arg11[%c64, %c0_65] : memref<192x256xf32, #tpu.memory_space<vmem>>, vector<8x256xf32>
    %191 = arith.addf %190, %189 : vector<8x256xf32>
    %192 = arith.negf %191 : vector<8x256xf32>
    %193 = math.exp %192 : vector<8x256xf32>
    %cst_66 = arith.constant 1.000000e+00 : f32
    %194 = vector.broadcast %cst_66 : f32 to vector<8x256xf32>
    %195 = arith.addf %194, %193 : vector<8x256xf32>
    %196 = arith.divf %194, %195 : vector<8x256xf32>
    %197 = vector.extract_strided_slice %196 {offsets = [0, 0], sizes = [8, 64], strides = [1, 1]} : vector<8x256xf32> to vector<8x64xf32>
    %198 = vector.extract_strided_slice %196 {offsets = [0, 64], sizes = [8, 64], strides = [1, 1]} : vector<8x256xf32> to vector<8x64xf32>
    %199 = vector.extract_strided_slice %196 {offsets = [0, 128], sizes = [8, 64], strides = [1, 1]} : vector<8x256xf32> to vector<8x64xf32>
    %200 = vector.extract_strided_slice %196 {offsets = [0, 192], sizes = [8, 64], strides = [1, 1]} : vector<8x256xf32> to vector<8x64xf32>
    %cst_67 = arith.constant 2.000000e+00 : f32
    %201 = vector.broadcast %cst_67 : f32 to vector<8x64xf32>
    %202 = arith.mulf %201, %200 : vector<8x64xf32>
    %cst_68 = arith.constant 1.000000e+00 : f32
    %203 = vector.broadcast %cst_68 : f32 to vector<8x64xf32>
    %204 = arith.subf %202, %203 : vector<8x64xf32>
    %205 = arith.mulf %198, %185 : vector<8x64xf32>
    %206 = arith.mulf %197, %204 : vector<8x64xf32>
    %207 = arith.addf %205, %206 : vector<8x64xf32>
    %208 = math.tanh %207 : vector<8x64xf32>
    %209 = arith.mulf %199, %208 : vector<8x64xf32>
    %c0_69 = arith.constant 0 : index
    %c0_70 = arith.constant 0 : index
    %210 = vector.load %arg3[%c0_69, %c0_70] : memref<64x256xf32, #tpu.memory_space<vmem>>, vector<64x256xf32>
    %cst_71 = arith.constant dense<0.000000e+00> : vector<8x256xf32>
    %211 = tpu.matmul %209, %210, %cst_71 {dimension_numbers = #tpu.dot_dimension_numbers<[1], [0], [0], [1], [0, 0, 1, 1], [], []>} : vector<8x64xf32>, vector<64x256xf32>, vector<8x256xf32> -> vector<8x256xf32>
    %c72 = arith.constant 72 : index
    %c0_72 = arith.constant 0 : index
    %212 = vector.load %arg11[%c72, %c0_72] : memref<192x256xf32, #tpu.memory_space<vmem>>, vector<8x256xf32>
    %213 = arith.addf %212, %211 : vector<8x256xf32>
    %214 = arith.negf %213 : vector<8x256xf32>
    %215 = math.exp %214 : vector<8x256xf32>
    %cst_73 = arith.constant 1.000000e+00 : f32
    %216 = vector.broadcast %cst_73 : f32 to vector<8x256xf32>
    %217 = arith.addf %216, %215 : vector<8x256xf32>
    %218 = arith.divf %216, %217 : vector<8x256xf32>
    %219 = vector.extract_strided_slice %218 {offsets = [0, 0], sizes = [8, 64], strides = [1, 1]} : vector<8x256xf32> to vector<8x64xf32>
    %220 = vector.extract_strided_slice %218 {offsets = [0, 64], sizes = [8, 64], strides = [1, 1]} : vector<8x256xf32> to vector<8x64xf32>
    %221 = vector.extract_strided_slice %218 {offsets = [0, 128], sizes = [8, 64], strides = [1, 1]} : vector<8x256xf32> to vector<8x64xf32>
    %222 = vector.extract_strided_slice %218 {offsets = [0, 192], sizes = [8, 64], strides = [1, 1]} : vector<8x256xf32> to vector<8x64xf32>
    %cst_74 = arith.constant 2.000000e+00 : f32
    %223 = vector.broadcast %cst_74 : f32 to vector<8x64xf32>
    %224 = arith.mulf %223, %222 : vector<8x64xf32>
    %cst_75 = arith.constant 1.000000e+00 : f32
    %225 = vector.broadcast %cst_75 : f32 to vector<8x64xf32>
    %226 = arith.subf %224, %225 : vector<8x64xf32>
    %227 = arith.mulf %220, %207 : vector<8x64xf32>
    %228 = arith.mulf %219, %226 : vector<8x64xf32>
    %229 = arith.addf %227, %228 : vector<8x64xf32>
    %230 = math.tanh %229 : vector<8x64xf32>
    %231 = arith.mulf %221, %230 : vector<8x64xf32>
    %c0_76 = arith.constant 0 : index
    %c0_77 = arith.constant 0 : index
    %232 = vector.load %arg3[%c0_76, %c0_77] : memref<64x256xf32, #tpu.memory_space<vmem>>, vector<64x256xf32>
    %cst_78 = arith.constant dense<0.000000e+00> : vector<8x256xf32>
    %233 = tpu.matmul %231, %232, %cst_78 {dimension_numbers = #tpu.dot_dimension_numbers<[1], [0], [0], [1], [0, 0, 1, 1], [], []>} : vector<8x64xf32>, vector<64x256xf32>, vector<8x256xf32> -> vector<8x256xf32>
    %c80 = arith.constant 80 : index
    %c0_79 = arith.constant 0 : index
    %234 = vector.load %arg11[%c80, %c0_79] : memref<192x256xf32, #tpu.memory_space<vmem>>, vector<8x256xf32>
    %235 = arith.addf %234, %233 : vector<8x256xf32>
    %236 = arith.negf %235 : vector<8x256xf32>
    %237 = math.exp %236 : vector<8x256xf32>
    %cst_80 = arith.constant 1.000000e+00 : f32
    %238 = vector.broadcast %cst_80 : f32 to vector<8x256xf32>
    %239 = arith.addf %238, %237 : vector<8x256xf32>
    %240 = arith.divf %238, %239 : vector<8x256xf32>
    %241 = vector.extract_strided_slice %240 {offsets = [0, 0], sizes = [8, 64], strides = [1, 1]} : vector<8x256xf32> to vector<8x64xf32>
    %242 = vector.extract_strided_slice %240 {offsets = [0, 64], sizes = [8, 64], strides = [1, 1]} : vector<8x256xf32> to vector<8x64xf32>
    %243 = vector.extract_strided_slice %240 {offsets = [0, 128], sizes = [8, 64], strides = [1, 1]} : vector<8x256xf32> to vector<8x64xf32>
    %244 = vector.extract_strided_slice %240 {offsets = [0, 192], sizes = [8, 64], strides = [1, 1]} : vector<8x256xf32> to vector<8x64xf32>
    %cst_81 = arith.constant 2.000000e+00 : f32
    %245 = vector.broadcast %cst_81 : f32 to vector<8x64xf32>
    %246 = arith.mulf %245, %244 : vector<8x64xf32>
    %cst_82 = arith.constant 1.000000e+00 : f32
    %247 = vector.broadcast %cst_82 : f32 to vector<8x64xf32>
    %248 = arith.subf %246, %247 : vector<8x64xf32>
    %249 = arith.mulf %242, %229 : vector<8x64xf32>
    %250 = arith.mulf %241, %248 : vector<8x64xf32>
    %251 = arith.addf %249, %250 : vector<8x64xf32>
    %252 = math.tanh %251 : vector<8x64xf32>
    %253 = arith.mulf %243, %252 : vector<8x64xf32>
    %c0_83 = arith.constant 0 : index
    %c0_84 = arith.constant 0 : index
    %254 = vector.load %arg3[%c0_83, %c0_84] : memref<64x256xf32, #tpu.memory_space<vmem>>, vector<64x256xf32>
    %cst_85 = arith.constant dense<0.000000e+00> : vector<8x256xf32>
    %255 = tpu.matmul %253, %254, %cst_85 {dimension_numbers = #tpu.dot_dimension_numbers<[1], [0], [0], [1], [0, 0, 1, 1], [], []>} : vector<8x64xf32>, vector<64x256xf32>, vector<8x256xf32> -> vector<8x256xf32>
    %c88 = arith.constant 88 : index
    %c0_86 = arith.constant 0 : index
    %256 = vector.load %arg11[%c88, %c0_86] : memref<192x256xf32, #tpu.memory_space<vmem>>, vector<8x256xf32>
    %257 = arith.addf %256, %255 : vector<8x256xf32>
    %258 = arith.negf %257 : vector<8x256xf32>
    %259 = math.exp %258 : vector<8x256xf32>
    %cst_87 = arith.constant 1.000000e+00 : f32
    %260 = vector.broadcast %cst_87 : f32 to vector<8x256xf32>
    %261 = arith.addf %260, %259 : vector<8x256xf32>
    %262 = arith.divf %260, %261 : vector<8x256xf32>
    %263 = vector.extract_strided_slice %262 {offsets = [0, 0], sizes = [8, 64], strides = [1, 1]} : vector<8x256xf32> to vector<8x64xf32>
    %264 = vector.extract_strided_slice %262 {offsets = [0, 64], sizes = [8, 64], strides = [1, 1]} : vector<8x256xf32> to vector<8x64xf32>
    %265 = vector.extract_strided_slice %262 {offsets = [0, 128], sizes = [8, 64], strides = [1, 1]} : vector<8x256xf32> to vector<8x64xf32>
    %266 = vector.extract_strided_slice %262 {offsets = [0, 192], sizes = [8, 64], strides = [1, 1]} : vector<8x256xf32> to vector<8x64xf32>
    %cst_88 = arith.constant 2.000000e+00 : f32
    %267 = vector.broadcast %cst_88 : f32 to vector<8x64xf32>
    %268 = arith.mulf %267, %266 : vector<8x64xf32>
    %cst_89 = arith.constant 1.000000e+00 : f32
    %269 = vector.broadcast %cst_89 : f32 to vector<8x64xf32>
    %270 = arith.subf %268, %269 : vector<8x64xf32>
    %271 = arith.mulf %264, %251 : vector<8x64xf32>
    %272 = arith.mulf %263, %270 : vector<8x64xf32>
    %273 = arith.addf %271, %272 : vector<8x64xf32>
    %274 = math.tanh %273 : vector<8x64xf32>
    %275 = arith.mulf %265, %274 : vector<8x64xf32>
    %c0_90 = arith.constant 0 : index
    %c0_91 = arith.constant 0 : index
    %276 = vector.load %arg3[%c0_90, %c0_91] : memref<64x256xf32, #tpu.memory_space<vmem>>, vector<64x256xf32>
    %cst_92 = arith.constant dense<0.000000e+00> : vector<8x256xf32>
    %277 = tpu.matmul %275, %276, %cst_92 {dimension_numbers = #tpu.dot_dimension_numbers<[1], [0], [0], [1], [0, 0, 1, 1], [], []>} : vector<8x64xf32>, vector<64x256xf32>, vector<8x256xf32> -> vector<8x256xf32>
    %c96 = arith.constant 96 : index
    %c0_93 = arith.constant 0 : index
    %278 = vector.load %arg11[%c96, %c0_93] : memref<192x256xf32, #tpu.memory_space<vmem>>, vector<8x256xf32>
    %279 = arith.addf %278, %277 : vector<8x256xf32>
    %280 = arith.negf %279 : vector<8x256xf32>
    %281 = math.exp %280 : vector<8x256xf32>
    %cst_94 = arith.constant 1.000000e+00 : f32
    %282 = vector.broadcast %cst_94 : f32 to vector<8x256xf32>
    %283 = arith.addf %282, %281 : vector<8x256xf32>
    %284 = arith.divf %282, %283 : vector<8x256xf32>
    %285 = vector.extract_strided_slice %284 {offsets = [0, 0], sizes = [8, 64], strides = [1, 1]} : vector<8x256xf32> to vector<8x64xf32>
    %286 = vector.extract_strided_slice %284 {offsets = [0, 64], sizes = [8, 64], strides = [1, 1]} : vector<8x256xf32> to vector<8x64xf32>
    %287 = vector.extract_strided_slice %284 {offsets = [0, 128], sizes = [8, 64], strides = [1, 1]} : vector<8x256xf32> to vector<8x64xf32>
    %288 = vector.extract_strided_slice %284 {offsets = [0, 192], sizes = [8, 64], strides = [1, 1]} : vector<8x256xf32> to vector<8x64xf32>
    %cst_95 = arith.constant 2.000000e+00 : f32
    %289 = vector.broadcast %cst_95 : f32 to vector<8x64xf32>
    %290 = arith.mulf %289, %288 : vector<8x64xf32>
    %cst_96 = arith.constant 1.000000e+00 : f32
    %291 = vector.broadcast %cst_96 : f32 to vector<8x64xf32>
    %292 = arith.subf %290, %291 : vector<8x64xf32>
    %293 = arith.mulf %286, %273 : vector<8x64xf32>
    %294 = arith.mulf %285, %292 : vector<8x64xf32>
    %295 = arith.addf %293, %294 : vector<8x64xf32>
    %296 = math.tanh %295 : vector<8x64xf32>
    %297 = arith.mulf %287, %296 : vector<8x64xf32>
    %c0_97 = arith.constant 0 : index
    %c0_98 = arith.constant 0 : index
    %298 = vector.load %arg3[%c0_97, %c0_98] : memref<64x256xf32, #tpu.memory_space<vmem>>, vector<64x256xf32>
    %cst_99 = arith.constant dense<0.000000e+00> : vector<8x256xf32>
    %299 = tpu.matmul %297, %298, %cst_99 {dimension_numbers = #tpu.dot_dimension_numbers<[1], [0], [0], [1], [0, 0, 1, 1], [], []>} : vector<8x64xf32>, vector<64x256xf32>, vector<8x256xf32> -> vector<8x256xf32>
    %c104 = arith.constant 104 : index
    %c0_100 = arith.constant 0 : index
    %300 = vector.load %arg11[%c104, %c0_100] : memref<192x256xf32, #tpu.memory_space<vmem>>, vector<8x256xf32>
    %301 = arith.addf %300, %299 : vector<8x256xf32>
    %302 = arith.negf %301 : vector<8x256xf32>
    %303 = math.exp %302 : vector<8x256xf32>
    %cst_101 = arith.constant 1.000000e+00 : f32
    %304 = vector.broadcast %cst_101 : f32 to vector<8x256xf32>
    %305 = arith.addf %304, %303 : vector<8x256xf32>
    %306 = arith.divf %304, %305 : vector<8x256xf32>
    %307 = vector.extract_strided_slice %306 {offsets = [0, 0], sizes = [8, 64], strides = [1, 1]} : vector<8x256xf32> to vector<8x64xf32>
    %308 = vector.extract_strided_slice %306 {offsets = [0, 64], sizes = [8, 64], strides = [1, 1]} : vector<8x256xf32> to vector<8x64xf32>
    %309 = vector.extract_strided_slice %306 {offsets = [0, 128], sizes = [8, 64], strides = [1, 1]} : vector<8x256xf32> to vector<8x64xf32>
    %310 = vector.extract_strided_slice %306 {offsets = [0, 192], sizes = [8, 64], strides = [1, 1]} : vector<8x256xf32> to vector<8x64xf32>
    %cst_102 = arith.constant 2.000000e+00 : f32
    %311 = vector.broadcast %cst_102 : f32 to vector<8x64xf32>
    %312 = arith.mulf %311, %310 : vector<8x64xf32>
    %cst_103 = arith.constant 1.000000e+00 : f32
    %313 = vector.broadcast %cst_103 : f32 to vector<8x64xf32>
    %314 = arith.subf %312, %313 : vector<8x64xf32>
    %315 = arith.mulf %308, %295 : vector<8x64xf32>
    %316 = arith.mulf %307, %314 : vector<8x64xf32>
    %317 = arith.addf %315, %316 : vector<8x64xf32>
    %318 = math.tanh %317 : vector<8x64xf32>
    %319 = arith.mulf %309, %318 : vector<8x64xf32>
    %c0_104 = arith.constant 0 : index
    %c0_105 = arith.constant 0 : index
    %320 = vector.load %arg3[%c0_104, %c0_105] : memref<64x256xf32, #tpu.memory_space<vmem>>, vector<64x256xf32>
    %cst_106 = arith.constant dense<0.000000e+00> : vector<8x256xf32>
    %321 = tpu.matmul %319, %320, %cst_106 {dimension_numbers = #tpu.dot_dimension_numbers<[1], [0], [0], [1], [0, 0, 1, 1], [], []>} : vector<8x64xf32>, vector<64x256xf32>, vector<8x256xf32> -> vector<8x256xf32>
    %c112 = arith.constant 112 : index
    %c0_107 = arith.constant 0 : index
    %322 = vector.load %arg11[%c112, %c0_107] : memref<192x256xf32, #tpu.memory_space<vmem>>, vector<8x256xf32>
    %323 = arith.addf %322, %321 : vector<8x256xf32>
    %324 = arith.negf %323 : vector<8x256xf32>
    %325 = math.exp %324 : vector<8x256xf32>
    %cst_108 = arith.constant 1.000000e+00 : f32
    %326 = vector.broadcast %cst_108 : f32 to vector<8x256xf32>
    %327 = arith.addf %326, %325 : vector<8x256xf32>
    %328 = arith.divf %326, %327 : vector<8x256xf32>
    %329 = vector.extract_strided_slice %328 {offsets = [0, 0], sizes = [8, 64], strides = [1, 1]} : vector<8x256xf32> to vector<8x64xf32>
    %330 = vector.extract_strided_slice %328 {offsets = [0, 64], sizes = [8, 64], strides = [1, 1]} : vector<8x256xf32> to vector<8x64xf32>
    %331 = vector.extract_strided_slice %328 {offsets = [0, 128], sizes = [8, 64], strides = [1, 1]} : vector<8x256xf32> to vector<8x64xf32>
    %332 = vector.extract_strided_slice %328 {offsets = [0, 192], sizes = [8, 64], strides = [1, 1]} : vector<8x256xf32> to vector<8x64xf32>
    %cst_109 = arith.constant 2.000000e+00 : f32
    %333 = vector.broadcast %cst_109 : f32 to vector<8x64xf32>
    %334 = arith.mulf %333, %332 : vector<8x64xf32>
    %cst_110 = arith.constant 1.000000e+00 : f32
    %335 = vector.broadcast %cst_110 : f32 to vector<8x64xf32>
    %336 = arith.subf %334, %335 : vector<8x64xf32>
    %337 = arith.mulf %330, %317 : vector<8x64xf32>
    %338 = arith.mulf %329, %336 : vector<8x64xf32>
    %339 = arith.addf %337, %338 : vector<8x64xf32>
    %340 = math.tanh %339 : vector<8x64xf32>
    %341 = arith.mulf %331, %340 : vector<8x64xf32>
    %c0_111 = arith.constant 0 : index
    %c0_112 = arith.constant 0 : index
    %342 = vector.load %arg3[%c0_111, %c0_112] : memref<64x256xf32, #tpu.memory_space<vmem>>, vector<64x256xf32>
    %cst_113 = arith.constant dense<0.000000e+00> : vector<8x256xf32>
    %343 = tpu.matmul %341, %342, %cst_113 {dimension_numbers = #tpu.dot_dimension_numbers<[1], [0], [0], [1], [0, 0, 1, 1], [], []>} : vector<8x64xf32>, vector<64x256xf32>, vector<8x256xf32> -> vector<8x256xf32>
    %c120 = arith.constant 120 : index
    %c0_114 = arith.constant 0 : index
    %344 = vector.load %arg11[%c120, %c0_114] : memref<192x256xf32, #tpu.memory_space<vmem>>, vector<8x256xf32>
    %345 = arith.addf %344, %343 : vector<8x256xf32>
    %346 = arith.negf %345 : vector<8x256xf32>
    %347 = math.exp %346 : vector<8x256xf32>
    %cst_115 = arith.constant 1.000000e+00 : f32
    %348 = vector.broadcast %cst_115 : f32 to vector<8x256xf32>
    %349 = arith.addf %348, %347 : vector<8x256xf32>
    %350 = arith.divf %348, %349 : vector<8x256xf32>
    %351 = vector.extract_strided_slice %350 {offsets = [0, 0], sizes = [8, 64], strides = [1, 1]} : vector<8x256xf32> to vector<8x64xf32>
    %352 = vector.extract_strided_slice %350 {offsets = [0, 64], sizes = [8, 64], strides = [1, 1]} : vector<8x256xf32> to vector<8x64xf32>
    %353 = vector.extract_strided_slice %350 {offsets = [0, 128], sizes = [8, 64], strides = [1, 1]} : vector<8x256xf32> to vector<8x64xf32>
    %354 = vector.extract_strided_slice %350 {offsets = [0, 192], sizes = [8, 64], strides = [1, 1]} : vector<8x256xf32> to vector<8x64xf32>
    %cst_116 = arith.constant 2.000000e+00 : f32
    %355 = vector.broadcast %cst_116 : f32 to vector<8x64xf32>
    %356 = arith.mulf %355, %354 : vector<8x64xf32>
    %cst_117 = arith.constant 1.000000e+00 : f32
    %357 = vector.broadcast %cst_117 : f32 to vector<8x64xf32>
    %358 = arith.subf %356, %357 : vector<8x64xf32>
    %359 = arith.mulf %352, %339 : vector<8x64xf32>
    %360 = arith.mulf %351, %358 : vector<8x64xf32>
    %361 = arith.addf %359, %360 : vector<8x64xf32>
    %362 = math.tanh %361 : vector<8x64xf32>
    %363 = arith.mulf %353, %362 : vector<8x64xf32>
    %c0_118 = arith.constant 0 : index
    %c0_119 = arith.constant 0 : index
    %364 = vector.load %arg3[%c0_118, %c0_119] : memref<64x256xf32, #tpu.memory_space<vmem>>, vector<64x256xf32>
    %cst_120 = arith.constant dense<0.000000e+00> : vector<8x256xf32>
    %365 = tpu.matmul %363, %364, %cst_120 {dimension_numbers = #tpu.dot_dimension_numbers<[1], [0], [0], [1], [0, 0, 1, 1], [], []>} : vector<8x64xf32>, vector<64x256xf32>, vector<8x256xf32> -> vector<8x256xf32>
    %c128 = arith.constant 128 : index
    %c0_121 = arith.constant 0 : index
    %366 = vector.load %arg11[%c128, %c0_121] : memref<192x256xf32, #tpu.memory_space<vmem>>, vector<8x256xf32>
    %367 = arith.addf %366, %365 : vector<8x256xf32>
    %368 = arith.negf %367 : vector<8x256xf32>
    %369 = math.exp %368 : vector<8x256xf32>
    %cst_122 = arith.constant 1.000000e+00 : f32
    %370 = vector.broadcast %cst_122 : f32 to vector<8x256xf32>
    %371 = arith.addf %370, %369 : vector<8x256xf32>
    %372 = arith.divf %370, %371 : vector<8x256xf32>
    %373 = vector.extract_strided_slice %372 {offsets = [0, 0], sizes = [8, 64], strides = [1, 1]} : vector<8x256xf32> to vector<8x64xf32>
    %374 = vector.extract_strided_slice %372 {offsets = [0, 64], sizes = [8, 64], strides = [1, 1]} : vector<8x256xf32> to vector<8x64xf32>
    %375 = vector.extract_strided_slice %372 {offsets = [0, 128], sizes = [8, 64], strides = [1, 1]} : vector<8x256xf32> to vector<8x64xf32>
    %376 = vector.extract_strided_slice %372 {offsets = [0, 192], sizes = [8, 64], strides = [1, 1]} : vector<8x256xf32> to vector<8x64xf32>
    %cst_123 = arith.constant 2.000000e+00 : f32
    %377 = vector.broadcast %cst_123 : f32 to vector<8x64xf32>
    %378 = arith.mulf %377, %376 : vector<8x64xf32>
    %cst_124 = arith.constant 1.000000e+00 : f32
    %379 = vector.broadcast %cst_124 : f32 to vector<8x64xf32>
    %380 = arith.subf %378, %379 : vector<8x64xf32>
    %381 = arith.mulf %374, %361 : vector<8x64xf32>
    %382 = arith.mulf %373, %380 : vector<8x64xf32>
    %383 = arith.addf %381, %382 : vector<8x64xf32>
    %384 = math.tanh %383 : vector<8x64xf32>
    %385 = arith.mulf %375, %384 : vector<8x64xf32>
    %c0_125 = arith.constant 0 : index
    %c0_126 = arith.constant 0 : index
    %386 = vector.load %arg3[%c0_125, %c0_126] : memref<64x256xf32, #tpu.memory_space<vmem>>, vector<64x256xf32>
    %cst_127 = arith.constant dense<0.000000e+00> : vector<8x256xf32>
    %387 = tpu.matmul %385, %386, %cst_127 {dimension_numbers = #tpu.dot_dimension_numbers<[1], [0], [0], [1], [0, 0, 1, 1], [], []>} : vector<8x64xf32>, vector<64x256xf32>, vector<8x256xf32> -> vector<8x256xf32>
    %c136 = arith.constant 136 : index
    %c0_128 = arith.constant 0 : index
    %388 = vector.load %arg11[%c136, %c0_128] : memref<192x256xf32, #tpu.memory_space<vmem>>, vector<8x256xf32>
    %389 = arith.addf %388, %387 : vector<8x256xf32>
    %390 = arith.negf %389 : vector<8x256xf32>
    %391 = math.exp %390 : vector<8x256xf32>
    %cst_129 = arith.constant 1.000000e+00 : f32
    %392 = vector.broadcast %cst_129 : f32 to vector<8x256xf32>
    %393 = arith.addf %392, %391 : vector<8x256xf32>
    %394 = arith.divf %392, %393 : vector<8x256xf32>
    %395 = vector.extract_strided_slice %394 {offsets = [0, 0], sizes = [8, 64], strides = [1, 1]} : vector<8x256xf32> to vector<8x64xf32>
    %396 = vector.extract_strided_slice %394 {offsets = [0, 64], sizes = [8, 64], strides = [1, 1]} : vector<8x256xf32> to vector<8x64xf32>
    %397 = vector.extract_strided_slice %394 {offsets = [0, 128], sizes = [8, 64], strides = [1, 1]} : vector<8x256xf32> to vector<8x64xf32>
    %398 = vector.extract_strided_slice %394 {offsets = [0, 192], sizes = [8, 64], strides = [1, 1]} : vector<8x256xf32> to vector<8x64xf32>
    %cst_130 = arith.constant 2.000000e+00 : f32
    %399 = vector.broadcast %cst_130 : f32 to vector<8x64xf32>
    %400 = arith.mulf %399, %398 : vector<8x64xf32>
    %cst_131 = arith.constant 1.000000e+00 : f32
    %401 = vector.broadcast %cst_131 : f32 to vector<8x64xf32>
    %402 = arith.subf %400, %401 : vector<8x64xf32>
    %403 = arith.mulf %396, %383 : vector<8x64xf32>
    %404 = arith.mulf %395, %402 : vector<8x64xf32>
    %405 = arith.addf %403, %404 : vector<8x64xf32>
    %406 = math.tanh %405 : vector<8x64xf32>
    %407 = arith.mulf %397, %406 : vector<8x64xf32>
    %c0_132 = arith.constant 0 : index
    %c0_133 = arith.constant 0 : index
    %408 = vector.load %arg3[%c0_132, %c0_133] : memref<64x256xf32, #tpu.memory_space<vmem>>, vector<64x256xf32>
    %cst_134 = arith.constant dense<0.000000e+00> : vector<8x256xf32>
    %409 = tpu.matmul %407, %408, %cst_134 {dimension_numbers = #tpu.dot_dimension_numbers<[1], [0], [0], [1], [0, 0, 1, 1], [], []>} : vector<8x64xf32>, vector<64x256xf32>, vector<8x256xf32> -> vector<8x256xf32>
    %c144 = arith.constant 144 : index
    %c0_135 = arith.constant 0 : index
    %410 = vector.load %arg11[%c144, %c0_135] : memref<192x256xf32, #tpu.memory_space<vmem>>, vector<8x256xf32>
    %411 = arith.addf %410, %409 : vector<8x256xf32>
    %412 = arith.negf %411 : vector<8x256xf32>
    %413 = math.exp %412 : vector<8x256xf32>
    %cst_136 = arith.constant 1.000000e+00 : f32
    %414 = vector.broadcast %cst_136 : f32 to vector<8x256xf32>
    %415 = arith.addf %414, %413 : vector<8x256xf32>
    %416 = arith.divf %414, %415 : vector<8x256xf32>
    %417 = vector.extract_strided_slice %416 {offsets = [0, 0], sizes = [8, 64], strides = [1, 1]} : vector<8x256xf32> to vector<8x64xf32>
    %418 = vector.extract_strided_slice %416 {offsets = [0, 64], sizes = [8, 64], strides = [1, 1]} : vector<8x256xf32> to vector<8x64xf32>
    %419 = vector.extract_strided_slice %416 {offsets = [0, 128], sizes = [8, 64], strides = [1, 1]} : vector<8x256xf32> to vector<8x64xf32>
    %420 = vector.extract_strided_slice %416 {offsets = [0, 192], sizes = [8, 64], strides = [1, 1]} : vector<8x256xf32> to vector<8x64xf32>
    %cst_137 = arith.constant 2.000000e+00 : f32
    %421 = vector.broadcast %cst_137 : f32 to vector<8x64xf32>
    %422 = arith.mulf %421, %420 : vector<8x64xf32>
    %cst_138 = arith.constant 1.000000e+00 : f32
    %423 = vector.broadcast %cst_138 : f32 to vector<8x64xf32>
    %424 = arith.subf %422, %423 : vector<8x64xf32>
    %425 = arith.mulf %418, %405 : vector<8x64xf32>
    %426 = arith.mulf %417, %424 : vector<8x64xf32>
    %427 = arith.addf %425, %426 : vector<8x64xf32>
    %428 = math.tanh %427 : vector<8x64xf32>
    %429 = arith.mulf %419, %428 : vector<8x64xf32>
    %c0_139 = arith.constant 0 : index
    %c0_140 = arith.constant 0 : index
    %430 = vector.load %arg3[%c0_139, %c0_140] : memref<64x256xf32, #tpu.memory_space<vmem>>, vector<64x256xf32>
    %cst_141 = arith.constant dense<0.000000e+00> : vector<8x256xf32>
    %431 = tpu.matmul %429, %430, %cst_141 {dimension_numbers = #tpu.dot_dimension_numbers<[1], [0], [0], [1], [0, 0, 1, 1], [], []>} : vector<8x64xf32>, vector<64x256xf32>, vector<8x256xf32> -> vector<8x256xf32>
    %c152 = arith.constant 152 : index
    %c0_142 = arith.constant 0 : index
    %432 = vector.load %arg11[%c152, %c0_142] : memref<192x256xf32, #tpu.memory_space<vmem>>, vector<8x256xf32>
    %433 = arith.addf %432, %431 : vector<8x256xf32>
    %434 = arith.negf %433 : vector<8x256xf32>
    %435 = math.exp %434 : vector<8x256xf32>
    %cst_143 = arith.constant 1.000000e+00 : f32
    %436 = vector.broadcast %cst_143 : f32 to vector<8x256xf32>
    %437 = arith.addf %436, %435 : vector<8x256xf32>
    %438 = arith.divf %436, %437 : vector<8x256xf32>
    %439 = vector.extract_strided_slice %438 {offsets = [0, 0], sizes = [8, 64], strides = [1, 1]} : vector<8x256xf32> to vector<8x64xf32>
    %440 = vector.extract_strided_slice %438 {offsets = [0, 64], sizes = [8, 64], strides = [1, 1]} : vector<8x256xf32> to vector<8x64xf32>
    %441 = vector.extract_strided_slice %438 {offsets = [0, 128], sizes = [8, 64], strides = [1, 1]} : vector<8x256xf32> to vector<8x64xf32>
    %442 = vector.extract_strided_slice %438 {offsets = [0, 192], sizes = [8, 64], strides = [1, 1]} : vector<8x256xf32> to vector<8x64xf32>
    %cst_144 = arith.constant 2.000000e+00 : f32
    %443 = vector.broadcast %cst_144 : f32 to vector<8x64xf32>
    %444 = arith.mulf %443, %442 : vector<8x64xf32>
    %cst_145 = arith.constant 1.000000e+00 : f32
    %445 = vector.broadcast %cst_145 : f32 to vector<8x64xf32>
    %446 = arith.subf %444, %445 : vector<8x64xf32>
    %447 = arith.mulf %440, %427 : vector<8x64xf32>
    %448 = arith.mulf %439, %446 : vector<8x64xf32>
    %449 = arith.addf %447, %448 : vector<8x64xf32>
    %450 = math.tanh %449 : vector<8x64xf32>
    %451 = arith.mulf %441, %450 : vector<8x64xf32>
    %c0_146 = arith.constant 0 : index
    %c0_147 = arith.constant 0 : index
    %452 = vector.load %arg3[%c0_146, %c0_147] : memref<64x256xf32, #tpu.memory_space<vmem>>, vector<64x256xf32>
    %cst_148 = arith.constant dense<0.000000e+00> : vector<8x256xf32>
    %453 = tpu.matmul %451, %452, %cst_148 {dimension_numbers = #tpu.dot_dimension_numbers<[1], [0], [0], [1], [0, 0, 1, 1], [], []>} : vector<8x64xf32>, vector<64x256xf32>, vector<8x256xf32> -> vector<8x256xf32>
    %c160 = arith.constant 160 : index
    %c0_149 = arith.constant 0 : index
    %454 = vector.load %arg11[%c160, %c0_149] : memref<192x256xf32, #tpu.memory_space<vmem>>, vector<8x256xf32>
    %455 = arith.addf %454, %453 : vector<8x256xf32>
    %456 = arith.negf %455 : vector<8x256xf32>
    %457 = math.exp %456 : vector<8x256xf32>
    %cst_150 = arith.constant 1.000000e+00 : f32
    %458 = vector.broadcast %cst_150 : f32 to vector<8x256xf32>
    %459 = arith.addf %458, %457 : vector<8x256xf32>
    %460 = arith.divf %458, %459 : vector<8x256xf32>
    %461 = vector.extract_strided_slice %460 {offsets = [0, 0], sizes = [8, 64], strides = [1, 1]} : vector<8x256xf32> to vector<8x64xf32>
    %462 = vector.extract_strided_slice %460 {offsets = [0, 64], sizes = [8, 64], strides = [1, 1]} : vector<8x256xf32> to vector<8x64xf32>
    %463 = vector.extract_strided_slice %460 {offsets = [0, 128], sizes = [8, 64], strides = [1, 1]} : vector<8x256xf32> to vector<8x64xf32>
    %464 = vector.extract_strided_slice %460 {offsets = [0, 192], sizes = [8, 64], strides = [1, 1]} : vector<8x256xf32> to vector<8x64xf32>
    %cst_151 = arith.constant 2.000000e+00 : f32
    %465 = vector.broadcast %cst_151 : f32 to vector<8x64xf32>
    %466 = arith.mulf %465, %464 : vector<8x64xf32>
    %cst_152 = arith.constant 1.000000e+00 : f32
    %467 = vector.broadcast %cst_152 : f32 to vector<8x64xf32>
    %468 = arith.subf %466, %467 : vector<8x64xf32>
    %469 = arith.mulf %462, %449 : vector<8x64xf32>
    %470 = arith.mulf %461, %468 : vector<8x64xf32>
    %471 = arith.addf %469, %470 : vector<8x64xf32>
    %472 = math.tanh %471 : vector<8x64xf32>
    %473 = arith.mulf %463, %472 : vector<8x64xf32>
    %c0_153 = arith.constant 0 : index
    %c0_154 = arith.constant 0 : index
    %474 = vector.load %arg3[%c0_153, %c0_154] : memref<64x256xf32, #tpu.memory_space<vmem>>, vector<64x256xf32>
    %cst_155 = arith.constant dense<0.000000e+00> : vector<8x256xf32>
    %475 = tpu.matmul %473, %474, %cst_155 {dimension_numbers = #tpu.dot_dimension_numbers<[1], [0], [0], [1], [0, 0, 1, 1], [], []>} : vector<8x64xf32>, vector<64x256xf32>, vector<8x256xf32> -> vector<8x256xf32>
    %c168 = arith.constant 168 : index
    %c0_156 = arith.constant 0 : index
    %476 = vector.load %arg11[%c168, %c0_156] : memref<192x256xf32, #tpu.memory_space<vmem>>, vector<8x256xf32>
    %477 = arith.addf %476, %475 : vector<8x256xf32>
    %478 = arith.negf %477 : vector<8x256xf32>
    %479 = math.exp %478 : vector<8x256xf32>
    %cst_157 = arith.constant 1.000000e+00 : f32
    %480 = vector.broadcast %cst_157 : f32 to vector<8x256xf32>
    %481 = arith.addf %480, %479 : vector<8x256xf32>
    %482 = arith.divf %480, %481 : vector<8x256xf32>
    %483 = vector.extract_strided_slice %482 {offsets = [0, 0], sizes = [8, 64], strides = [1, 1]} : vector<8x256xf32> to vector<8x64xf32>
    %484 = vector.extract_strided_slice %482 {offsets = [0, 64], sizes = [8, 64], strides = [1, 1]} : vector<8x256xf32> to vector<8x64xf32>
    %485 = vector.extract_strided_slice %482 {offsets = [0, 128], sizes = [8, 64], strides = [1, 1]} : vector<8x256xf32> to vector<8x64xf32>
    %486 = vector.extract_strided_slice %482 {offsets = [0, 192], sizes = [8, 64], strides = [1, 1]} : vector<8x256xf32> to vector<8x64xf32>
    %cst_158 = arith.constant 2.000000e+00 : f32
    %487 = vector.broadcast %cst_158 : f32 to vector<8x64xf32>
    %488 = arith.mulf %487, %486 : vector<8x64xf32>
    %cst_159 = arith.constant 1.000000e+00 : f32
    %489 = vector.broadcast %cst_159 : f32 to vector<8x64xf32>
    %490 = arith.subf %488, %489 : vector<8x64xf32>
    %491 = arith.mulf %484, %471 : vector<8x64xf32>
    %492 = arith.mulf %483, %490 : vector<8x64xf32>
    %493 = arith.addf %491, %492 : vector<8x64xf32>
    %494 = math.tanh %493 : vector<8x64xf32>
    %495 = arith.mulf %485, %494 : vector<8x64xf32>
    %c0_160 = arith.constant 0 : index
    %c0_161 = arith.constant 0 : index
    %496 = vector.load %arg3[%c0_160, %c0_161] : memref<64x256xf32, #tpu.memory_space<vmem>>, vector<64x256xf32>
    %cst_162 = arith.constant dense<0.000000e+00> : vector<8x256xf32>
    %497 = tpu.matmul %495, %496, %cst_162 {dimension_numbers = #tpu.dot_dimension_numbers<[1], [0], [0], [1], [0, 0, 1, 1], [], []>} : vector<8x64xf32>, vector<64x256xf32>, vector<8x256xf32> -> vector<8x256xf32>
    %c176 = arith.constant 176 : index
    %c0_163 = arith.constant 0 : index
    %498 = vector.load %arg11[%c176, %c0_163] : memref<192x256xf32, #tpu.memory_space<vmem>>, vector<8x256xf32>
    %499 = arith.addf %498, %497 : vector<8x256xf32>
    %500 = arith.negf %499 : vector<8x256xf32>
    %501 = math.exp %500 : vector<8x256xf32>
    %cst_164 = arith.constant 1.000000e+00 : f32
    %502 = vector.broadcast %cst_164 : f32 to vector<8x256xf32>
    %503 = arith.addf %502, %501 : vector<8x256xf32>
    %504 = arith.divf %502, %503 : vector<8x256xf32>
    %505 = vector.extract_strided_slice %504 {offsets = [0, 0], sizes = [8, 64], strides = [1, 1]} : vector<8x256xf32> to vector<8x64xf32>
    %506 = vector.extract_strided_slice %504 {offsets = [0, 64], sizes = [8, 64], strides = [1, 1]} : vector<8x256xf32> to vector<8x64xf32>
    %507 = vector.extract_strided_slice %504 {offsets = [0, 128], sizes = [8, 64], strides = [1, 1]} : vector<8x256xf32> to vector<8x64xf32>
    %508 = vector.extract_strided_slice %504 {offsets = [0, 192], sizes = [8, 64], strides = [1, 1]} : vector<8x256xf32> to vector<8x64xf32>
    %cst_165 = arith.constant 2.000000e+00 : f32
    %509 = vector.broadcast %cst_165 : f32 to vector<8x64xf32>
    %510 = arith.mulf %509, %508 : vector<8x64xf32>
    %cst_166 = arith.constant 1.000000e+00 : f32
    %511 = vector.broadcast %cst_166 : f32 to vector<8x64xf32>
    %512 = arith.subf %510, %511 : vector<8x64xf32>
    %513 = arith.mulf %506, %493 : vector<8x64xf32>
    %514 = arith.mulf %505, %512 : vector<8x64xf32>
    %515 = arith.addf %513, %514 : vector<8x64xf32>
    %516 = math.tanh %515 : vector<8x64xf32>
    %517 = arith.mulf %507, %516 : vector<8x64xf32>
    %c0_167 = arith.constant 0 : index
    %c0_168 = arith.constant 0 : index
    %518 = vector.load %arg3[%c0_167, %c0_168] : memref<64x256xf32, #tpu.memory_space<vmem>>, vector<64x256xf32>
    %cst_169 = arith.constant dense<0.000000e+00> : vector<8x256xf32>
    %519 = tpu.matmul %517, %518, %cst_169 {dimension_numbers = #tpu.dot_dimension_numbers<[1], [0], [0], [1], [0, 0, 1, 1], [], []>} : vector<8x64xf32>, vector<64x256xf32>, vector<8x256xf32> -> vector<8x256xf32>
    %c184 = arith.constant 184 : index
    %c0_170 = arith.constant 0 : index
    %520 = vector.load %arg11[%c184, %c0_170] : memref<192x256xf32, #tpu.memory_space<vmem>>, vector<8x256xf32>
    %521 = arith.addf %520, %519 : vector<8x256xf32>
    %522 = arith.negf %521 : vector<8x256xf32>
    %523 = math.exp %522 : vector<8x256xf32>
    %cst_171 = arith.constant 1.000000e+00 : f32
    %524 = vector.broadcast %cst_171 : f32 to vector<8x256xf32>
    %525 = arith.addf %524, %523 : vector<8x256xf32>
    %526 = arith.divf %524, %525 : vector<8x256xf32>
    %527 = vector.extract_strided_slice %526 {offsets = [0, 0], sizes = [8, 64], strides = [1, 1]} : vector<8x256xf32> to vector<8x64xf32>
    %528 = vector.extract_strided_slice %526 {offsets = [0, 64], sizes = [8, 64], strides = [1, 1]} : vector<8x256xf32> to vector<8x64xf32>
    %529 = vector.extract_strided_slice %526 {offsets = [0, 128], sizes = [8, 64], strides = [1, 1]} : vector<8x256xf32> to vector<8x64xf32>
    %530 = vector.extract_strided_slice %526 {offsets = [0, 192], sizes = [8, 64], strides = [1, 1]} : vector<8x256xf32> to vector<8x64xf32>
    %cst_172 = arith.constant 2.000000e+00 : f32
    %531 = vector.broadcast %cst_172 : f32 to vector<8x64xf32>
    %532 = arith.mulf %531, %530 : vector<8x64xf32>
    %cst_173 = arith.constant 1.000000e+00 : f32
    %533 = vector.broadcast %cst_173 : f32 to vector<8x64xf32>
    %534 = arith.subf %532, %533 : vector<8x64xf32>
    %535 = arith.mulf %528, %515 : vector<8x64xf32>
    %536 = arith.mulf %527, %534 : vector<8x64xf32>
    %537 = arith.addf %535, %536 : vector<8x64xf32>
    %538 = math.tanh %537 : vector<8x64xf32>
    %539 = arith.mulf %529, %538 : vector<8x64xf32>
    %c0_174 = arith.constant 0 : index
    %c0_175 = arith.constant 0 : index
    %540 = vector.load %arg4[%c0_174, %c0_175] : memref<64x128xf32, #tpu.memory_space<vmem>>, vector<64x128xf32>
    %cst_176 = arith.constant dense<0.000000e+00> : vector<8x128xf32>
    %541 = tpu.matmul %539, %540, %cst_176 {dimension_numbers = #tpu.dot_dimension_numbers<[1], [0], [0], [1], [0, 0, 1, 1], [], []>} : vector<8x64xf32>, vector<64x128xf32>, vector<8x128xf32> -> vector<8x128xf32>
    %c0_177 = arith.constant 0 : index
    %c0_178 = arith.constant 0 : index
    %542 = vector.load %arg5[%c0_177, %c0_178] : memref<1x128xf32, #tpu.memory_space<vmem>>, vector<1x128xf32>
    %543 = vector.broadcast %542 : vector<1x128xf32> to vector<8x128xf32>
    %544 = arith.addf %541, %543 : vector<8x128xf32>
    %545 = arith.negf %544 : vector<8x128xf32>
    %546 = math.exp %545 : vector<8x128xf32>
    %cst_179 = arith.constant 1.000000e+00 : f32
    %547 = vector.broadcast %cst_179 : f32 to vector<8x128xf32>
    %548 = arith.addf %547, %546 : vector<8x128xf32>
    %549 = arith.divf %547, %548 : vector<8x128xf32>
    %550 = vector.extract_strided_slice %549 {offsets = [0, 0], sizes = [8, 32], strides = [1, 1]} : vector<8x128xf32> to vector<8x32xf32>
    %551 = vector.extract_strided_slice %549 {offsets = [0, 32], sizes = [8, 32], strides = [1, 1]} : vector<8x128xf32> to vector<8x32xf32>
    %552 = vector.extract_strided_slice %549 {offsets = [0, 64], sizes = [8, 32], strides = [1, 1]} : vector<8x128xf32> to vector<8x32xf32>
    %553 = vector.extract_strided_slice %549 {offsets = [0, 96], sizes = [8, 32], strides = [1, 1]} : vector<8x128xf32> to vector<8x32xf32>
    %cst_180 = arith.constant 2.000000e+00 : f32
    %554 = vector.broadcast %cst_180 : f32 to vector<8x32xf32>
    %555 = arith.mulf %554, %553 : vector<8x32xf32>
    %cst_181 = arith.constant 1.000000e+00 : f32
    %556 = vector.broadcast %cst_181 : f32 to vector<8x32xf32>
    %557 = arith.subf %555, %556 : vector<8x32xf32>
    %558 = vector.extract_strided_slice %537 {offsets = [0, 32], sizes = [8, 32], strides = [1, 1]} : vector<8x64xf32> to vector<8x32xf32>
    %559 = arith.mulf %551, %558 : vector<8x32xf32>
    %560 = arith.mulf %550, %557 : vector<8x32xf32>
    %561 = arith.addf %559, %560 : vector<8x32xf32>
    %562 = math.tanh %561 : vector<8x32xf32>
    %563 = arith.mulf %552, %562 : vector<8x32xf32>
    %c0_182 = arith.constant 0 : index
    %c0_183 = arith.constant 0 : index
    %564 = vector.load %arg6[%c0_182, %c0_183] : memref<32x8xf32, #tpu.memory_space<vmem>>, vector<32x8xf32>
    %cst_184 = arith.constant dense<0.000000e+00> : vector<8x8xf32>
    %565 = tpu.matmul %563, %564, %cst_184 {dimension_numbers = #tpu.dot_dimension_numbers<[1], [0], [0], [1], [0, 0, 1, 1], [], []>} : vector<8x32xf32>, vector<32x8xf32>, vector<8x8xf32> -> vector<8x8xf32>
    %c0_185 = arith.constant 0 : index
    %c0_186 = arith.constant 0 : index
    %566 = vector.load %arg7[%c0_185, %c0_186] : memref<1x8xf32, #tpu.memory_space<vmem>>, vector<1x8xf32>
    %567 = vector.broadcast %566 : vector<1x8xf32> to vector<8x8xf32>
    %568 = arith.addf %565, %567 : vector<8x8xf32>
    %569 = math.tanh %568 : vector<8x8xf32>
    %c0_187 = arith.constant 0 : index
    %c0_188 = arith.constant 0 : index
    %570 = vector.load %arg8[%c0_187, %c0_188] : memref<1x8xf32, #tpu.memory_space<vmem>>, vector<1x8xf32>
    %571 = vector.broadcast %570 : vector<1x8xf32> to vector<8x8xf32>
    %572 = arith.mulf %569, %571 : vector<8x8xf32>
    %cst_189 = arith.constant dense<0.000000e+00> : vector<8xf32>
    %573 = vector.multi_reduction <add>, %572, %cst_189 [1] : vector<8x8xf32> to vector<8xf32>
    %574 = vector.shape_cast %573 : vector<8xf32> to vector<8x1xf32>
    %c0_190 = arith.constant 0 : index
    %c0_191 = arith.constant 0 : index
    %575 = vector.load %arg9[%c0_190, %c0_191] : memref<1x1xf32, #tpu.memory_space<vmem>>, vector<1x1xf32>
    %576 = vector.broadcast %575 : vector<1x1xf32> to vector<8x1xf32>
    %577 = arith.addf %574, %576 : vector<8x1xf32>
    %cst_192 = arith.constant 3.000000e+00 : f32
    %578 = vector.broadcast %cst_192 : f32 to vector<8x1xf32>
    %579 = arith.mulf %578, %577 : vector<8x1xf32>
    %c0_193 = arith.constant 0 : index
    %c0_194 = arith.constant 0 : index
    %580 = vector.load %arg10[%c0_193, %c0_194] : memref<8x1xf32, #tpu.memory_space<vmem>>, vector<8x1xf32>
    tpu.vector_store %arg10[%c0_193, %c0_194], %579 {strides = array<i32>} : memref<8x1xf32, #tpu.memory_space<vmem>>, vector<8x1xf32>,
    return
  }
}

</mosaic_0001>

<bundles_post_ra>
// kernel: tpu_custom_call.1
= control target key start
LH: loop header
LB: loop body
LE: loop exit
PB: predicated region body
PF: predicated region fallthrough
CT: control target
= control target key end

     0   :  { %v183_v0 = vlaneseq  ;;  %v3578_v1 = vmov 0   ;;  %v3580_v52 = vmov 0.0   ;;  %vm405_vm1 = vcmask 523264   ;;  %s4595_s0 = inlined_call_operand.vmem [shape: f32[192,1], index: 0, kind: input, shape index: {}]   ;;  %s4596_s1 = inlined_call_operand.vmem [shape: f32[1,256], index: 1, kind: input, shape index: {}]   ;;  %s4597_s2 = inlined_call_operand.vmem [shape: f32[1,256], index: 2, kind: input, shape index: {}]   ;;  %s4598_s3 = inlined_call_operand.vmem [shape: f32[64,256], index: 3, kind: input, shape index: {}]   ;;  %s4599_s4 = inlined_call_operand.vmem [shape: f32[64,128], index: 4, kind: input, shape index: {}]   ;;  %s4600_s5 = inlined_call_operand.vmem [shape: f32[1,128], index: 5, kind: input, shape index: {}]   ;;  %s4601_s6 = inlined_call_operand.vmem [shape: f32[32,8], index: 6, kind: input, shape index: {}]   ;;  %s4602_s9 = inlined_call_operand.<no memory space> [shape: f32[1,1], index: 9, kind: input, shape index: {}]   ;;  %s4603_s7 = inlined_call_operand.vmem [shape: f32[1,8], index: 7, kind: input, shape index: {}]   ;;  %s4604_s8 = inlined_call_operand.vmem [shape: f32[1,8], index: 8, kind: input, shape index: {}]   ;;  %s4605_s10 = inlined_call_operand.vmem [shape: f32[8,1], index: 10, kind: output, shape index: {}]  }
   0x1   :  { %3297 = vset.pattern.permute.xlu0 %v3578_v1  ;;  %v37_v2 = vld [vmem:[%s4595_s0] sm:$0xff]  ;;  %v38_v24 = vld [vmem:[%s4595_s0 + $0x8] sm:$0xff]  ;;  %v3670_v33 = vld [vmem:[%s4598_s3 + $0x78] sm:$0xff]  ;;  %473 = vmatprep.mubr.f32.mxu0 %v3580_v52  ;;  %vm3581_vm2 = vmmov 0   ;;  %vm3044_vm3 = vcmask 261120   ;;  %vm3126_vm4 = vcmask 64512  }
   0x2   :  { %64 = vperm.xlu0 %3297, %v37_v2   ;;  %v184_v3 = vshrl.u32 %v183_v0, 7  ;;  %v61_v4 = vld [vmem:[%s4596_s1] sm:$0x3]  ;;  %v350_v10 = vand.u32 127, %v183_v0  ;;  %s3579_s1 = smov 64   ;;  %v3675_v34 = vld [vmem:[%s4598_s3 + $0x70] sm:$0xff]  ;;  %425 = vmatprep.subr.mxu0 %v3670_v33 }
   0x3   :  { %v241_v5 = vld [vmem:[%s4597_s2] sm:$0x3]  ;;  %v3680_v35 = vld [vmem:[%s4598_s3 + $0x68] sm:$0xff]  ;;  %534 = vmatprep.subr.mxu1 %v3670_v33  ;;  %426 = vmatpush1.msra.mxu0 %v3675_v34  ;;  %v3693_v37 = vld [vmem:[%s4598_s3 + $0x58] sm:$0xff]  ;;  %vm3139_vm5 = vcmask 7168  }
   0x4   :  { %v185_v6 = vsub.s32 0, %v184_v3  ;;  %v189_v9 = vsub.s32 1, %v184_v3  ;;  %v351_v12 = vadd.s32 128, %v350_v10  ;;  %v3686_v36 = vld [vmem:[%s4598_s3 + $0x60] sm:$0xff]  ;;  %535 = vmatpush1.msra.mxu1 %v3675_v34  ;;  %427 = vmatprep.subr.mxu0 %v3680_v35  ;;  %v3700_v38 = vld [vmem:[%s4598_s3 + $0x50] sm:$0xff]  ;;  %v3707_v39 = vld [vmem:[%s4598_s3 + $0x48] sm:$0xff] }
   0x5   :  { %536 = vmatprep.subr.mxu1 %v3680_v35  ;;  %428 = vmatpush1.msra.mxu0 %v3686_v36  ;;  %v3714_v40 = vld [vmem:[%s4598_s3 + $0x40] sm:$0xff]  ;;  %v3721_v41 = vld [vmem:[%s4598_s3 + $0x38] sm:$0xff]  ;;  %v3728_v42 = vld [vmem:[%s4598_s3 + $0x30] sm:$0xff] }
   0x6   :  { %v3647_v7 = vrot.slane %v61_v4, %v185_v6  ;;  %v3649_v8 = vrot.slane %v241_v5, %v185_v6  ;;  %v3651_v11 = vrot.slane %v61_v4, %v189_v9  ;;  %v3653_v13 = vrot.slane %v241_v5, %v189_v9  ;;  %537 = vmatpush1.msra.mxu1 %v3686_v36  ;;  %v3735_v43 = vld [vmem:[%s4598_s3 + $0x28] sm:$0xff]  ;;  %v3742_v44 = vld [vmem:[%s4598_s3 + $0x20] sm:$0xff]  ;;  %v3749_v45 = vld [vmem:[%s4598_s3 + $0x18] sm:$0xff] }
   0x7   :  { %vm353_vm0 = vcmp.lt.s32.totalorder %v351_v12, 224  ;;  %429 = vmatprep.subr.mxu0 %v3693_v37  ;;  %538 = vmatprep.subr.mxu1 %v3693_v37  ;;  %v3756_v46 = vld [vmem:[%s4598_s3 + $0x10] sm:$0xff]  ;;  %v3771_v50 = vld [vmem:[%s4598_s3 + $0x8] sm:$0xff]  ;;  %v3777_v51 = vld [vmem:[%s4598_s3] sm:$0xff] }
   0x8   :  { %430 = vmatpush1.msra.mxu0 %v3700_v38  ;;  %539 = vmatpush1.msra.mxu1 %v3700_v38 }
   0x9   :  { %431 = vmatprep.subr.mxu0 %v3707_v39  ;;  %540 = vmatprep.subr.mxu1 %v3707_v39 }
   0xa   :  { %432 = vmatpush1.msra.mxu0 %v3714_v40  ;;  %541 = vmatpush1.msra.mxu1 %v3714_v40 }
   0xb   :  { %433 = vmatprep.subr.mxu0 %v3721_v41  ;;  %542 = vmatprep.subr.mxu1 %v3721_v41 }
   0xc   :  { %434 = vmatpush1.msra.mxu0 %v3728_v42  ;;  %543 = vmatpush1.msra.mxu1 %v3728_v42 }
   0xd   :  { %435 = vmatprep.subr.mxu0 %v3735_v43  ;;  %544 = vmatprep.subr.mxu1 %v3735_v43 }
   0xe   :  { %436 = vmatpush1.msra.mxu0 %v3742_v44  ;;  %545 = vmatpush1.msra.mxu1 %v3742_v44 }
   0xf   :  { %437 = vmatprep.subr.mxu0 %v3749_v45  ;;  %546 = vmatprep.subr.mxu1 %v3749_v45 }
  0x10   :  { %438 = vmatpush1.msra.mxu0 %v3756_v46  ;;  %547 = vmatpush1.msra.mxu1 %v3756_v46 }
  0x11   :  { %439 = vmatprep.subr.mxu0 %v3771_v50  ;;  %548 = vmatprep.subr.mxu1 %v3771_v50 }
  0x12   :  { %440 = vmatpush1.msra.mxu0 %v3777_v51  ;;  %549 = vmatpush1.msra.mxu1 %v3777_v51 }
  0x13   :  { %582 = vmatprep.mubr.f32.mxu1 %v3580_v52  ;;  %643 = vmatprep.subr.mxu0 %v3670_v33 }
  0x14   :  { %752 = vmatprep.subr.mxu1 %v3670_v33 }
  0x7d   :  { %v65_v14 = vpop.permute.xlu0 %64 }
  0x7e   :  { %v194_v15 = vmul.f32 %v3651_v11, %v65_v14  ;;  %v193_v25 = vmul.f32 %v3647_v7, %v65_v14 }
  0x80   :  { %v254_v16 = vadd.f32 %v3653_v13, %v194_v15  ;;  %v253_v26 = vadd.f32 %v3649_v8, %v193_v25 }
  0x82   :  { %v357_v17 = vsel %vm353_vm0, %v254_v16, 0.0  ;;  %v3145_v27 = vmul.f32 -1.442695, %v253_v26 }
  0x83   :  { %v3146_v18 = vmul.f32 -1.442695, %v357_v17  ;;  %v39_v17 = vld [vmem:[%s4595_s0 + $0x10] sm:$0xff] }
  0x85   :  { %3298 = vpow2.f32 %v3146_v18 }
  0x92   :  { %v3299_v19 = vpop.eup %3298 }
  0x93   :  { %v365_v20 = vadd.f32 1.0, %v3299_v19 }
  0x95   :  { %3300 = vrcp.f32 %v365_v20 }
  0x96   :  { %3302 = vpow2.f32 %v3145_v27 }
  0xa2   :  { %v3657_v21 = vpop.eup %3300 }
  0xa3   :  { %v370_v22 = vmul.f32 2.0, %v3657_v21  ;;  %v3303_v28 = vpop.eup %3302 }
  0xa4   :  { %v364_v29 = vadd.f32 1.0, %v3303_v28 }
  0xa5   :  { %v3147_v23 = vadd.f32 -1.0, %v370_v22 }
  0xa6   :  { %3304 = vrcp.f32 %v364_v29 }
  0xa7   :  { %374 = vrot.lane.b32.xlu0 %v3147_v23, %s3579_s1 }
  0xab   :  { %69 = vperm.xlu0 %3297, %v38_v24  }
  0xb3   :  { %v3305_v30 = vpop.eup %3304 }
  0xb4   :  { %v372_v47 = vmul.f32 0.0, %v3305_v30 }
 0x119   :  { %v375_v31 = vpop.permute.xlu0 %374 }
 0x11a   :  { %v377_v32 = vmul.f32 %v3305_v30, %v375_v31 }
 0x11c   :  { %379 = vrot.lane.b32.xlu1 %v377_v32, %s3579_s1 }
 0x126   :  { %v70_v56 = vpop.permute.xlu0 %69 }
 0x127   :  { %v196_v57 = vmul.f32 %v3651_v11, %v70_v56  ;;  %v195_v4 = vmul.f32 %v3647_v7, %v70_v56 }
 0x129   :  { %v256_v59 = vadd.f32 %v3653_v13, %v196_v57  ;;  %v255_v5 = vadd.f32 %v3649_v8, %v195_v4 }
 0x18e   :  { %v380_v48 = vpop.permute.xlu1 %379 }
 0x18f   :  { %v3765_v49 = vadd.f32 %v380_v48, %v372_v47 }
 0x191   :  { %3306 = vtanh.f32 %v3765_v49 }
 0x19e   :  { %v3307_v53 = vpop.eup %3306 }
 0x19f   :  { %385 = vrot.lane.b32.xlu1 %v3307_v53, %s3579_s1 }
 0x211   :  { %v386_v54 = vpop.permute.xlu1 %385 }
 0x212   :  { %v388_v55 = vmul.f32 %v3657_v21, %v386_v54 }
 0x214   :  { %3148 = vmatmul.mubr.msk.f32.vlgmr.msra.gmra.mxu0 %vm405_vm1, %v388_v55 }
 0x215   :  { %644 = vmatpush1.msra.mxu0 %v3675_v34  ;;  %691 = vmatprep.mubr.f32.mxu0 %v3580_v52 }
 0x216   :  { %645 = vmatprep.subr.mxu0 %v3680_v35 }
 0x217   :  { %646 = vmatpush1.msra.mxu0 %v3686_v36 }
 0x218   :  { %647 = vmatprep.subr.mxu0 %v3693_v37 }
 0x219   :  { %648 = vmatpush1.msra.mxu0 %v3700_v38 }
 0x21a   :  { %649 = vmatprep.subr.mxu0 %v3707_v39 }
 0x21b   :  { %650 = vmatpush1.msra.mxu0 %v3714_v40 }
 0x21c   :  { %651 = vmatprep.subr.mxu0 %v3721_v41 }
 0x21d   :  { %652 = vmatpush1.msra.mxu0 %v3728_v42 }
 0x21e   :  { %653 = vmatprep.subr.mxu0 %v3735_v43 }
 0x21f   :  { %654 = vmatpush1.msra.mxu0 %v3742_v44 }
 0x220   :  { %655 = vmatprep.subr.mxu0 %v3749_v45 }
 0x221   :  { %656 = vmatpush1.msra.mxu0 %v3756_v46 }
 0x222   :  { %657 = vmatprep.subr.mxu0 %v3771_v50 }
 0x223   :  { %658 = vmatpush1.msra.mxu0 %v3777_v51 }
 0x224   :  { %861 = vmatprep.subr.mxu0 %v3670_v33 }
 0x2d4   :  { %v475_v58 = vpop.f32.mrf.mxu0 }
 0x2d5   :  { %v482_v6 = vadd.f32 %v475_v58, %v255_v5 }
 0x2d6   :  { %v477_v60 = vpop.f32.mrf.mxu0 }
 0x2d7   :  { %v483_v61 = vadd.f32 %v477_v60, %v256_v59  ;;  %v3149_v9 = vmul.f32 -1.442695, %v482_v6 }
 0x2d9   :  { %v3150_v62 = vmul.f32 -1.442695, %v483_v61 }
 0x2db   :  { %3308 = vpow2.f32 %v3150_v62  ;;  %v40_v62 = vld [vmem:[%s4595_s0 + $0x18] sm:$0xff] }
 0x2e8   :  { %v3309_v63 = vpop.eup %3308 }
 0x2e9   :  { %v491_v0 = vadd.f32 1.0, %v3309_v63 }
 0x2eb   :  { %3310 = vrcp.f32 %v491_v0 }
 0x2ec   :  { %3312 = vpow2.f32 %v3149_v9 }
 0x2f8   :  { %v3311_v1 = vpop.eup %3310 }
 0x2f9   :  { %v496_v2 = vmul.f32 2.0, %v3311_v1  ;;  %v3313_v10 = vpop.eup %3312 }
 0x2fa   :  { %v490_v12 = vadd.f32 1.0, %v3313_v10 }
 0x2fb   :  { %v3151_v3 = vadd.f32 -1.0, %v496_v2 }
 0x2fc   :  { %3314 = vrcp.f32 %v490_v12 }
 0x2fd   :  { %500 = vrot.lane.b32.xlu1 %v3151_v3, %s3579_s1 }
 0x309   :  { %v3315_v14 = vpop.eup %3314 }
 0x30a   :  { %v498_v18 = vmul.f32 %v3315_v14, %v3765_v49 }
 0x36f   :  { %v501_v15 = vpop.permute.xlu1 %500 }
 0x370   :  { %v503_v16 = vmul.f32 %v3315_v14, %v501_v15 }
 0x372   :  { %505 = vrot.lane.b32.xlu0 %v503_v16, %s3579_s1 }
 0x376   :  { %74 = vperm.xlu0 %3297, %v39_v17  }
 0x3e4   :  { %v506_v19 = vpop.permute.xlu0 %505 }
 0x3e5   :  { %v508_v20 = vadd.f32 %v506_v19, %v498_v18 }
 0x3e7   :  { %3316 = vtanh.f32 %v508_v20 }
 0x3f1   :  { %v75_v24 = vpop.permute.xlu0 %74 }
 0x3f2   :  { %v198_v25 = vmul.f32 %v3651_v11, %v75_v24  ;;  %v197_v53 = vmul.f32 %v3647_v7, %v75_v24 }
 0x3f4   :  { %v3317_v21 = vpop.eup %3316  ;;  %v258_v27 = vadd.f32 %v3653_v13, %v198_v25  ;;  %v257_v54 = vadd.f32 %v3649_v8, %v197_v53 }
 0x3f5   :  { %511 = vrot.lane.b32.xlu1 %v3317_v21, %s3579_s1 }
 0x467   :  { %v512_v22 = vpop.permute.xlu1 %511 }
 0x468   :  { %v514_v23 = vmul.f32 %v3311_v1, %v512_v22 }
 0x46a   :  { %3152 = vmatmul.mubr.msk.f32.vlgmr.msra.gmra.mxu1 %vm405_vm1, %v514_v23 }
 0x46b   :  { %753 = vmatpush1.msra.mxu1 %v3675_v34  ;;  %800 = vmatprep.mubr.f32.mxu1 %v3580_v52 }
 0x46c   :  { %754 = vmatprep.subr.mxu1 %v3680_v35 }
 0x46d   :  { %755 = vmatpush1.msra.mxu1 %v3686_v36 }
 0x46e   :  { %756 = vmatprep.subr.mxu1 %v3693_v37 }
 0x46f   :  { %757 = vmatpush1.msra.mxu1 %v3700_v38 }
 0x470   :  { %758 = vmatprep.subr.mxu1 %v3707_v39 }
 0x471   :  { %759 = vmatpush1.msra.mxu1 %v3714_v40 }
 0x472   :  { %760 = vmatprep.subr.mxu1 %v3721_v41 }
 0x473   :  { %761 = vmatpush1.msra.mxu1 %v3728_v42 }
 0x474   :  { %762 = vmatprep.subr.mxu1 %v3735_v43 }
 0x475   :  { %763 = vmatpush1.msra.mxu1 %v3742_v44 }
 0x476   :  { %764 = vmatprep.subr.mxu1 %v3749_v45 }
 0x477   :  { %765 = vmatpush1.msra.mxu1 %v3756_v46 }
 0x478   :  { %766 = vmatprep.subr.mxu1 %v3771_v50 }
 0x479   :  { %767 = vmatpush1.msra.mxu1 %v3777_v51 }
 0x47a   :  { %970 = vmatprep.subr.mxu1 %v3670_v33 }
 0x52a   :  { %v584_v26 = vpop.f32.mrf.mxu1 }
 0x52b   :  { %v591_v55 = vadd.f32 %v584_v26, %v257_v54 }
 0x52c   :  { %v586_v28 = vpop.f32.mrf.mxu1 }
 0x52d   :  { %v592_v29 = vadd.f32 %v586_v28, %v258_v27  ;;  %v3153_v56 = vmul.f32 -1.442695, %v591_v55 }
 0x52f   :  { %v3154_v30 = vmul.f32 -1.442695, %v592_v29 }
 0x531   :  { %3318 = vpow2.f32 %v3154_v30  ;;  %v41_v30 = vld [vmem:[%s4595_s0 + $0x20] sm:$0xff] }
 0x53e   :  { %v3319_v31 = vpop.eup %3318 }
 0x53f   :  { %v600_v32 = vadd.f32 1.0, %v3319_v31 }
 0x541   :  { %3320 = vrcp.f32 %v600_v32 }
 0x542   :  { %3322 = vpow2.f32 %v3153_v56 }
 0x54e   :  { %v3321_v47 = vpop.eup %3320 }
 0x54f   :  { %v605_v48 = vmul.f32 2.0, %v3321_v47  ;;  %v3323_v57 = vpop.eup %3322 }
 0x550   :  { %v599_v58 = vadd.f32 1.0, %v3323_v57 }
 0x551   :  { %v3155_v49 = vadd.f32 -1.0, %v605_v48 }
 0x552   :  { %3324 = vrcp.f32 %v599_v58 }
 0x553   :  { %609 = vrot.lane.b32.xlu1 %v3155_v49, %s3579_s1 }
 0x55f   :  { %v3325_v59 = vpop.eup %3324 }
 0x560   :  { %v607_v63 = vmul.f32 %v3325_v59, %v508_v20 }
 0x5c5   :  { %v610_v60 = vpop.permute.xlu1 %609 }
 0x5c6   :  { %v612_v61 = vmul.f32 %v3325_v59, %v610_v60 }
 0x5c8   :  { %614 = vrot.lane.b32.xlu0 %v612_v61, %s3579_s1 }
 0x5cc   :  { %79 = vperm.xlu0 %3297, %v40_v62  }
 0x63a   :  { %v615_v0 = vpop.permute.xlu0 %614 }
 0x63b   :  { %v617_v1 = vadd.f32 %v615_v0, %v607_v63 }
 0x63d   :  { %3326 = vtanh.f32 %v617_v1 }
 0x647   :  { %v80_v5 = vpop.permute.xlu0 %79 }
 0x648   :  { %v200_v6 = vmul.f32 %v3651_v11, %v80_v5  ;;  %v199_v21 = vmul.f32 %v3647_v7, %v80_v5 }
 0x64a   :  { %v3327_v2 = vpop.eup %3326  ;;  %v260_v10 = vadd.f32 %v3653_v13, %v200_v6  ;;  %v259_v22 = vadd.f32 %v3649_v8, %v199_v21 }
 0x64b   :  { %620 = vrot.lane.b32.xlu1 %v3327_v2, %s3579_s1 }
 0x6bd   :  { %v621_v3 = vpop.permute.xlu1 %620 }
 0x6be   :  { %v623_v4 = vmul.f32 %v3321_v47, %v621_v3 }
 0x6c0   :  { %3156 = vmatmul.mubr.msk.f32.vlgmr.msra.gmra.mxu0 %vm405_vm1, %v623_v4 }
 0x6c1   :  { %862 = vmatpush1.msra.mxu0 %v3675_v34  ;;  %909 = vmatprep.mubr.f32.mxu0 %v3580_v52 }
 0x6c2   :  { %863 = vmatprep.subr.mxu0 %v3680_v35 }
 0x6c3   :  { %864 = vmatpush1.msra.mxu0 %v3686_v36 }
 0x6c4   :  { %865 = vmatprep.subr.mxu0 %v3693_v37 }
 0x6c5   :  { %866 = vmatpush1.msra.mxu0 %v3700_v38 }
 0x6c6   :  { %867 = vmatprep.subr.mxu0 %v3707_v39 }
 0x6c7   :  { %868 = vmatpush1.msra.mxu0 %v3714_v40 }
 0x6c8   :  { %869 = vmatprep.subr.mxu0 %v3721_v41 }
 0x6c9   :  { %870 = vmatpush1.msra.mxu0 %v3728_v42 }
 0x6ca   :  { %871 = vmatprep.subr.mxu0 %v3735_v43 }
 0x6cb   :  { %872 = vmatpush1.msra.mxu0 %v3742_v44 }
 0x6cc   :  { %873 = vmatprep.subr.mxu0 %v3749_v45 }
 0x6cd   :  { %874 = vmatpush1.msra.mxu0 %v3756_v46 }
 0x6ce   :  { %875 = vmatprep.subr.mxu0 %v3771_v50 }
 0x6cf   :  { %876 = vmatpush1.msra.mxu0 %v3777_v51 }
 0x6d0   :  { %1079 = vmatprep.subr.mxu0 %v3670_v33 }
 0x780   :  { %v693_v9 = vpop.f32.mrf.mxu0 }
 0x781   :  { %v700_v23 = vadd.f32 %v693_v9, %v259_v22 }
 0x782   :  { %v695_v12 = vpop.f32.mrf.mxu0 }
 0x783   :  { %v701_v14 = vadd.f32 %v695_v12, %v260_v10  ;;  %v3157_v24 = vmul.f32 -1.442695, %v700_v23 }
 0x785   :  { %v3158_v15 = vmul.f32 -1.442695, %v701_v14 }
 0x787   :  { %3328 = vpow2.f32 %v3158_v15  ;;  %v42_v15 = vld [vmem:[%s4595_s0 + $0x28] sm:$0xff] }
 0x794   :  { %v3329_v16 = vpop.eup %3328 }
 0x795   :  { %v709_v17 = vadd.f32 1.0, %v3329_v16 }
 0x797   :  { %3330 = vrcp.f32 %v709_v17 }
 0x798   :  { %3332 = vpow2.f32 %v3157_v24 }
 0x7a4   :  { %v3331_v18 = vpop.eup %3330 }
 0x7a5   :  { %v714_v19 = vmul.f32 2.0, %v3331_v18  ;;  %v3333_v25 = vpop.eup %3332 }
 0x7a6   :  { %v708_v26 = vadd.f32 1.0, %v3333_v25 }
 0x7a7   :  { %v3159_v20 = vadd.f32 -1.0, %v714_v19 }
 0x7a8   :  { %3334 = vrcp.f32 %v708_v26 }
 0x7a9   :  { %718 = vrot.lane.b32.xlu1 %v3159_v20, %s3579_s1 }
 0x7b5   :  { %v3335_v27 = vpop.eup %3334 }
 0x7b6   :  { %v716_v31 = vmul.f32 %v3335_v27, %v617_v1 }
 0x81b   :  { %v719_v28 = vpop.permute.xlu1 %718 }
 0x81c   :  { %v721_v29 = vmul.f32 %v3335_v27, %v719_v28 }
 0x81e   :  { %723 = vrot.lane.b32.xlu0 %v721_v29, %s3579_s1 }
 0x822   :  { %84 = vperm.xlu0 %3297, %v41_v30  }
 0x890   :  { %v724_v32 = vpop.permute.xlu0 %723 }
 0x891   :  { %v726_v47 = vadd.f32 %v724_v32, %v716_v31 }
 0x893   :  { %3336 = vtanh.f32 %v726_v47 }
 0x89d   :  { %v85_v54 = vpop.permute.xlu0 %84 }
 0x89e   :  { %v202_v55 = vmul.f32 %v3651_v11, %v85_v54  ;;  %v201_v2 = vmul.f32 %v3647_v7, %v85_v54 }
 0x8a0   :  { %v3337_v48 = vpop.eup %3336  ;;  %v262_v57 = vadd.f32 %v3653_v13, %v202_v55  ;;  %v261_v3 = vadd.f32 %v3649_v8, %v201_v2 }
 0x8a1   :  { %729 = vrot.lane.b32.xlu1 %v3337_v48, %s3579_s1 }
 0x913   :  { %v730_v49 = vpop.permute.xlu1 %729 }
 0x914   :  { %v732_v53 = vmul.f32 %v3331_v18, %v730_v49 }
 0x916   :  { %3160 = vmatmul.mubr.msk.f32.vlgmr.msra.gmra.mxu1 %vm405_vm1, %v732_v53 }
 0x917   :  { %971 = vmatpush1.msra.mxu1 %v3675_v34  ;;  %1018 = vmatprep.mubr.f32.mxu1 %v3580_v52 }
 0x918   :  { %972 = vmatprep.subr.mxu1 %v3680_v35 }
 0x919   :  { %973 = vmatpush1.msra.mxu1 %v3686_v36 }
 0x91a   :  { %974 = vmatprep.subr.mxu1 %v3693_v37 }
 0x91b   :  { %975 = vmatpush1.msra.mxu1 %v3700_v38 }
 0x91c   :  { %976 = vmatprep.subr.mxu1 %v3707_v39 }
 0x91d   :  { %977 = vmatpush1.msra.mxu1 %v3714_v40 }
 0x91e   :  { %978 = vmatprep.subr.mxu1 %v3721_v41 }
 0x91f   :  { %979 = vmatpush1.msra.mxu1 %v3728_v42 }
 0x920   :  { %980 = vmatprep.subr.mxu1 %v3735_v43 }
 0x921   :  { %981 = vmatpush1.msra.mxu1 %v3742_v44 }
 0x922   :  { %982 = vmatprep.subr.mxu1 %v3749_v45 }
 0x923   :  { %983 = vmatpush1.msra.mxu1 %v3756_v46 }
 0x924   :  { %984 = vmatprep.subr.mxu1 %v3771_v50 }
 0x925   :  { %985 = vmatpush1.msra.mxu1 %v3777_v51 }
 0x926   :  { %1188 = vmatprep.subr.mxu1 %v3670_v33 }
 0x9d6   :  { %v802_v56 = vpop.f32.mrf.mxu1 }
 0x9d7   :  { %v809_v4 = vadd.f32 %v802_v56, %v261_v3 }
 0x9d8   :  { %v804_v58 = vpop.f32.mrf.mxu1 }
 0x9d9   :  { %v810_v59 = vadd.f32 %v804_v58, %v262_v57  ;;  %v3161_v5 = vmul.f32 -1.442695, %v809_v4 }
 0x9db   :  { %v3162_v60 = vmul.f32 -1.442695, %v810_v59 }
 0x9dd   :  { %3338 = vpow2.f32 %v3162_v60  ;;  %v43_v60 = vld [vmem:[%s4595_s0 + $0x30] sm:$0xff] }
 0x9ea   :  { %v3339_v61 = vpop.eup %3338 }
 0x9eb   :  { %v818_v62 = vadd.f32 1.0, %v3339_v61 }
 0x9ed   :  { %3340 = vrcp.f32 %v818_v62 }
 0x9ee   :  { %3342 = vpow2.f32 %v3161_v5 }
 0x9fa   :  { %v3341_v63 = vpop.eup %3340 }
 0x9fb   :  { %v823_v0 = vmul.f32 2.0, %v3341_v63  ;;  %v3343_v6 = vpop.eup %3342 }
 0x9fc   :  { %v817_v9 = vadd.f32 1.0, %v3343_v6 }
 0x9fd   :  { %v3163_v1 = vadd.f32 -1.0, %v823_v0 }
 0x9fe   :  { %3344 = vrcp.f32 %v817_v9 }
 0x9ff   :  { %827 = vrot.lane.b32.xlu1 %v3163_v1, %s3579_s1 }
 0xa0b   :  { %v3345_v10 = vpop.eup %3344 }
 0xa0c   :  { %v825_v16 = vmul.f32 %v3345_v10, %v726_v47 }
 0xa71   :  { %v828_v12 = vpop.permute.xlu1 %827 }
 0xa72   :  { %v830_v14 = vmul.f32 %v3345_v10, %v828_v12 }
 0xa74   :  { %832 = vrot.lane.b32.xlu0 %v830_v14, %s3579_s1 }
 0xa78   :  { %89 = vperm.xlu0 %3297, %v42_v15  }
 0xae6   :  { %v833_v17 = vpop.permute.xlu0 %832 }
 0xae7   :  { %v835_v18 = vadd.f32 %v833_v17, %v825_v16 }
 0xae9   :  { %3346 = vtanh.f32 %v835_v18 }
 0xaf3   :  { %v90_v22 = vpop.permute.xlu0 %89 }
 0xaf4   :  { %v204_v23 = vmul.f32 %v3651_v11, %v90_v22  ;;  %v203_v48 = vmul.f32 %v3647_v7, %v90_v22 }
 0xaf6   :  { %v3347_v19 = vpop.eup %3346  ;;  %v264_v25 = vadd.f32 %v3653_v13, %v204_v23  ;;  %v263_v49 = vadd.f32 %v3649_v8, %v203_v48 }
 0xaf7   :  { %838 = vrot.lane.b32.xlu1 %v3347_v19, %s3579_s1 }
 0xb69   :  { %v839_v20 = vpop.permute.xlu1 %838 }
 0xb6a   :  { %v841_v21 = vmul.f32 %v3341_v63, %v839_v20 }
 0xb6c   :  { %3164 = vmatmul.mubr.msk.f32.vlgmr.msra.gmra.mxu0 %vm405_vm1, %v841_v21 }
 0xb6d   :  { %1080 = vmatpush1.msra.mxu0 %v3675_v34  ;;  %1127 = vmatprep.mubr.f32.mxu0 %v3580_v52 }
 0xb6e   :  { %1081 = vmatprep.subr.mxu0 %v3680_v35 }
 0xb6f   :  { %1082 = vmatpush1.msra.mxu0 %v3686_v36 }
 0xb70   :  { %1083 = vmatprep.subr.mxu0 %v3693_v37 }
 0xb71   :  { %1084 = vmatpush1.msra.mxu0 %v3700_v38 }
 0xb72   :  { %1085 = vmatprep.subr.mxu0 %v3707_v39 }
 0xb73   :  { %1086 = vmatpush1.msra.mxu0 %v3714_v40 }
 0xb74   :  { %1087 = vmatprep.subr.mxu0 %v3721_v41 }
 0xb75   :  { %1088 = vmatpush1.msra.mxu0 %v3728_v42 }
 0xb76   :  { %1089 = vmatprep.subr.mxu0 %v3735_v43 }
 0xb77   :  { %1090 = vmatpush1.msra.mxu0 %v3742_v44 }
 0xb78   :  { %1091 = vmatprep.subr.mxu0 %v3749_v45 }
 0xb79   :  { %1092 = vmatpush1.msra.mxu0 %v3756_v46 }
 0xb7a   :  { %1093 = vmatprep.subr.mxu0 %v3771_v50 }
 0xb7b   :  { %1094 = vmatpush1.msra.mxu0 %v3777_v51 }
 0xb7c   :  { %1297 = vmatprep.subr.mxu0 %v3670_v33 }
 0xc2c   :  { %v911_v24 = vpop.f32.mrf.mxu0 }
 0xc2d   :  { %v918_v53 = vadd.f32 %v911_v24, %v263_v49 }
 0xc2e   :  { %v913_v26 = vpop.f32.mrf.mxu0 }
 0xc2f   :  { %v919_v27 = vadd.f32 %v913_v26, %v264_v25  ;;  %v3165_v54 = vmul.f32 -1.442695, %v918_v53 }
 0xc31   :  { %v3166_v28 = vmul.f32 -1.442695, %v919_v27 }
 0xc33   :  { %3348 = vpow2.f32 %v3166_v28  ;;  %v44_v28 = vld [vmem:[%s4595_s0 + $0x38] sm:$0xff] }
 0xc40   :  { %v3349_v29 = vpop.eup %3348 }
 0xc41   :  { %v927_v30 = vadd.f32 1.0, %v3349_v29 }
 0xc43   :  { %3350 = vrcp.f32 %v927_v30 }
 0xc44   :  { %3352 = vpow2.f32 %v3165_v54 }
 0xc50   :  { %v3351_v31 = vpop.eup %3350 }
 0xc51   :  { %v932_v32 = vmul.f32 2.0, %v3351_v31  ;;  %v3353_v55 = vpop.eup %3352 }
 0xc52   :  { %v926_v56 = vadd.f32 1.0, %v3353_v55 }
 0xc53   :  { %v3167_v47 = vadd.f32 -1.0, %v932_v32 }
 0xc54   :  { %3354 = vrcp.f32 %v926_v56 }
 0xc55   :  { %936 = vrot.lane.b32.xlu1 %v3167_v47, %s3579_s1 }
 0xc61   :  { %v3355_v57 = vpop.eup %3354 }
 0xc62   :  { %v934_v61 = vmul.f32 %v3355_v57, %v835_v18 }
 0xcc7   :  { %v937_v58 = vpop.permute.xlu1 %936 }
 0xcc8   :  { %v939_v59 = vmul.f32 %v3355_v57, %v937_v58 }
 0xcca   :  { %941 = vrot.lane.b32.xlu0 %v939_v59, %s3579_s1 }
 0xcce   :  { %94 = vperm.xlu0 %3297, %v43_v60  }
 0xd3c   :  { %v942_v62 = vpop.permute.xlu0 %941 }
 0xd3d   :  { %v944_v63 = vadd.f32 %v942_v62, %v934_v61 }
 0xd3f   :  { %3356 = vtanh.f32 %v944_v63 }
 0xd49   :  { %v95_v3 = vpop.permute.xlu0 %94 }
 0xd4a   :  { %v206_v4 = vmul.f32 %v3651_v11, %v95_v3  ;;  %v205_v19 = vmul.f32 %v3647_v7, %v95_v3 }
 0xd4c   :  { %v3357_v0 = vpop.eup %3356  ;;  %v266_v6 = vadd.f32 %v3653_v13, %v206_v4  ;;  %v265_v20 = vadd.f32 %v3649_v8, %v205_v19 }
 0xd4d   :  { %947 = vrot.lane.b32.xlu1 %v3357_v0, %s3579_s1 }
 0xdbf   :  { %v948_v1 = vpop.permute.xlu1 %947 }
 0xdc0   :  { %v950_v2 = vmul.f32 %v3351_v31, %v948_v1 }
 0xdc2   :  { %3168 = vmatmul.mubr.msk.f32.vlgmr.msra.gmra.mxu1 %vm405_vm1, %v950_v2 }
 0xdc3   :  { %1189 = vmatpush1.msra.mxu1 %v3675_v34  ;;  %1236 = vmatprep.mubr.f32.mxu1 %v3580_v52 }
 0xdc4   :  { %1190 = vmatprep.subr.mxu1 %v3680_v35 }
 0xdc5   :  { %1191 = vmatpush1.msra.mxu1 %v3686_v36 }
 0xdc6   :  { %1192 = vmatprep.subr.mxu1 %v3693_v37 }
 0xdc7   :  { %1193 = vmatpush1.msra.mxu1 %v3700_v38 }
 0xdc8   :  { %1194 = vmatprep.subr.mxu1 %v3707_v39 }
 0xdc9   :  { %1195 = vmatpush1.msra.mxu1 %v3714_v40 }
 0xdca   :  { %1196 = vmatprep.subr.mxu1 %v3721_v41 }
 0xdcb   :  { %1197 = vmatpush1.msra.mxu1 %v3728_v42 }
 0xdcc   :  { %1198 = vmatprep.subr.mxu1 %v3735_v43 }
 0xdcd   :  { %1199 = vmatpush1.msra.mxu1 %v3742_v44 }
 0xdce   :  { %1200 = vmatprep.subr.mxu1 %v3749_v45 }
 0xdcf   :  { %1201 = vmatpush1.msra.mxu1 %v3756_v46 }
 0xdd0   :  { %1202 = vmatprep.subr.mxu1 %v3771_v50 }
 0xdd1   :  { %1203 = vmatpush1.msra.mxu1 %v3777_v51 }
 0xdd2   :  { %1406 = vmatprep.subr.mxu1 %v3670_v33 }
 0xe82   :  { %v1020_v5 = vpop.f32.mrf.mxu1 }
 0xe83   :  { %v1027_v21 = vadd.f32 %v1020_v5, %v265_v20 }
 0xe84   :  { %v1022_v9 = vpop.f32.mrf.mxu1 }
 0xe85   :  { %v1028_v10 = vadd.f32 %v1022_v9, %v266_v6  ;;  %v3169_v22 = vmul.f32 -1.442695, %v1027_v21 }
 0xe87   :  { %v3170_v12 = vmul.f32 -1.442695, %v1028_v10 }
 0xe89   :  { %3358 = vpow2.f32 %v3170_v12  ;;  %v45_v12 = vld [vmem:[%s4595_s0 + $0x40] sm:$0xff] }
 0xe96   :  { %v3359_v14 = vpop.eup %3358 }
 0xe97   :  { %v1036_v15 = vadd.f32 1.0, %v3359_v14 }
 0xe99   :  { %3360 = vrcp.f32 %v1036_v15 }
 0xe9a   :  { %3362 = vpow2.f32 %v3169_v22 }
 0xea6   :  { %v3361_v16 = vpop.eup %3360 }
 0xea7   :  { %v1041_v17 = vmul.f32 2.0, %v3361_v16  ;;  %v3363_v23 = vpop.eup %3362 }
 0xea8   :  { %v1035_v24 = vadd.f32 1.0, %v3363_v23 }
 0xea9   :  { %v3171_v18 = vadd.f32 -1.0, %v1041_v17 }
 0xeaa   :  { %3364 = vrcp.f32 %v1035_v24 }
 0xeab   :  { %1045 = vrot.lane.b32.xlu1 %v3171_v18, %s3579_s1 }
 0xeb7   :  { %v3365_v25 = vpop.eup %3364 }
 0xeb8   :  { %v1043_v29 = vmul.f32 %v3365_v25, %v944_v63 }
 0xf1d   :  { %v1046_v26 = vpop.permute.xlu1 %1045 }
 0xf1e   :  { %v1048_v27 = vmul.f32 %v3365_v25, %v1046_v26 }
 0xf20   :  { %1050 = vrot.lane.b32.xlu0 %v1048_v27, %s3579_s1 }
 0xf24   :  { %99 = vperm.xlu0 %3297, %v44_v28  }
 0xf92   :  { %v1051_v30 = vpop.permute.xlu0 %1050 }
 0xf93   :  { %v1053_v31 = vadd.f32 %v1051_v30, %v1043_v29 }
 0xf95   :  { %3366 = vtanh.f32 %v1053_v31 }
 0xf9f   :  { %v100_v49 = vpop.permute.xlu0 %99 }
 0xfa0   :  { %v208_v53 = vmul.f32 %v3651_v11, %v100_v49  ;;  %v207_v0 = vmul.f32 %v3647_v7, %v100_v49 }
 0xfa2   :  { %v3367_v32 = vpop.eup %3366  ;;  %v268_v55 = vadd.f32 %v3653_v13, %v208_v53  ;;  %v267_v1 = vadd.f32 %v3649_v8, %v207_v0 }
 0xfa3   :  { %1056 = vrot.lane.b32.xlu1 %v3367_v32, %s3579_s1 }
0x1015   :  { %v1057_v47 = vpop.permute.xlu1 %1056 }
0x1016   :  { %v1059_v48 = vmul.f32 %v3361_v16, %v1057_v47 }
0x1018   :  { %3172 = vmatmul.mubr.msk.f32.vlgmr.msra.gmra.mxu0 %vm405_vm1, %v1059_v48 }
0x1019   :  { %1298 = vmatpush1.msra.mxu0 %v3675_v34  ;;  %1345 = vmatprep.mubr.f32.mxu0 %v3580_v52 }
0x101a   :  { %1299 = vmatprep.subr.mxu0 %v3680_v35 }
0x101b   :  { %1300 = vmatpush1.msra.mxu0 %v3686_v36 }
0x101c   :  { %1301 = vmatprep.subr.mxu0 %v3693_v37 }
0x101d   :  { %1302 = vmatpush1.msra.mxu0 %v3700_v38 }
0x101e   :  { %1303 = vmatprep.subr.mxu0 %v3707_v39 }
0x101f   :  { %1304 = vmatpush1.msra.mxu0 %v3714_v40 }
0x1020   :  { %1305 = vmatprep.subr.mxu0 %v3721_v41 }
0x1021   :  { %1306 = vmatpush1.msra.mxu0 %v3728_v42 }
0x1022   :  { %1307 = vmatprep.subr.mxu0 %v3735_v43 }
0x1023   :  { %1308 = vmatpush1.msra.mxu0 %v3742_v44 }
0x1024   :  { %1309 = vmatprep.subr.mxu0 %v3749_v45 }
0x1025   :  { %1310 = vmatpush1.msra.mxu0 %v3756_v46 }
0x1026   :  { %1311 = vmatprep.subr.mxu0 %v3771_v50 }
0x1027   :  { %1312 = vmatpush1.msra.mxu0 %v3777_v51 }
0x1028   :  { %1515 = vmatprep.subr.mxu0 %v3670_v33 }
0x10d8   :  { %v1129_v54 = vpop.f32.mrf.mxu0 }
0x10d9   :  { %v1136_v2 = vadd.f32 %v1129_v54, %v267_v1 }
0x10da   :  { %v1131_v56 = vpop.f32.mrf.mxu0 }
0x10db   :  { %v1137_v57 = vadd.f32 %v1131_v56, %v268_v55  ;;  %v3173_v3 = vmul.f32 -1.442695, %v1136_v2 }
0x10dd   :  { %v3174_v58 = vmul.f32 -1.442695, %v1137_v57  ;;  %v46_v57 = vld [vmem:[%s4595_s0 + $0x48] sm:$0xff] }
0x10df   :  { %3368 = vpow2.f32 %v3174_v58 }
0x10ec   :  { %v3369_v59 = vpop.eup %3368 }
0x10ed   :  { %v1145_v60 = vadd.f32 1.0, %v3369_v59 }
0x10ef   :  { %3370 = vrcp.f32 %v1145_v60 }
0x10f0   :  { %3372 = vpow2.f32 %v3173_v3 }
0x10fc   :  { %v3371_v61 = vpop.eup %3370 }
0x10fd   :  { %v1150_v62 = vmul.f32 2.0, %v3371_v61  ;;  %v3373_v4 = vpop.eup %3372 }
0x10fe   :  { %v1144_v5 = vadd.f32 1.0, %v3373_v4 }
0x10ff   :  { %v3175_v63 = vadd.f32 -1.0, %v1150_v62 }
0x1100   :  { %3374 = vrcp.f32 %v1144_v5 }
0x1101   :  { %1154 = vrot.lane.b32.xlu1 %v3175_v63, %s3579_s1 }
0x110d   :  { %v3375_v6 = vpop.eup %3374 }
0x110e   :  { %v1152_v14 = vmul.f32 %v3375_v6, %v1053_v31 }
0x1173   :  { %v1155_v9 = vpop.permute.xlu1 %1154 }
0x1174   :  { %v1157_v10 = vmul.f32 %v3375_v6, %v1155_v9  ;;  %v47_v9 = vld [vmem:[%s4595_s0 + $0x50] sm:$0xff] }
0x1176   :  { %1159 = vrot.lane.b32.xlu0 %v1157_v10, %s3579_s1 }
0x117a   :  { %104 = vperm.xlu0 %3297, %v45_v12  }
0x11e8   :  { %v1160_v15 = vpop.permute.xlu0 %1159 }
0x11e9   :  { %v1162_v16 = vadd.f32 %v1160_v15, %v1152_v14 }
0x11eb   :  { %3376 = vtanh.f32 %v1162_v16 }
0x11f5   :  { %v105_v20 = vpop.permute.xlu0 %104 }
0x11f6   :  { %v210_v21 = vmul.f32 %v3651_v11, %v105_v20 }
0x11f8   :  { %v3377_v17 = vpop.eup %3376  ;;  %v270_v23 = vadd.f32 %v3653_v13, %v210_v21  ;;  %v4072_v21 = vld [vmem:[%s4598_s3 + $0x58] sm:$0xff] }
0x11f9   :  { %1165 = vrot.lane.b32.xlu1 %v3377_v17, %s3579_s1 }
0x126b   :  { %v1166_v18 = vpop.permute.xlu1 %1165 }
0x126c   :  { %v1168_v19 = vmul.f32 %v3371_v61, %v1166_v18  ;;  %v4053_v18 = vld [vmem:[%s4598_s3 + $0x70] sm:$0xff] }
0x126e   :  { %3176 = vmatmul.mubr.msk.f32.vlgmr.msra.gmra.mxu1 %vm405_vm1, %v1168_v19  ;;  %v4060_v19 = vld [vmem:[%s4598_s3 + $0x68] sm:$0xff] }
0x126f   :  { %1407 = vmatpush1.msra.mxu1 %v3675_v34  ;;  %1454 = vmatprep.mubr.f32.mxu1 %v3580_v52 }
0x1270   :  { %1408 = vmatprep.subr.mxu1 %v3680_v35 }
0x1271   :  { %1409 = vmatpush1.msra.mxu1 %v3686_v36 }
0x1272   :  { %1410 = vmatprep.subr.mxu1 %v3693_v37 }
0x1273   :  { %1411 = vmatpush1.msra.mxu1 %v3700_v38 }
0x1274   :  { %1412 = vmatprep.subr.mxu1 %v3707_v39 }
0x1275   :  { %1413 = vmatpush1.msra.mxu1 %v3714_v40 }
0x1276   :  { %1414 = vmatprep.subr.mxu1 %v3721_v41 }
0x1277   :  { %1415 = vmatpush1.msra.mxu1 %v3728_v42 }
0x1278   :  { %1416 = vmatprep.subr.mxu1 %v3735_v43 }
0x1279   :  { %1417 = vmatpush1.msra.mxu1 %v3742_v44 }
0x127a   :  { %1418 = vmatprep.subr.mxu1 %v3749_v45 }
0x127b   :  { %1419 = vmatpush1.msra.mxu1 %v3756_v46 }
0x127c   :  { %1420 = vmatprep.subr.mxu1 %v3771_v50 }
0x127d   :  { %1421 = vmatpush1.msra.mxu1 %v3777_v51 }
0x127e   :  { %1624 = vmatprep.subr.mxu1 %v3670_v33  ;;  %v209_v33 = vmul.f32 %v3647_v7, %v105_v20  ;;  %v4066_v20 = vld [vmem:[%s4598_s3 + $0x60] sm:$0xff] }
0x1280   :  { %v269_v32 = vadd.f32 %v3649_v8, %v209_v33  ;;  %v4138_v33 = vld [vmem:[%s4598_s3] sm:$0xff] }
0x132e   :  { %v1238_v22 = vpop.f32.mrf.mxu1 }
0x132f   :  { %v1245_v47 = vadd.f32 %v1238_v22, %v269_v32  ;;  %v4078_v22 = vld [vmem:[%s4598_s3 + $0x50] sm:$0xff] }
0x1330   :  { %v1240_v24 = vpop.f32.mrf.mxu1 }
0x1331   :  { %v1246_v25 = vadd.f32 %v1240_v24, %v270_v23  ;;  %v3177_v48 = vmul.f32 -1.442695, %v1245_v47  ;;  %v4084_v23 = vld [vmem:[%s4598_s3 + $0x48] sm:$0xff]  ;;  %v4090_v24 = vld [vmem:[%s4598_s3 + $0x40] sm:$0xff] }
0x1333   :  { %v3178_v26 = vmul.f32 -1.442695, %v1246_v25  ;;  %v4096_v25 = vld [vmem:[%s4598_s3 + $0x38] sm:$0xff] }
0x1335   :  { %3378 = vpow2.f32 %v3178_v26  ;;  %v4102_v26 = vld [vmem:[%s4598_s3 + $0x30] sm:$0xff] }
0x1342   :  { %v3379_v27 = vpop.eup %3378 }
0x1343   :  { %v1254_v28 = vadd.f32 1.0, %v3379_v27  ;;  %v4108_v27 = vld [vmem:[%s4598_s3 + $0x28] sm:$0xff] }
0x1345   :  { %3380 = vrcp.f32 %v1254_v28  ;;  %v4114_v28 = vld [vmem:[%s4598_s3 + $0x20] sm:$0xff] }
0x1346   :  { %3382 = vpow2.f32 %v3177_v48 }
0x1352   :  { %v3381_v29 = vpop.eup %3380 }
0x1353   :  { %v1259_v30 = vmul.f32 2.0, %v3381_v29  ;;  %v3383_v49 = vpop.eup %3382 }
0x1354   :  { %v1253_v53 = vadd.f32 1.0, %v3383_v49 }
0x1355   :  { %v3179_v31 = vadd.f32 -1.0, %v1259_v30  ;;  %v4126_v30 = vld [vmem:[%s4598_s3 + $0x10] sm:$0xff] }
0x1356   :  { %3384 = vrcp.f32 %v1253_v53 }
0x1357   :  { %1263 = vrot.lane.b32.xlu1 %v3179_v31, %s3579_s1  ;;  %v4132_v31 = vld [vmem:[%s4598_s3 + $0x8] sm:$0xff] }
0x1363   :  { %v3385_v54 = vpop.eup %3384 }
0x1364   :  { %v1261_v58 = vmul.f32 %v3385_v54, %v1162_v16 }
0x13c9   :  { %v1264_v55 = vpop.permute.xlu1 %1263 }
0x13ca   :  { %v1266_v56 = vmul.f32 %v3385_v54, %v1264_v55 }
0x13cc   :  { %1268 = vrot.lane.b32.xlu0 %v1266_v56, %s3579_s1 }
0x13d0   :  { %109 = vperm.xlu0 %3297, %v46_v57  }
0x143e   :  { %v1269_v59 = vpop.permute.xlu0 %1268 }
0x143f   :  { %v1271_v60 = vadd.f32 %v1269_v59, %v1261_v58 }
0x1441   :  { %3386 = vtanh.f32 %v1271_v60 }
0x144e   :  { %v3387_v61 = vpop.eup %3386 }
0x144f   :  { %1274 = vrot.lane.b32.xlu1 %v3387_v61, %s3579_s1 }
0x14c1   :  { %v1275_v62 = vpop.permute.xlu1 %1274 }
0x14c2   :  { %v1277_v63 = vmul.f32 %v3381_v29, %v1275_v62  ;;  %v4120_v29 = vld [vmem:[%s4598_s3 + $0x18] sm:$0xff] }
0x14c4   :  { %3180 = vmatmul.mubr.msk.f32.vlgmr.msra.gmra.mxu0 %vm405_vm1, %v1277_v63 }
0x14c5   :  { %1516 = vmatpush1.msra.mxu0 %v3675_v34  ;;  %1563 = vmatprep.mubr.f32.mxu0 %v3580_v52  ;;  %v4033_v34 = vld [vmem:[%s4598_s3 + $0x78] sm:$0xff] }
0x14c6   :  { %1517 = vmatprep.subr.mxu0 %v3680_v35  ;;  %v110_v35 = vpop.permute.xlu0 %109 }
0x14c7   :  { %1518 = vmatpush1.msra.mxu0 %v3686_v36  ;;  %v212_v36 = vmul.f32 %v3651_v11, %v110_v35 }
0x14c8   :  { %1519 = vmatprep.subr.mxu0 %v3693_v37 }
0x14c9   :  { %1520 = vmatpush1.msra.mxu0 %v3700_v38  ;;  %v272_v38 = vadd.f32 %v3653_v13, %v212_v36 }
0x14ca   :  { %1521 = vmatprep.subr.mxu0 %v3707_v39 }
0x14cb   :  { %1522 = vmatpush1.msra.mxu0 %v3714_v40 }
0x14cc   :  { %1523 = vmatprep.subr.mxu0 %v3721_v41 }
0x14cd   :  { %1524 = vmatpush1.msra.mxu0 %v3728_v42 }
0x14ce   :  { %1525 = vmatprep.subr.mxu0 %v3735_v43 }
0x14cf   :  { %1526 = vmatpush1.msra.mxu0 %v3742_v44 }
0x14d0   :  { %1527 = vmatprep.subr.mxu0 %v3749_v45 }
0x14d1   :  { %1528 = vmatpush1.msra.mxu0 %v3756_v46 }
0x14d2   :  { %1529 = vmatprep.subr.mxu0 %v3771_v50  ;;  %v211_v50 = vmul.f32 %v3647_v7, %v110_v35 }
0x14d3   :  { %1530 = vmatpush1.msra.mxu0 %v3777_v51 }
0x14d4   :  { %1733 = vmatprep.subr.mxu0 %v4033_v34  ;;  %v271_v51 = vadd.f32 %v3649_v8, %v211_v50 }
0x1584   :  { %v1347_v37 = vpop.f32.mrf.mxu0 }
0x1585   :  { %v1354_v0 = vadd.f32 %v1347_v37, %v271_v51 }
0x1586   :  { %v1349_v39 = vpop.f32.mrf.mxu0 }
0x1587   :  { %v1355_v40 = vadd.f32 %v1349_v39, %v272_v38  ;;  %v3181_v1 = vmul.f32 -1.442695, %v1354_v0 }
0x1589   :  { %v3182_v41 = vmul.f32 -1.442695, %v1355_v40 }
0x158b   :  { %3388 = vpow2.f32 %v3182_v41  ;;  %v48_v41 = vld [vmem:[%s4595_s0 + $0x58] sm:$0xff] }
0x1598   :  { %v3389_v42 = vpop.eup %3388 }
0x1599   :  { %v1363_v43 = vadd.f32 1.0, %v3389_v42 }
0x159b   :  { %3390 = vrcp.f32 %v1363_v43 }
0x159c   :  { %3392 = vpow2.f32 %v3181_v1 }
0x15a8   :  { %v3391_v44 = vpop.eup %3390 }
0x15a9   :  { %v1368_v45 = vmul.f32 2.0, %v3391_v44  ;;  %v3393_v2 = vpop.eup %3392 }
0x15aa   :  { %v1362_v3 = vadd.f32 1.0, %v3393_v2 }
0x15ab   :  { %v3183_v46 = vadd.f32 -1.0, %v1368_v45 }
0x15ac   :  { %3394 = vrcp.f32 %v1362_v3 }
0x15ad   :  { %1372 = vrot.lane.b32.xlu1 %v3183_v46, %s3579_s1 }
0x15b9   :  { %v3395_v4 = vpop.eup %3394 }
0x15ba   :  { %v1370_v10 = vmul.f32 %v3395_v4, %v1271_v60 }
0x161f   :  { %v1373_v5 = vpop.permute.xlu1 %1372 }
0x1620   :  { %v1375_v6 = vmul.f32 %v3395_v4, %v1373_v5 }
0x1622   :  { %1377 = vrot.lane.b32.xlu0 %v1375_v6, %s3579_s1 }
0x1626   :  { %114 = vperm.xlu0 %3297, %v47_v9  }
0x1694   :  { %v1378_v12 = vpop.permute.xlu0 %1377 }
0x1695   :  { %v4045_v14 = vadd.f32 %v1378_v12, %v1370_v10 }
0x1697   :  { %3396 = vtanh.f32 %v4045_v14 }
0x16a1   :  { %v115_v32 = vpop.permute.xlu0 %114 }
0x16a2   :  { %v214_v47 = vmul.f32 %v3651_v11, %v115_v32  ;;  %v213_v61 = vmul.f32 %v3647_v7, %v115_v32 }
0x16a4   :  { %v3397_v15 = vpop.eup %3396  ;;  %v274_v49 = vadd.f32 %v3653_v13, %v214_v47  ;;  %v273_v62 = vadd.f32 %v3649_v8, %v213_v61 }
0x16a5   :  { %1383 = vrot.lane.b32.xlu1 %v3397_v15, %s3579_s1 }
0x1717   :  { %v1384_v16 = vpop.permute.xlu1 %1383 }
0x1718   :  { %v1386_v17 = vmul.f32 %v3391_v44, %v1384_v16 }
0x171a   :  { %3184 = vmatmul.mubr.msk.f32.vlgmr.msra.gmra.mxu1 %vm405_vm1, %v1386_v17 }
0x171b   :  { %1625 = vmatpush1.msra.mxu1 %v4053_v18  ;;  %1672 = vmatprep.mubr.f32.mxu1 %v3580_v52 }
0x171c   :  { %1626 = vmatprep.subr.mxu1 %v4060_v19 }
0x171d   :  { %1627 = vmatpush1.msra.mxu1 %v4066_v20 }
0x171e   :  { %1628 = vmatprep.subr.mxu1 %v4072_v21 }
0x171f   :  { %1629 = vmatpush1.msra.mxu1 %v4078_v22 }
0x1720   :  { %1630 = vmatprep.subr.mxu1 %v4084_v23 }
0x1721   :  { %1631 = vmatpush1.msra.mxu1 %v4090_v24 }
0x1722   :  { %1632 = vmatprep.subr.mxu1 %v4096_v25 }
0x1723   :  { %1633 = vmatpush1.msra.mxu1 %v4102_v26 }
0x1724   :  { %1634 = vmatprep.subr.mxu1 %v4108_v27 }
0x1725   :  { %1635 = vmatpush1.msra.mxu1 %v4114_v28 }
0x1726   :  { %1636 = vmatprep.subr.mxu1 %v4120_v29 }
0x1727   :  { %1637 = vmatpush1.msra.mxu1 %v4126_v30 }
0x1728   :  { %1638 = vmatprep.subr.mxu1 %v4132_v31 }
0x1729   :  { %1639 = vmatpush1.msra.mxu1 %v4138_v33 }
0x172a   :  { %1842 = vmatprep.subr.mxu1 %v4033_v34 }
0x17da   :  { %v1456_v48 = vpop.f32.mrf.mxu1 }
0x17db   :  { %v1463_v63 = vadd.f32 %v1456_v48, %v273_v62 }
0x17dc   :  { %v1458_v53 = vpop.f32.mrf.mxu1 }
0x17dd   :  { %v1464_v54 = vadd.f32 %v1458_v53, %v274_v49  ;;  %v3185_v35 = vmul.f32 -1.442695, %v1463_v63 }
0x17df   :  { %v3186_v55 = vmul.f32 -1.442695, %v1464_v54 }
0x17e1   :  { %3398 = vpow2.f32 %v3186_v55  ;;  %v49_v55 = vld [vmem:[%s4595_s0 + $0x60] sm:$0xff] }
0x17ee   :  { %v3399_v56 = vpop.eup %3398 }
0x17ef   :  { %v1472_v57 = vadd.f32 1.0, %v3399_v56 }
0x17f1   :  { %3400 = vrcp.f32 %v1472_v57 }
0x17f2   :  { %3402 = vpow2.f32 %v3185_v35 }
0x17fe   :  { %v3401_v58 = vpop.eup %3400 }
0x17ff   :  { %v1477_v59 = vmul.f32 2.0, %v3401_v58  ;;  %v3403_v36 = vpop.eup %3402 }
0x1800   :  { %v1471_v37 = vadd.f32 1.0, %v3403_v36 }
0x1801   :  { %v3187_v60 = vadd.f32 -1.0, %v1477_v59 }
0x1802   :  { %3404 = vrcp.f32 %v1471_v37 }
0x1803   :  { %1481 = vrot.lane.b32.xlu1 %v3187_v60, %s3579_s1 }
0x180f   :  { %v3405_v38 = vpop.eup %3404 }
0x1810   :  { %v1479_v42 = vmul.f32 %v3405_v38, %v4045_v14 }
0x1875   :  { %v1482_v39 = vpop.permute.xlu1 %1481 }
0x1876   :  { %v1484_v40 = vmul.f32 %v3405_v38, %v1482_v39 }
0x1878   :  { %1486 = vrot.lane.b32.xlu0 %v1484_v40, %s3579_s1 }
0x187c   :  { %119 = vperm.xlu0 %3297, %v48_v41  }
0x18ea   :  { %v1487_v43 = vpop.permute.xlu0 %1486 }
0x18eb   :  { %v1489_v44 = vadd.f32 %v1487_v43, %v1479_v42 }
0x18ed   :  { %3406 = vtanh.f32 %v1489_v44 }
0x18f7   :  { %v120_v51 = vpop.permute.xlu0 %119 }
0x18f8   :  { %v216_v0 = vmul.f32 %v3651_v11, %v120_v51  ;;  %v215_v15 = vmul.f32 %v3647_v7, %v120_v51 }
0x18fa   :  { %v3407_v45 = vpop.eup %3406  ;;  %v276_v2 = vadd.f32 %v3653_v13, %v216_v0  ;;  %v275_v16 = vadd.f32 %v3649_v8, %v215_v15 }
0x18fb   :  { %1492 = vrot.lane.b32.xlu1 %v3407_v45, %s3579_s1 }
0x196d   :  { %v1493_v46 = vpop.permute.xlu1 %1492 }
0x196e   :  { %v1495_v50 = vmul.f32 %v3401_v58, %v1493_v46 }
0x1970   :  { %3188 = vmatmul.mubr.msk.f32.vlgmr.msra.gmra.mxu0 %vm405_vm1, %v1495_v50 }
0x1971   :  { %1734 = vmatpush1.msra.mxu0 %v4053_v18  ;;  %1781 = vmatprep.mubr.f32.mxu0 %v3580_v52 }
0x1972   :  { %1735 = vmatprep.subr.mxu0 %v4060_v19 }
0x1973   :  { %1736 = vmatpush1.msra.mxu0 %v4066_v20 }
0x1974   :  { %1737 = vmatprep.subr.mxu0 %v4072_v21 }
0x1975   :  { %1738 = vmatpush1.msra.mxu0 %v4078_v22 }
0x1976   :  { %1739 = vmatprep.subr.mxu0 %v4084_v23 }
0x1977   :  { %1740 = vmatpush1.msra.mxu0 %v4090_v24 }
0x1978   :  { %1741 = vmatprep.subr.mxu0 %v4096_v25 }
0x1979   :  { %1742 = vmatpush1.msra.mxu0 %v4102_v26 }
0x197a   :  { %1743 = vmatprep.subr.mxu0 %v4108_v27 }
0x197b   :  { %1744 = vmatpush1.msra.mxu0 %v4114_v28 }
0x197c   :  { %1745 = vmatprep.subr.mxu0 %v4120_v29 }
0x197d   :  { %1746 = vmatpush1.msra.mxu0 %v4126_v30 }
0x197e   :  { %1747 = vmatprep.subr.mxu0 %v4132_v31 }
0x197f   :  { %1748 = vmatpush1.msra.mxu0 %v4138_v33 }
0x1980   :  { %1951 = vmatprep.subr.mxu0 %v4033_v34 }
0x1a30   :  { %v1565_v1 = vpop.f32.mrf.mxu0 }
0x1a31   :  { %v1572_v17 = vadd.f32 %v1565_v1, %v275_v16 }
0x1a32   :  { %v1567_v3 = vpop.f32.mrf.mxu0 }
0x1a33   :  { %v1573_v4 = vadd.f32 %v1567_v3, %v276_v2  ;;  %v3189_v32 = vmul.f32 -1.442695, %v1572_v17 }
0x1a35   :  { %v3190_v5 = vmul.f32 -1.442695, %v1573_v4 }
0x1a37   :  { %3408 = vpow2.f32 %v3190_v5  ;;  %v50_v5 = vld [vmem:[%s4595_s0 + $0x68] sm:$0xff] }
0x1a44   :  { %v3409_v6 = vpop.eup %3408 }
0x1a45   :  { %v1581_v9 = vadd.f32 1.0, %v3409_v6 }
0x1a47   :  { %3410 = vrcp.f32 %v1581_v9 }
0x1a48   :  { %3412 = vpow2.f32 %v3189_v32 }
0x1a54   :  { %v3411_v10 = vpop.eup %3410 }
0x1a55   :  { %v1586_v12 = vmul.f32 2.0, %v3411_v10  ;;  %v3413_v47 = vpop.eup %3412 }
0x1a56   :  { %v1580_v48 = vadd.f32 1.0, %v3413_v47 }
0x1a57   :  { %v3191_v14 = vadd.f32 -1.0, %v1586_v12 }
0x1a58   :  { %3414 = vrcp.f32 %v1580_v48 }
0x1a59   :  { %1590 = vrot.lane.b32.xlu1 %v3191_v14, %s3579_s1 }
0x1a65   :  { %v3415_v49 = vpop.eup %3414 }
0x1a66   :  { %v1588_v56 = vmul.f32 %v3415_v49, %v1489_v44 }
0x1acb   :  { %v1591_v53 = vpop.permute.xlu1 %1590 }
0x1acc   :  { %v1593_v54 = vmul.f32 %v3415_v49, %v1591_v53 }
0x1ace   :  { %1595 = vrot.lane.b32.xlu0 %v1593_v54, %s3579_s1 }
0x1ad2   :  { %124 = vperm.xlu0 %3297, %v49_v55  }
0x1b40   :  { %v1596_v57 = vpop.permute.xlu0 %1595 }
0x1b41   :  { %v1598_v58 = vadd.f32 %v1596_v57, %v1588_v56 }
0x1b43   :  { %3416 = vtanh.f32 %v1598_v58 }
0x1b4d   :  { %v125_v62 = vpop.permute.xlu0 %124 }
0x1b4e   :  { %v218_v63 = vmul.f32 %v3651_v11, %v125_v62  ;;  %v217_v45 = vmul.f32 %v3647_v7, %v125_v62 }
0x1b50   :  { %v3417_v59 = vpop.eup %3416  ;;  %v278_v36 = vadd.f32 %v3653_v13, %v218_v63  ;;  %v277_v46 = vadd.f32 %v3649_v8, %v217_v45 }
0x1b51   :  { %1601 = vrot.lane.b32.xlu1 %v3417_v59, %s3579_s1 }
0x1bc3   :  { %v1602_v60 = vpop.permute.xlu1 %1601 }
0x1bc4   :  { %v1604_v61 = vmul.f32 %v3411_v10, %v1602_v60 }
0x1bc6   :  { %3192 = vmatmul.mubr.msk.f32.vlgmr.msra.gmra.mxu1 %vm405_vm1, %v1604_v61 }
0x1bc7   :  { %1843 = vmatpush1.msra.mxu1 %v4053_v18  ;;  %1890 = vmatprep.mubr.f32.mxu1 %v3580_v52 }
0x1bc8   :  { %1844 = vmatprep.subr.mxu1 %v4060_v19 }
0x1bc9   :  { %1845 = vmatpush1.msra.mxu1 %v4066_v20 }
0x1bca   :  { %1846 = vmatprep.subr.mxu1 %v4072_v21 }
0x1bcb   :  { %1847 = vmatpush1.msra.mxu1 %v4078_v22 }
0x1bcc   :  { %1848 = vmatprep.subr.mxu1 %v4084_v23 }
0x1bcd   :  { %1849 = vmatpush1.msra.mxu1 %v4090_v24 }
0x1bce   :  { %1850 = vmatprep.subr.mxu1 %v4096_v25 }
0x1bcf   :  { %1851 = vmatpush1.msra.mxu1 %v4102_v26 }
0x1bd0   :  { %1852 = vmatprep.subr.mxu1 %v4108_v27 }
0x1bd1   :  { %1853 = vmatpush1.msra.mxu1 %v4114_v28 }
0x1bd2   :  { %1854 = vmatprep.subr.mxu1 %v4120_v29 }
0x1bd3   :  { %1855 = vmatpush1.msra.mxu1 %v4126_v30 }
0x1bd4   :  { %1856 = vmatprep.subr.mxu1 %v4132_v31 }
0x1bd5   :  { %1857 = vmatpush1.msra.mxu1 %v4138_v33 }
0x1bd6   :  { %2060 = vmatprep.subr.mxu1 %v4033_v34 }
0x1c86   :  { %v1674_v35 = vpop.f32.mrf.mxu1 }
0x1c87   :  { %v1681_v50 = vadd.f32 %v1674_v35, %v277_v46 }
0x1c88   :  { %v1676_v37 = vpop.f32.mrf.mxu1 }
0x1c89   :  { %v1682_v38 = vadd.f32 %v1676_v37, %v278_v36  ;;  %v3193_v51 = vmul.f32 -1.442695, %v1681_v50 }
0x1c8b   :  { %v3194_v39 = vmul.f32 -1.442695, %v1682_v38 }
0x1c8d   :  { %3418 = vpow2.f32 %v3194_v39  ;;  %v51_v39 = vld [vmem:[%s4595_s0 + $0x70] sm:$0xff] }
0x1c9a   :  { %v3419_v40 = vpop.eup %3418 }
0x1c9b   :  { %v1690_v41 = vadd.f32 1.0, %v3419_v40 }
0x1c9d   :  { %3420 = vrcp.f32 %v1690_v41 }
0x1c9e   :  { %3422 = vpow2.f32 %v3193_v51 }
0x1caa   :  { %v3421_v42 = vpop.eup %3420 }
0x1cab   :  { %v1695_v43 = vmul.f32 2.0, %v3421_v42  ;;  %v3423_v0 = vpop.eup %3422 }
0x1cac   :  { %v1689_v1 = vadd.f32 1.0, %v3423_v0 }
0x1cad   :  { %v3195_v44 = vadd.f32 -1.0, %v1695_v43 }
0x1cae   :  { %3424 = vrcp.f32 %v1689_v1 }
0x1caf   :  { %1699 = vrot.lane.b32.xlu1 %v3195_v44, %s3579_s1 }
0x1cbb   :  { %v3425_v2 = vpop.eup %3424 }
0x1cbc   :  { %v1697_v6 = vmul.f32 %v3425_v2, %v1598_v58 }
0x1d21   :  { %v1700_v3 = vpop.permute.xlu1 %1699 }
0x1d22   :  { %v1702_v4 = vmul.f32 %v3425_v2, %v1700_v3 }
0x1d24   :  { %1704 = vrot.lane.b32.xlu0 %v1702_v4, %s3579_s1 }
0x1d28   :  { %129 = vperm.xlu0 %3297, %v50_v5  }
0x1d96   :  { %v1705_v9 = vpop.permute.xlu0 %1704 }
0x1d97   :  { %v1707_v10 = vadd.f32 %v1705_v9, %v1697_v6 }
0x1d99   :  { %3426 = vtanh.f32 %v1707_v10 }
0x1da3   :  { %v130_v16 = vpop.permute.xlu0 %129 }
0x1da4   :  { %v220_v17 = vmul.f32 %v3651_v11, %v130_v16  ;;  %v219_v59 = vmul.f32 %v3647_v7, %v130_v16 }
0x1da6   :  { %v3427_v12 = vpop.eup %3426  ;;  %v280_v47 = vadd.f32 %v3653_v13, %v220_v17  ;;  %v279_v60 = vadd.f32 %v3649_v8, %v219_v59 }
0x1da7   :  { %1710 = vrot.lane.b32.xlu1 %v3427_v12, %s3579_s1 }
0x1e19   :  { %v1711_v14 = vpop.permute.xlu1 %1710 }
0x1e1a   :  { %v1713_v15 = vmul.f32 %v3421_v42, %v1711_v14 }
0x1e1c   :  { %3196 = vmatmul.mubr.msk.f32.vlgmr.msra.gmra.mxu0 %vm405_vm1, %v1713_v15 }
0x1e1d   :  { %1952 = vmatpush1.msra.mxu0 %v4053_v18  ;;  %1999 = vmatprep.mubr.f32.mxu0 %v3580_v52 }
0x1e1e   :  { %1953 = vmatprep.subr.mxu0 %v4060_v19 }
0x1e1f   :  { %1954 = vmatpush1.msra.mxu0 %v4066_v20 }
0x1e20   :  { %1955 = vmatprep.subr.mxu0 %v4072_v21 }
0x1e21   :  { %1956 = vmatpush1.msra.mxu0 %v4078_v22 }
0x1e22   :  { %1957 = vmatprep.subr.mxu0 %v4084_v23 }
0x1e23   :  { %1958 = vmatpush1.msra.mxu0 %v4090_v24 }
0x1e24   :  { %1959 = vmatprep.subr.mxu0 %v4096_v25 }
0x1e25   :  { %1960 = vmatpush1.msra.mxu0 %v4102_v26 }
0x1e26   :  { %1961 = vmatprep.subr.mxu0 %v4108_v27 }
0x1e27   :  { %1962 = vmatpush1.msra.mxu0 %v4114_v28 }
0x1e28   :  { %1963 = vmatprep.subr.mxu0 %v4120_v29 }
0x1e29   :  { %1964 = vmatpush1.msra.mxu0 %v4126_v30 }
0x1e2a   :  { %1965 = vmatprep.subr.mxu0 %v4132_v31 }
0x1e2b   :  { %1966 = vmatpush1.msra.mxu0 %v4138_v33 }
0x1e2c   :  { %2169 = vmatprep.subr.mxu0 %v4033_v34 }
0x1edc   :  { %v1783_v32 = vpop.f32.mrf.mxu0 }
0x1edd   :  { %v1790_v61 = vadd.f32 %v1783_v32, %v279_v60 }
0x1ede   :  { %v1785_v48 = vpop.f32.mrf.mxu0 }
0x1edf   :  { %v1791_v49 = vadd.f32 %v1785_v48, %v280_v47  ;;  %v3197_v62 = vmul.f32 -1.442695, %v1790_v61 }
0x1ee1   :  { %v3198_v53 = vmul.f32 -1.442695, %v1791_v49 }
0x1ee3   :  { %3428 = vpow2.f32 %v3198_v53  ;;  %v52_v53 = vld [vmem:[%s4595_s0 + $0x78] sm:$0xff] }
0x1ef0   :  { %v3429_v54 = vpop.eup %3428 }
0x1ef1   :  { %v1799_v55 = vadd.f32 1.0, %v3429_v54 }
0x1ef3   :  { %3430 = vrcp.f32 %v1799_v55 }
0x1ef4   :  { %3432 = vpow2.f32 %v3197_v62 }
0x1f00   :  { %v3431_v56 = vpop.eup %3430 }
0x1f01   :  { %v1804_v57 = vmul.f32 2.0, %v3431_v56  ;;  %v3433_v63 = vpop.eup %3432 }
0x1f02   :  { %v1798_v35 = vadd.f32 1.0, %v3433_v63 }
0x1f03   :  { %v3199_v58 = vadd.f32 -1.0, %v1804_v57 }
0x1f04   :  { %3434 = vrcp.f32 %v1798_v35 }
0x1f05   :  { %1808 = vrot.lane.b32.xlu1 %v3199_v58, %s3579_s1 }
0x1f11   :  { %v3435_v36 = vpop.eup %3434 }
0x1f12   :  { %v1806_v40 = vmul.f32 %v3435_v36, %v1707_v10 }
0x1f77   :  { %v1809_v37 = vpop.permute.xlu1 %1808 }
0x1f78   :  { %v1811_v38 = vmul.f32 %v3435_v36, %v1809_v37 }
0x1f7a   :  { %1813 = vrot.lane.b32.xlu0 %v1811_v38, %s3579_s1 }
0x1f7e   :  { %134 = vperm.xlu0 %3297, %v51_v39  }
0x1fec   :  { %v1814_v41 = vpop.permute.xlu0 %1813 }
0x1fed   :  { %v1816_v42 = vadd.f32 %v1814_v41, %v1806_v40 }
0x1fef   :  { %3436 = vtanh.f32 %v1816_v42 }
0x1ff9   :  { %v135_v46 = vpop.permute.xlu0 %134 }
0x1ffa   :  { %v222_v50 = vmul.f32 %v3651_v11, %v135_v46  ;;  %v221_v12 = vmul.f32 %v3647_v7, %v135_v46 }
0x1ffc   :  { %v3437_v43 = vpop.eup %3436  ;;  %v282_v0 = vadd.f32 %v3653_v13, %v222_v50  ;;  %v281_v14 = vadd.f32 %v3649_v8, %v221_v12 }
0x1ffd   :  { %1819 = vrot.lane.b32.xlu1 %v3437_v43, %s3579_s1 }
0x206f   :  { %v1820_v44 = vpop.permute.xlu1 %1819 }
0x2070   :  { %v1822_v45 = vmul.f32 %v3431_v56, %v1820_v44 }
0x2072   :  { %3200 = vmatmul.mubr.msk.f32.vlgmr.msra.gmra.mxu1 %vm405_vm1, %v1822_v45 }
0x2073   :  { %2061 = vmatpush1.msra.mxu1 %v4053_v18  ;;  %2108 = vmatprep.mubr.f32.mxu1 %v3580_v52 }
0x2074   :  { %2062 = vmatprep.subr.mxu1 %v4060_v19 }
0x2075   :  { %2063 = vmatpush1.msra.mxu1 %v4066_v20 }
0x2076   :  { %2064 = vmatprep.subr.mxu1 %v4072_v21 }
0x2077   :  { %2065 = vmatpush1.msra.mxu1 %v4078_v22 }
0x2078   :  { %2066 = vmatprep.subr.mxu1 %v4084_v23 }
0x2079   :  { %2067 = vmatpush1.msra.mxu1 %v4090_v24 }
0x207a   :  { %2068 = vmatprep.subr.mxu1 %v4096_v25 }
0x207b   :  { %2069 = vmatpush1.msra.mxu1 %v4102_v26 }
0x207c   :  { %2070 = vmatprep.subr.mxu1 %v4108_v27 }
0x207d   :  { %2071 = vmatpush1.msra.mxu1 %v4114_v28 }
0x207e   :  { %2072 = vmatprep.subr.mxu1 %v4120_v29 }
0x207f   :  { %2073 = vmatpush1.msra.mxu1 %v4126_v30 }
0x2080   :  { %2074 = vmatprep.subr.mxu1 %v4132_v31 }
0x2081   :  { %2075 = vmatpush1.msra.mxu1 %v4138_v33 }
0x2082   :  { %2278 = vmatprep.subr.mxu1 %v4033_v34 }
0x2132   :  { %v1892_v51 = vpop.f32.mrf.mxu1 }
0x2133   :  { %v1899_v15 = vadd.f32 %v1892_v51, %v281_v14 }
0x2134   :  { %v1894_v1 = vpop.f32.mrf.mxu1 }
0x2135   :  { %v1900_v2 = vadd.f32 %v1894_v1, %v282_v0  ;;  %v3201_v16 = vmul.f32 -1.442695, %v1899_v15 }
0x2137   :  { %v3202_v3 = vmul.f32 -1.442695, %v1900_v2 }
0x2139   :  { %3438 = vpow2.f32 %v3202_v3  ;;  %v53_v3 = vld [vmem:[%s4595_s0 + $0x80] sm:$0xff] }
0x2146   :  { %v3439_v4 = vpop.eup %3438 }
0x2147   :  { %v1908_v5 = vadd.f32 1.0, %v3439_v4 }
0x2149   :  { %3440 = vrcp.f32 %v1908_v5 }
0x214a   :  { %3442 = vpow2.f32 %v3201_v16 }
0x2156   :  { %v3441_v6 = vpop.eup %3440 }
0x2157   :  { %v1913_v9 = vmul.f32 2.0, %v3441_v6  ;;  %v3443_v17 = vpop.eup %3442 }
0x2158   :  { %v1907_v32 = vadd.f32 1.0, %v3443_v17 }
0x2159   :  { %v3203_v10 = vadd.f32 -1.0, %v1913_v9 }
0x215a   :  { %3444 = vrcp.f32 %v1907_v32 }
0x215b   :  { %1917 = vrot.lane.b32.xlu1 %v3203_v10, %s3579_s1 }
0x2167   :  { %v3445_v47 = vpop.eup %3444 }
0x2168   :  { %v1915_v54 = vmul.f32 %v3445_v47, %v1816_v42 }
0x21cd   :  { %v1918_v48 = vpop.permute.xlu1 %1917 }
0x21ce   :  { %v1920_v49 = vmul.f32 %v3445_v47, %v1918_v48 }
0x21d0   :  { %1922 = vrot.lane.b32.xlu0 %v1920_v49, %s3579_s1 }
0x21d4   :  { %139 = vperm.xlu0 %3297, %v52_v53  }
0x2242   :  { %v1923_v55 = vpop.permute.xlu0 %1922 }
0x2243   :  { %v1925_v56 = vadd.f32 %v1923_v55, %v1915_v54 }
0x2245   :  { %3446 = vtanh.f32 %v1925_v56 }
0x224f   :  { %v140_v60 = vpop.permute.xlu0 %139 }
0x2250   :  { %v224_v61 = vmul.f32 %v3651_v11, %v140_v60  ;;  %v223_v43 = vmul.f32 %v3647_v7, %v140_v60 }
0x2252   :  { %v3447_v57 = vpop.eup %3446  ;;  %v284_v63 = vadd.f32 %v3653_v13, %v224_v61  ;;  %v283_v44 = vadd.f32 %v3649_v8, %v223_v43 }
0x2253   :  { %1928 = vrot.lane.b32.xlu1 %v3447_v57, %s3579_s1 }
0x22c5   :  { %v1929_v58 = vpop.permute.xlu1 %1928 }
0x22c6   :  { %v1931_v59 = vmul.f32 %v3441_v6, %v1929_v58 }
0x22c8   :  { %3204 = vmatmul.mubr.msk.f32.vlgmr.msra.gmra.mxu0 %vm405_vm1, %v1931_v59 }
0x22c9   :  { %2170 = vmatpush1.msra.mxu0 %v4053_v18  ;;  %2217 = vmatprep.mubr.f32.mxu0 %v3580_v52 }
0x22ca   :  { %2171 = vmatprep.subr.mxu0 %v4060_v19 }
0x22cb   :  { %2172 = vmatpush1.msra.mxu0 %v4066_v20 }
0x22cc   :  { %2173 = vmatprep.subr.mxu0 %v4072_v21 }
0x22cd   :  { %2174 = vmatpush1.msra.mxu0 %v4078_v22 }
0x22ce   :  { %2175 = vmatprep.subr.mxu0 %v4084_v23 }
0x22cf   :  { %2176 = vmatpush1.msra.mxu0 %v4090_v24 }
0x22d0   :  { %2177 = vmatprep.subr.mxu0 %v4096_v25 }
0x22d1   :  { %2178 = vmatpush1.msra.mxu0 %v4102_v26 }
0x22d2   :  { %2179 = vmatprep.subr.mxu0 %v4108_v27 }
0x22d3   :  { %2180 = vmatpush1.msra.mxu0 %v4114_v28 }
0x22d4   :  { %2181 = vmatprep.subr.mxu0 %v4120_v29 }
0x22d5   :  { %2182 = vmatpush1.msra.mxu0 %v4126_v30 }
0x22d6   :  { %2183 = vmatprep.subr.mxu0 %v4132_v31 }
0x22d7   :  { %2184 = vmatpush1.msra.mxu0 %v4138_v33 }
0x22d8   :  { %2387 = vmatprep.subr.mxu0 %v4033_v34 }
0x2388   :  { %v2001_v62 = vpop.f32.mrf.mxu0 }
0x2389   :  { %v2008_v45 = vadd.f32 %v2001_v62, %v283_v44 }
0x238a   :  { %v2003_v35 = vpop.f32.mrf.mxu0 }
0x238b   :  { %v2009_v36 = vadd.f32 %v2003_v35, %v284_v63  ;;  %v3205_v46 = vmul.f32 -1.442695, %v2008_v45 }
0x238d   :  { %v3206_v37 = vmul.f32 -1.442695, %v2009_v36 }
0x238f   :  { %3448 = vpow2.f32 %v3206_v37  ;;  %v54_v37 = vld [vmem:[%s4595_s0 + $0x88] sm:$0xff] }
0x239c   :  { %v3449_v38 = vpop.eup %3448 }
0x239d   :  { %v2017_v39 = vadd.f32 1.0, %v3449_v38 }
0x239f   :  { %3450 = vrcp.f32 %v2017_v39 }
0x23a0   :  { %3452 = vpow2.f32 %v3205_v46 }
0x23ac   :  { %v3451_v40 = vpop.eup %3450 }
0x23ad   :  { %v2022_v41 = vmul.f32 2.0, %v3451_v40  ;;  %v3453_v50 = vpop.eup %3452 }
0x23ae   :  { %v2016_v51 = vadd.f32 1.0, %v3453_v50 }
0x23af   :  { %v3207_v42 = vadd.f32 -1.0, %v2022_v41 }
0x23b0   :  { %3454 = vrcp.f32 %v2016_v51 }
0x23b1   :  { %2026 = vrot.lane.b32.xlu1 %v3207_v42, %s3579_s1 }
0x23bd   :  { %v3455_v0 = vpop.eup %3454 }
0x23be   :  { %v2024_v4 = vmul.f32 %v3455_v0, %v1925_v56 }
0x2423   :  { %v2027_v1 = vpop.permute.xlu1 %2026 }
0x2424   :  { %v2029_v2 = vmul.f32 %v3455_v0, %v2027_v1 }
0x2426   :  { %2031 = vrot.lane.b32.xlu0 %v2029_v2, %s3579_s1 }
0x242a   :  { %144 = vperm.xlu0 %3297, %v53_v3  }
0x2498   :  { %v2032_v5 = vpop.permute.xlu0 %2031 }
0x2499   :  { %v2034_v6 = vadd.f32 %v2032_v5, %v2024_v4 }
0x249b   :  { %3456 = vtanh.f32 %v2034_v6 }
0x24a5   :  { %v145_v14 = vpop.permute.xlu0 %144 }
0x24a6   :  { %v226_v15 = vmul.f32 %v3651_v11, %v145_v14  ;;  %v225_v57 = vmul.f32 %v3647_v7, %v145_v14 }
0x24a8   :  { %v3457_v9 = vpop.eup %3456  ;;  %v286_v17 = vadd.f32 %v3653_v13, %v226_v15  ;;  %v285_v58 = vadd.f32 %v3649_v8, %v225_v57 }
0x24a9   :  { %2037 = vrot.lane.b32.xlu1 %v3457_v9, %s3579_s1 }
0x251b   :  { %v2038_v10 = vpop.permute.xlu1 %2037 }
0x251c   :  { %v2040_v12 = vmul.f32 %v3451_v40, %v2038_v10 }
0x251e   :  { %3208 = vmatmul.mubr.msk.f32.vlgmr.msra.gmra.mxu1 %vm405_vm1, %v2040_v12 }
0x251f   :  { %2279 = vmatpush1.msra.mxu1 %v4053_v18  ;;  %2326 = vmatprep.mubr.f32.mxu1 %v3580_v52 }
0x2520   :  { %2280 = vmatprep.subr.mxu1 %v4060_v19 }
0x2521   :  { %2281 = vmatpush1.msra.mxu1 %v4066_v20 }
0x2522   :  { %2282 = vmatprep.subr.mxu1 %v4072_v21 }
0x2523   :  { %2283 = vmatpush1.msra.mxu1 %v4078_v22 }
0x2524   :  { %2284 = vmatprep.subr.mxu1 %v4084_v23 }
0x2525   :  { %2285 = vmatpush1.msra.mxu1 %v4090_v24 }
0x2526   :  { %2286 = vmatprep.subr.mxu1 %v4096_v25 }
0x2527   :  { %2287 = vmatpush1.msra.mxu1 %v4102_v26 }
0x2528   :  { %2288 = vmatprep.subr.mxu1 %v4108_v27 }
0x2529   :  { %2289 = vmatpush1.msra.mxu1 %v4114_v28 }
0x252a   :  { %2290 = vmatprep.subr.mxu1 %v4120_v29 }
0x252b   :  { %2291 = vmatpush1.msra.mxu1 %v4126_v30 }
0x252c   :  { %2292 = vmatprep.subr.mxu1 %v4132_v31 }
0x252d   :  { %2293 = vmatpush1.msra.mxu1 %v4138_v33 }
0x252e   :  { %2496 = vmatprep.subr.mxu1 %v4033_v34 }
0x25de   :  { %v2110_v16 = vpop.f32.mrf.mxu1 }
0x25df   :  { %v2117_v59 = vadd.f32 %v2110_v16, %v285_v58 }
0x25e0   :  { %v2112_v32 = vpop.f32.mrf.mxu1 }
0x25e1   :  { %v2118_v47 = vadd.f32 %v2112_v32, %v286_v17  ;;  %v3209_v60 = vmul.f32 -1.442695, %v2117_v59 }
0x25e3   :  { %v3210_v48 = vmul.f32 -1.442695, %v2118_v47 }
0x25e5   :  { %3458 = vpow2.f32 %v3210_v48  ;;  %v55_v48 = vld [vmem:[%s4595_s0 + $0x90] sm:$0xff] }
0x25f2   :  { %v3459_v49 = vpop.eup %3458 }
0x25f3   :  { %v2126_v53 = vadd.f32 1.0, %v3459_v49 }
0x25f5   :  { %3460 = vrcp.f32 %v2126_v53 }
0x25f6   :  { %3462 = vpow2.f32 %v3209_v60 }
0x2602   :  { %v3461_v54 = vpop.eup %3460 }
0x2603   :  { %v2131_v55 = vmul.f32 2.0, %v3461_v54  ;;  %v3463_v61 = vpop.eup %3462 }
0x2604   :  { %v2125_v62 = vadd.f32 1.0, %v3463_v61 }
0x2605   :  { %v3211_v56 = vadd.f32 -1.0, %v2131_v55 }
0x2606   :  { %3464 = vrcp.f32 %v2125_v62 }
0x2607   :  { %2135 = vrot.lane.b32.xlu1 %v3211_v56, %s3579_s1 }
0x2613   :  { %v3465_v63 = vpop.eup %3464 }
0x2614   :  { %v2133_v38 = vmul.f32 %v3465_v63, %v2034_v6 }
0x2679   :  { %v2136_v35 = vpop.permute.xlu1 %2135 }
0x267a   :  { %v2138_v36 = vmul.f32 %v3465_v63, %v2136_v35 }
0x267c   :  { %2140 = vrot.lane.b32.xlu0 %v2138_v36, %s3579_s1 }
0x2680   :  { %149 = vperm.xlu0 %3297, %v54_v37  }
0x26ee   :  { %v2141_v39 = vpop.permute.xlu0 %2140 }
0x26ef   :  { %v2143_v40 = vadd.f32 %v2141_v39, %v2133_v38 }
0x26f1   :  { %3466 = vtanh.f32 %v2143_v40 }
0x26fb   :  { %v150_v44 = vpop.permute.xlu0 %149 }
0x26fc   :  { %v228_v45 = vmul.f32 %v3651_v11, %v150_v44  ;;  %v227_v9 = vmul.f32 %v3647_v7, %v150_v44 }
0x26fe   :  { %v3467_v41 = vpop.eup %3466  ;;  %v288_v50 = vadd.f32 %v3653_v13, %v228_v45  ;;  %v287_v10 = vadd.f32 %v3649_v8, %v227_v9 }
0x26ff   :  { %2146 = vrot.lane.b32.xlu1 %v3467_v41, %s3579_s1 }
0x2771   :  { %v2147_v42 = vpop.permute.xlu1 %2146 }
0x2772   :  { %v2149_v43 = vmul.f32 %v3461_v54, %v2147_v42 }
0x2774   :  { %3212 = vmatmul.mubr.msk.f32.vlgmr.msra.gmra.mxu0 %vm405_vm1, %v2149_v43 }
0x2775   :  { %2388 = vmatpush1.msra.mxu0 %v4053_v18  ;;  %2435 = vmatprep.mubr.f32.mxu0 %v3580_v52 }
0x2776   :  { %2389 = vmatprep.subr.mxu0 %v4060_v19 }
0x2777   :  { %2390 = vmatpush1.msra.mxu0 %v4066_v20 }
0x2778   :  { %2391 = vmatprep.subr.mxu0 %v4072_v21 }
0x2779   :  { %2392 = vmatpush1.msra.mxu0 %v4078_v22 }
0x277a   :  { %2393 = vmatprep.subr.mxu0 %v4084_v23 }
0x277b   :  { %2394 = vmatpush1.msra.mxu0 %v4090_v24 }
0x277c   :  { %2395 = vmatprep.subr.mxu0 %v4096_v25 }
0x277d   :  { %2396 = vmatpush1.msra.mxu0 %v4102_v26 }
0x277e   :  { %2397 = vmatprep.subr.mxu0 %v4108_v27 }
0x277f   :  { %2398 = vmatpush1.msra.mxu0 %v4114_v28 }
0x2780   :  { %2399 = vmatprep.subr.mxu0 %v4120_v29 }
0x2781   :  { %2400 = vmatpush1.msra.mxu0 %v4126_v30 }
0x2782   :  { %2401 = vmatprep.subr.mxu0 %v4132_v31 }
0x2783   :  { %2402 = vmatpush1.msra.mxu0 %v4138_v33 }
0x2784   :  { %2605 = vmatprep.subr.mxu0 %v4033_v34 }
0x2834   :  { %v2219_v46 = vpop.f32.mrf.mxu0 }
0x2835   :  { %v2226_v12 = vadd.f32 %v2219_v46, %v287_v10 }
0x2836   :  { %v2221_v51 = vpop.f32.mrf.mxu0 }
0x2837   :  { %v2227_v0 = vadd.f32 %v2221_v51, %v288_v50  ;;  %v3213_v14 = vmul.f32 -1.442695, %v2226_v12 }
0x2839   :  { %v3214_v1 = vmul.f32 -1.442695, %v2227_v0  ;;  %v56_v0 = vld [vmem:[%s4595_s0 + $0x98] sm:$0xff] }
0x283b   :  { %3468 = vpow2.f32 %v3214_v1 }
0x2848   :  { %v3469_v2 = vpop.eup %3468 }
0x2849   :  { %v2235_v3 = vadd.f32 1.0, %v3469_v2 }
0x284b   :  { %3470 = vrcp.f32 %v2235_v3 }
0x284c   :  { %3472 = vpow2.f32 %v3213_v14 }
0x2858   :  { %v3471_v4 = vpop.eup %3470 }
0x2859   :  { %v2240_v5 = vmul.f32 2.0, %v3471_v4  ;;  %v3473_v15 = vpop.eup %3472 }
0x285a   :  { %v2234_v16 = vadd.f32 1.0, %v3473_v15 }
0x285b   :  { %v3215_v6 = vadd.f32 -1.0, %v2240_v5 }
0x285c   :  { %3474 = vrcp.f32 %v2234_v16 }
0x285d   :  { %2244 = vrot.lane.b32.xlu1 %v3215_v6, %s3579_s1 }
0x2869   :  { %v3475_v17 = vpop.eup %3474 }
0x286a   :  { %v2242_v49 = vmul.f32 %v3475_v17, %v2143_v40 }
0x28cf   :  { %v2245_v32 = vpop.permute.xlu1 %2244 }
0x28d0   :  { %v2247_v47 = vmul.f32 %v3475_v17, %v2245_v32  ;;  %v57_v32 = vld [vmem:[%s4595_s0 + $0xa0] sm:$0xff] }
0x28d2   :  { %2249 = vrot.lane.b32.xlu0 %v2247_v47, %s3579_s1 }
0x28d6   :  { %154 = vperm.xlu0 %3297, %v55_v48  }
0x2944   :  { %v2250_v53 = vpop.permute.xlu0 %2249 }
0x2945   :  { %v2252_v54 = vadd.f32 %v2250_v53, %v2242_v49 }
0x2947   :  { %3476 = vtanh.f32 %v2252_v54 }
0x2951   :  { %v155_v58 = vpop.permute.xlu0 %154 }
0x2952   :  { %v230_v59 = vmul.f32 %v3651_v11, %v155_v58 }
0x2954   :  { %v3477_v55 = vpop.eup %3476  ;;  %v290_v61 = vadd.f32 %v3653_v13, %v230_v59  ;;  %v4433_v59 = vld [vmem:[%s4598_s3 + $0x58] sm:$0xff] }
0x2955   :  { %2255 = vrot.lane.b32.xlu1 %v3477_v55, %s3579_s1 }
0x29c7   :  { %v2256_v56 = vpop.permute.xlu1 %2255 }
0x29c8   :  { %v2258_v57 = vmul.f32 %v3471_v4, %v2256_v56  ;;  %v4414_v56 = vld [vmem:[%s4598_s3 + $0x70] sm:$0xff] }
0x29ca   :  { %3216 = vmatmul.mubr.msk.f32.vlgmr.msra.gmra.mxu1 %vm405_vm1, %v2258_v57  ;;  %v4421_v57 = vld [vmem:[%s4598_s3 + $0x68] sm:$0xff] }
0x29cb   :  { %2497 = vmatpush1.msra.mxu1 %v4053_v18  ;;  %2544 = vmatprep.mubr.f32.mxu1 %v3580_v52 }
0x29cc   :  { %2498 = vmatprep.subr.mxu1 %v4060_v19 }
0x29cd   :  { %2499 = vmatpush1.msra.mxu1 %v4066_v20 }
0x29ce   :  { %2500 = vmatprep.subr.mxu1 %v4072_v21 }
0x29cf   :  { %2501 = vmatpush1.msra.mxu1 %v4078_v22 }
0x29d0   :  { %2502 = vmatprep.subr.mxu1 %v4084_v23 }
0x29d1   :  { %2503 = vmatpush1.msra.mxu1 %v4090_v24 }
0x29d2   :  { %2504 = vmatprep.subr.mxu1 %v4096_v25 }
0x29d3   :  { %2505 = vmatpush1.msra.mxu1 %v4102_v26 }
0x29d4   :  { %2506 = vmatprep.subr.mxu1 %v4108_v27 }
0x29d5   :  { %2507 = vmatpush1.msra.mxu1 %v4114_v28 }
0x29d6   :  { %2508 = vmatprep.subr.mxu1 %v4120_v29 }
0x29d7   :  { %2509 = vmatpush1.msra.mxu1 %v4126_v30 }
0x29d8   :  { %2510 = vmatprep.subr.mxu1 %v4132_v31 }
0x29d9   :  { %2511 = vmatpush1.msra.mxu1 %v4138_v33 }
0x29da   :  { %2714 = vmatprep.subr.mxu1 %v4033_v34  ;;  %v229_v34 = vmul.f32 %v3647_v7, %v155_v58  ;;  %v4427_v58 = vld [vmem:[%s4598_s3 + $0x60] sm:$0xff] }
0x29dc   :  { %v289_v41 = vadd.f32 %v3649_v8, %v229_v34  ;;  %v3577_v34 = vld [vmem:[%s4598_s3] sm:$0xff] }
0x2a8a   :  { %v2328_v60 = vpop.f32.mrf.mxu1 }
0x2a8b   :  { %v2335_v42 = vadd.f32 %v2328_v60, %v289_v41  ;;  %v4439_v60 = vld [vmem:[%s4598_s3 + $0x50] sm:$0xff] }
0x2a8c   :  { %v2330_v62 = vpop.f32.mrf.mxu1 }
0x2a8d   :  { %v2336_v63 = vadd.f32 %v2330_v62, %v290_v61  ;;  %v3217_v43 = vmul.f32 -1.442695, %v2335_v42  ;;  %v4445_v61 = vld [vmem:[%s4598_s3 + $0x48] sm:$0xff]  ;;  %v4451_v62 = vld [vmem:[%s4598_s3 + $0x40] sm:$0xff] }
0x2a8f   :  { %v3218_v35 = vmul.f32 -1.442695, %v2336_v63  ;;  %v3570_v63 = vld [vmem:[%s4598_s3 + $0x38] sm:$0xff] }
0x2a91   :  { %3478 = vpow2.f32 %v3218_v35  ;;  %v3571_v35 = vld [vmem:[%s4598_s3 + $0x30] sm:$0xff] }
0x2a9e   :  { %v3479_v36 = vpop.eup %3478 }
0x2a9f   :  { %v2344_v37 = vadd.f32 1.0, %v3479_v36  ;;  %v3572_v36 = vld [vmem:[%s4598_s3 + $0x28] sm:$0xff] }
0x2aa1   :  { %3480 = vrcp.f32 %v2344_v37  ;;  %v3573_v37 = vld [vmem:[%s4598_s3 + $0x20] sm:$0xff] }
0x2aa2   :  { %3482 = vpow2.f32 %v3217_v43 }
0x2aae   :  { %v3481_v38 = vpop.eup %3480 }
0x2aaf   :  { %v2349_v39 = vmul.f32 2.0, %v3481_v38  ;;  %v3483_v44 = vpop.eup %3482 }
0x2ab0   :  { %v2343_v45 = vadd.f32 1.0, %v3483_v44 }
0x2ab1   :  { %v3219_v40 = vadd.f32 -1.0, %v2349_v39  ;;  %v3575_v39 = vld [vmem:[%s4598_s3 + $0x10] sm:$0xff] }
0x2ab2   :  { %3484 = vrcp.f32 %v2343_v45 }
0x2ab3   :  { %2353 = vrot.lane.b32.xlu1 %v3219_v40, %s3579_s1  ;;  %v3576_v40 = vld [vmem:[%s4598_s3 + $0x8] sm:$0xff] }
0x2abf   :  { %v3485_v46 = vpop.eup %3484 }
0x2ac0   :  { %v2351_v1 = vmul.f32 %v3485_v46, %v2252_v54 }
0x2b25   :  { %v2354_v50 = vpop.permute.xlu1 %2353 }
0x2b26   :  { %v2356_v51 = vmul.f32 %v3485_v46, %v2354_v50 }
0x2b28   :  { %2358 = vrot.lane.b32.xlu0 %v2356_v51, %s3579_s1 }
0x2b2c   :  { %159 = vperm.xlu0 %3297, %v56_v0  }
0x2b9a   :  { %v2359_v2 = vpop.permute.xlu0 %2358 }
0x2b9b   :  { %v2361_v3 = vadd.f32 %v2359_v2, %v2351_v1 }
0x2b9d   :  { %3486 = vtanh.f32 %v2361_v3 }
0x2baa   :  { %v3487_v4 = vpop.eup %3486 }
0x2bab   :  { %2364 = vrot.lane.b32.xlu1 %v3487_v4, %s3579_s1 }
0x2c1d   :  { %v2365_v5 = vpop.permute.xlu1 %2364 }
0x2c1e   :  { %v2367_v6 = vmul.f32 %v3481_v38, %v2365_v5  ;;  %v3574_v38 = vld [vmem:[%s4598_s3 + $0x18] sm:$0xff] }
0x2c20   :  { %3220 = vmatmul.mubr.msk.f32.vlgmr.msra.gmra.mxu0 %vm405_vm1, %v2367_v6 }
0x2c21   :  { %2606 = vmatpush1.msra.mxu0 %v4053_v18  ;;  %2653 = vmatprep.mubr.f32.mxu0 %v3580_v52  ;;  %v3562_v18 = vld [vmem:[%s4598_s3 + $0x78] sm:$0xff] }
0x2c22   :  { %2607 = vmatprep.subr.mxu0 %v4060_v19  ;;  %v160_v19 = vpop.permute.xlu0 %159 }
0x2c23   :  { %2608 = vmatpush1.msra.mxu0 %v4066_v20  ;;  %v232_v20 = vmul.f32 %v3651_v11, %v160_v19 }
0x2c24   :  { %2609 = vmatprep.subr.mxu0 %v4072_v21 }
0x2c25   :  { %2610 = vmatpush1.msra.mxu0 %v4078_v22  ;;  %v292_v22 = vadd.f32 %v3653_v13, %v232_v20 }
0x2c26   :  { %2611 = vmatprep.subr.mxu0 %v4084_v23 }
0x2c27   :  { %2612 = vmatpush1.msra.mxu0 %v4090_v24 }
0x2c28   :  { %2613 = vmatprep.subr.mxu0 %v4096_v25 }
0x2c29   :  { %2614 = vmatpush1.msra.mxu0 %v4102_v26 }
0x2c2a   :  { %2615 = vmatprep.subr.mxu0 %v4108_v27 }
0x2c2b   :  { %2616 = vmatpush1.msra.mxu0 %v4114_v28 }
0x2c2c   :  { %2617 = vmatprep.subr.mxu0 %v4120_v29 }
0x2c2d   :  { %2618 = vmatpush1.msra.mxu0 %v4126_v30 }
0x2c2e   :  { %2619 = vmatprep.subr.mxu0 %v4132_v31  ;;  %v231_v31 = vmul.f32 %v3647_v7, %v160_v19 }
0x2c2f   :  { %2620 = vmatpush1.msra.mxu0 %v4138_v33 }
0x2c30   :  { %2823 = vmatprep.subr.mxu0 %v3562_v18  ;;  %v291_v33 = vadd.f32 %v3649_v8, %v231_v31 }
0x2ce0   :  { %v2437_v21 = vpop.f32.mrf.mxu0 }
0x2ce1   :  { %v2444_v9 = vadd.f32 %v2437_v21, %v291_v33 }
0x2ce2   :  { %v2439_v23 = vpop.f32.mrf.mxu0 }
0x2ce3   :  { %v2445_v24 = vadd.f32 %v2439_v23, %v292_v22  ;;  %v3221_v10 = vmul.f32 -1.442695, %v2444_v9 }
0x2ce5   :  { %v3222_v25 = vmul.f32 -1.442695, %v2445_v24  ;;  %v58_v24 = vld [vmem:[%s4595_s0 + $0xa8] sm:$0xff] }
0x2ce7   :  { %3488 = vpow2.f32 %v3222_v25 }
0x2cf4   :  { %v3489_v26 = vpop.eup %3488 }
0x2cf5   :  { %v2453_v27 = vadd.f32 1.0, %v3489_v26 }
0x2cf7   :  { %3490 = vrcp.f32 %v2453_v27 }
0x2cf8   :  { %3492 = vpow2.f32 %v3221_v10 }
0x2d04   :  { %v3491_v28 = vpop.eup %3490 }
0x2d05   :  { %v2458_v29 = vmul.f32 2.0, %v3491_v28  ;;  %v3493_v12 = vpop.eup %3492 }
0x2d06   :  { %v2452_v14 = vadd.f32 1.0, %v3493_v12 }
0x2d07   :  { %v3223_v30 = vadd.f32 -1.0, %v2458_v29 }
0x2d08   :  { %3494 = vrcp.f32 %v2452_v14 }
0x2d09   :  { %2462 = vrot.lane.b32.xlu1 %v3223_v30, %s3579_s1 }
0x2d15   :  { %v3495_v15 = vpop.eup %3494 }
0x2d16   :  { %v2460_v47 = vmul.f32 %v3495_v15, %v2361_v3 }
0x2d7b   :  { %v2463_v16 = vpop.permute.xlu1 %2462 }
0x2d7c   :  { %v2465_v17 = vmul.f32 %v3495_v15, %v2463_v16 }
0x2d7e   :  { %2467 = vrot.lane.b32.xlu0 %v2465_v17, %s3579_s1 }
0x2d82   :  { %164 = vperm.xlu0 %3297, %v57_v32  }
0x2df0   :  { %v2468_v48 = vpop.permute.xlu0 %2467 }
0x2df1   :  { %v4406_v49 = vadd.f32 %v2468_v48, %v2460_v47 }
0x2df3   :  { %3496 = vtanh.f32 %v4406_v49 }
0x2dfd   :  { %v165_v41 = vpop.permute.xlu0 %164 }
0x2dfe   :  { %v234_v42 = vmul.f32 %v3651_v11, %v165_v41  ;;  %v233_v4 = vmul.f32 %v3647_v7, %v165_v41 }
0x2e00   :  { %v3497_v53 = vpop.eup %3496  ;;  %v294_v44 = vadd.f32 %v3653_v13, %v234_v42  ;;  %v293_v5 = vadd.f32 %v3649_v8, %v233_v4 }
0x2e01   :  { %2473 = vrot.lane.b32.xlu1 %v3497_v53, %s3579_s1 }
0x2e73   :  { %v2474_v54 = vpop.permute.xlu1 %2473 }
0x2e74   :  { %v2476_v55 = vmul.f32 %v3491_v28, %v2474_v54 }
0x2e76   :  { %3224 = vmatmul.mubr.msk.f32.vlgmr.msra.gmra.mxu1 %vm405_vm1, %v2476_v55 }
0x2e77   :  { %2715 = vmatpush1.msra.mxu1 %v4414_v56  ;;  %2762 = vmatprep.mubr.f32.mxu1 %v3580_v52 }
0x2e78   :  { %2716 = vmatprep.subr.mxu1 %v4421_v57 }
0x2e79   :  { %2717 = vmatpush1.msra.mxu1 %v4427_v58 }
0x2e7a   :  { %2718 = vmatprep.subr.mxu1 %v4433_v59 }
0x2e7b   :  { %2719 = vmatpush1.msra.mxu1 %v4439_v60 }
0x2e7c   :  { %2720 = vmatprep.subr.mxu1 %v4445_v61 }
0x2e7d   :  { %2721 = vmatpush1.msra.mxu1 %v4451_v62 }
0x2e7e   :  { %2722 = vmatprep.subr.mxu1 %v3570_v63 }
0x2e7f   :  { %2723 = vmatpush1.msra.mxu1 %v3571_v35 }
0x2e80   :  { %2724 = vmatprep.subr.mxu1 %v3572_v36 }
0x2e81   :  { %2725 = vmatpush1.msra.mxu1 %v3573_v37 }
0x2e82   :  { %2726 = vmatprep.subr.mxu1 %v3574_v38 }
0x2e83   :  { %2727 = vmatpush1.msra.mxu1 %v3575_v39 }
0x2e84   :  { %2728 = vmatprep.subr.mxu1 %v3576_v40 }
0x2e85   :  { %2729 = vmatpush1.msra.mxu1 %v3577_v34 }
0x2e86   :  { %3262 = vmatprep.subr.mxu1 %v3580_v52 }
0x2f36   :  { %v2546_v43 = vpop.f32.mrf.mxu1 }
0x2f37   :  { %v2553_v6 = vadd.f32 %v2546_v43, %v293_v5 }
0x2f38   :  { %v2548_v45 = vpop.f32.mrf.mxu1 }
0x2f39   :  { %v2554_v46 = vadd.f32 %v2548_v45, %v294_v44  ;;  %v3225_v18 = vmul.f32 -1.442695, %v2553_v6 }
0x2f3b   :  { %v3226_v50 = vmul.f32 -1.442695, %v2554_v46 }
0x2f3d   :  { %3498 = vpow2.f32 %v3226_v50 }
0x2f4a   :  { %v3499_v51 = vpop.eup %3498 }
0x2f4b   :  { %v2562_v0 = vadd.f32 1.0, %v3499_v51 }
0x2f4d   :  { %3500 = vrcp.f32 %v2562_v0 }
0x2f4e   :  { %3502 = vpow2.f32 %v3225_v18 }
0x2f5a   :  { %v3501_v1 = vpop.eup %3500 }
0x2f5b   :  { %v2567_v2 = vmul.f32 2.0, %v3501_v1  ;;  %v3503_v19 = vpop.eup %3502 }
0x2f5c   :  { %v2561_v20 = vadd.f32 1.0, %v3503_v19 }
0x2f5d   :  { %v3227_v3 = vadd.f32 -1.0, %v2567_v2 }
0x2f5e   :  { %3504 = vrcp.f32 %v2561_v20 }
0x2f5f   :  { %2571 = vrot.lane.b32.xlu1 %v3227_v3, %s3579_s1 }
0x2f6b   :  { %v3505_v21 = vpop.eup %3504 }
0x2f6c   :  { %v2569_v25 = vmul.f32 %v3505_v21, %v4406_v49 }
0x2fd1   :  { %v2572_v22 = vpop.permute.xlu1 %2571 }
0x2fd2   :  { %v2574_v23 = vmul.f32 %v3505_v21, %v2572_v22  ;;  %v60_v21 = vld [vmem:[%s4595_s0 + $0xb8] sm:$0xff] }
0x2fd4   :  { %2576 = vrot.lane.b32.xlu0 %v2574_v23, %s3579_s1 }
0x2fd8   :  { %169 = vperm.xlu0 %3297, %v58_v24  }
0x3046   :  { %v2577_v26 = vpop.permute.xlu0 %2576 }
0x3047   :  { %v2579_v27 = vadd.f32 %v2577_v26, %v2569_v25 }
0x3049   :  { %3506 = vtanh.f32 %v2579_v27 }
0x3053   :  { %v170_v31 = vpop.permute.xlu0 %169 }
0x3054   :  { %v236_v33 = vmul.f32 %v3651_v11, %v170_v31  ;;  %v235_v49 = vmul.f32 %v3647_v7, %v170_v31 }
0x3056   :  { %v3507_v28 = vpop.eup %3506  ;;  %v296_v10 = vadd.f32 %v3653_v13, %v236_v33  ;;  %v295_v53 = vadd.f32 %v3649_v8, %v235_v49 }
0x3057   :  { %2582 = vrot.lane.b32.xlu1 %v3507_v28, %s3579_s1 }
0x30c9   :  { %v2583_v29 = vpop.permute.xlu1 %2582 }
0x30ca   :  { %v2585_v30 = vmul.f32 %v3501_v1, %v2583_v29 }
0x30cc   :  { %3228 = vmatmul.mubr.msk.f32.vlgmr.msra.gmra.mxu0 %vm405_vm1, %v2585_v30 }
0x30cd   :  { %2824 = vmatpush1.msra.mxu0 %v4414_v56  ;;  %2871 = vmatprep.mubr.f32.mxu0 %v3580_v52 }
0x30ce   :  { %2825 = vmatprep.subr.mxu0 %v4421_v57 }
0x30cf   :  { %2826 = vmatpush1.msra.mxu0 %v4427_v58 }
0x30d0   :  { %2827 = vmatprep.subr.mxu0 %v4433_v59 }
0x30d1   :  { %2828 = vmatpush1.msra.mxu0 %v4439_v60 }
0x30d2   :  { %2829 = vmatprep.subr.mxu0 %v4445_v61  ;;  %v59_v61 = vld [vmem:[%s4595_s0 + $0xb0] sm:$0xff] }
0x30d3   :  { %2830 = vmatpush1.msra.mxu0 %v4451_v62 }
0x30d4   :  { %2831 = vmatprep.subr.mxu0 %v3570_v63 }
0x30d5   :  { %2832 = vmatpush1.msra.mxu0 %v3571_v35 }
0x30d6   :  { %2833 = vmatprep.subr.mxu0 %v3572_v36 }
0x30d7   :  { %2834 = vmatpush1.msra.mxu0 %v3573_v37 }
0x30d8   :  { %2835 = vmatprep.subr.mxu0 %v3574_v38 }
0x30d9   :  { %2836 = vmatpush1.msra.mxu0 %v3575_v39 }
0x30da   :  { %2837 = vmatprep.subr.mxu0 %v3576_v40 }
0x30db   :  { %2838 = vmatpush1.msra.mxu0 %v3577_v34 }
0x30dc   :  { %3281 = vmatprep.subr.mxu0 %v3580_v52 }
0x318c   :  { %v2655_v9 = vpop.f32.mrf.mxu0 }
0x318d   :  { %v2662_v54 = vadd.f32 %v2655_v9, %v295_v53 }
0x318e   :  { %v2657_v12 = vpop.f32.mrf.mxu0 }
0x318f   :  { %v2663_v14 = vadd.f32 %v2657_v12, %v296_v10  ;;  %v3229_v55 = vmul.f32 -1.442695, %v2662_v54 }
0x3191   :  { %v3230_v15 = vmul.f32 -1.442695, %v2663_v14 }
0x3193   :  { %3508 = vpow2.f32 %v3230_v15 }
0x31a0   :  { %v3509_v16 = vpop.eup %3508 }
0x31a1   :  { %v2671_v17 = vadd.f32 1.0, %v3509_v16 }
0x31a3   :  { %3510 = vrcp.f32 %v2671_v17 }
0x31a4   :  { %3512 = vpow2.f32 %v3229_v55 }
0x31b0   :  { %v3511_v32 = vpop.eup %3510 }
0x31b1   :  { %v2676_v47 = vmul.f32 2.0, %v3511_v32  ;;  %v3513_v56 = vpop.eup %3512 }
0x31b2   :  { %v2670_v57 = vadd.f32 1.0, %v3513_v56  ;;  %v2920_v56 = vld [vmem:[%s4599_s4 + $0x38] sm:$0xff] }
0x31b3   :  { %v3231_v48 = vadd.f32 -1.0, %v2676_v47 }
0x31b4   :  { %3514 = vrcp.f32 %v2670_v57  ;;  %v2917_v57 = vld [vmem:[%s4599_s4 + $0x20] sm:$0xff] }
0x31b5   :  { %2680 = vrot.lane.b32.xlu1 %v3231_v48, %s3579_s1 }
0x31c1   :  { %v3515_v58 = vpop.eup %3514 }
0x31c2   :  { %v2678_v62 = vmul.f32 %v3515_v58, %v2579_v27 }
0x3227   :  { %v2681_v59 = vpop.permute.xlu1 %2680 }
0x3228   :  { %v2683_v60 = vmul.f32 %v3515_v58, %v2681_v59  ;;  %v2916_v58 = vld [vmem:[%s4599_s4 + $0x18] sm:$0xff]  ;;  %v2915_v59 = vld [vmem:[%s4599_s4 + $0x10] sm:$0xff] }
0x322a   :  { %2685 = vrot.lane.b32.xlu0 %v2683_v60, %s3579_s1  ;;  %v2914_v60 = vld [vmem:[%s4599_s4 + $0x8] sm:$0xff] }
0x322e   :  { %174 = vperm.xlu0 %3297, %v59_v61  }
0x329c   :  { %v2686_v63 = vpop.permute.xlu0 %2685 }
0x329d   :  { %v2688_v35 = vadd.f32 %v2686_v63, %v2678_v62 }
0x329f   :  { %3516 = vtanh.f32 %v2688_v35 }
0x32a9   :  { %v175_v39 = vpop.permute.xlu0 %174 }
0x32aa   :  { %v238_v40 = vmul.f32 %v3651_v11, %v175_v39  ;;  %v237_v1 = vmul.f32 %v3647_v7, %v175_v39  ;;  %v3240_v39 = vld [vmem:[%s4600_s5] ss:$0 sm:$0xff] }
0x32ac   :  { %v3517_v36 = vpop.eup %3516  ;;  %v298_v41 = vadd.f32 %v3653_v13, %v238_v40  ;;  %v297_v2 = vadd.f32 %v3649_v8, %v237_v1 }
0x32ad   :  { %2691 = vrot.lane.b32.xlu1 %v3517_v36, %s3579_s1 }
0x331f   :  { %v2692_v37 = vpop.permute.xlu1 %2691 }
0x3320   :  { %v2694_v38 = vmul.f32 %v3511_v32, %v2692_v37 }
0x3322   :  { %3232 = vmatmul.mubr.msk.f32.vlgmr.msra.gmra.mxu1 %vm405_vm1, %v2694_v38 }
0x3323   :  { %3263 = vmatpush3.msra.mxu1 %v2920_v56  ;;  %3278 = vmatprep.mubr.msk.f32.mxu1 %vm3581_vm2, %v3580_v52 }
0x3324   :  { %3264 = vmatprep.subr.mxu1 %v3580_v52 }
0x33e2   :  { %v2764_v34 = vpop.f32.mrf.mxu1 }
0x33e3   :  { %v2771_v3 = vadd.f32 %v2764_v34, %v297_v2 }
0x33e4   :  { %v2766_v42 = vpop.f32.mrf.mxu1 }
0x33e5   :  { %v2772_v43 = vadd.f32 %v2766_v42, %v298_v41  ;;  %v3233_v4 = vmul.f32 -1.442695, %v2771_v3 }
0x33e7   :  { %v3234_v44 = vmul.f32 -1.442695, %v2772_v43 }
0x33e9   :  { %3518 = vpow2.f32 %v3234_v44 }
0x33f6   :  { %v3519_v45 = vpop.eup %3518 }
0x33f7   :  { %v2780_v46 = vadd.f32 1.0, %v3519_v45 }
0x33f9   :  { %3520 = vrcp.f32 %v2780_v46 }
0x33fa   :  { %3522 = vpow2.f32 %v3233_v4 }
0x3406   :  { %v3521_v50 = vpop.eup %3520 }
0x3407   :  { %v2785_v51 = vmul.f32 2.0, %v3521_v50  ;;  %v3523_v5 = vpop.eup %3522 }
0x3408   :  { %v2779_v6 = vadd.f32 1.0, %v3523_v5  ;;  %v3033_v5 = vld [vmem:[%s4601_s6 + $0x18] sm:$0xff] }
0x3409   :  { %v3235_v0 = vadd.f32 -1.0, %v2785_v51 }
0x340a   :  { %3524 = vrcp.f32 %v2779_v6  ;;  %v3032_v6 = vld [vmem:[%s4601_s6 + $0x10] sm:$0xff] }
0x340b   :  { %2789 = vrot.lane.b32.xlu1 %v3235_v0, %s3579_s1 }
0x3417   :  { %v3525_v18 = vpop.eup %3524 }
0x3418   :  { %v2787_v22 = vmul.f32 %v3525_v18, %v2688_v35  ;;  %v2913_v35 = vld [vmem:[%s4599_s4] sm:$0xff] }
0x347d   :  { %v2790_v19 = vpop.permute.xlu1 %2789 }
0x347e   :  { %v2792_v20 = vmul.f32 %v3525_v18, %v2790_v19  ;;  %v3031_v18 = vld [vmem:[%s4601_s6 + $0x8] sm:$0xff]  ;;  %v3030_v19 = vld [vmem:[%s4601_s6] sm:$0xff] }
0x3480   :  { %2794 = vrot.lane.b32.xlu0 %v2792_v20, %s3579_s1 }
0x3484   :  { %179 = vperm.xlu0 %3297, %v60_v21  }
0x34f2   :  { %v2795_v23 = vpop.permute.xlu0 %2794 }
0x34f3   :  { %v2797_v24 = vadd.f32 %v2795_v23, %v2787_v22 }
0x34f5   :  { %3526 = vtanh.f32 %v2797_v24 }
0x34ff   :  { %v180_v28 = vpop.permute.xlu0 %179 }
0x3500   :  { %v240_v29 = vmul.f32 %v3651_v11, %v180_v28  ;;  %v239_v32 = vmul.f32 %v3647_v7, %v180_v28  ;;  %v2919_v7 = vld [vmem:[%s4599_s4 + $0x30] sm:$0xff]  ;;  %v3246_v28 = vld [vmem:[%s4604_s8] ss:$0 sm:$0xff] }
0x3501   :  { %3265 = vmatpush3.msra.mxu1 %v2919_v7 }
0x3502   :  { %v3527_v25 = vpop.eup %3526  ;;  %v300_v31 = vadd.f32 %v3653_v13, %v240_v29  ;;  %v299_v47 = vadd.f32 %v3649_v8, %v239_v32  ;;  %v2918_v8 = vld [vmem:[%s4599_s4 + $0x28] sm:$0xff]  ;;  %3266 = vmatprep.subr.mxu1 %v3580_v52  ;;  %s3582_s4 = smov 32  }
0x3503   :  { %2800 = vrot.lane.b32.xlu1 %v3527_v25, %s3579_s1  ;;  %3267 = vmatpush3.msra.mxu1 %v2918_v8  ;;  %v3244_v25 = vld [vmem:[%s4603_s7] ss:$0 sm:$0xff] }
0x3504   :  { %3268 = vmatprep.subr.mxu1 %v3580_v52 }
0x3505   :  { %3269 = vmatpush3.msra.mxu1 %v2917_v57 }
0x3506   :  { %3270 = vmatprep.subr.mxu1 %v3580_v52 }
0x3507   :  { %3271 = vmatpush3.msra.mxu1 %v2916_v58 }
0x3508   :  { %3272 = vmatprep.subr.mxu1 %v3580_v52 }
0x3509   :  { %3273 = vmatpush3.msra.mxu1 %v2915_v59 }
0x350a   :  { %3274 = vmatprep.subr.mxu1 %v3580_v52 }
0x350b   :  { %3275 = vmatpush3.msra.mxu1 %v2914_v60 }
0x350c   :  { %3276 = vmatprep.subr.mxu1 %v3580_v52 }
0x350d   :  { %3277 = vmatpush3.msra.mxu1 %v2913_v35 }
0x3575   :  { %v2801_v26 = vpop.permute.xlu1 %2800 }
0x3576   :  { %v2803_v27 = vmul.f32 %v3521_v50, %v2801_v26 }
0x3578   :  { %3236 = vmatmul.mubr.msk.f32.vlgmr.msra.gmra.mxu0 %vm405_vm1, %v2803_v27 }
0x3579   :  { %3289 = vmatprep.mubr.msk.f32.mxu0 %vm3581_vm2, %v3580_v52  ;;  %3282 = vmatpush3.msra.mxu0 %v3033_v5 }
0x357a   :  { %3283 = vmatprep.subr.mxu0 %v3580_v52 }
0x357b   :  { %3284 = vmatpush3.msra.mxu0 %v3032_v6 }
0x357c   :  { %3285 = vmatprep.subr.mxu0 %v3580_v52 }
0x357d   :  { %3286 = vmatpush3.msra.mxu0 %v3031_v18 }
0x357e   :  { %3287 = vmatprep.subr.mxu0 %v3580_v52 }
0x357f   :  { %3288 = vmatpush3.msra.mxu0 %v3030_v19 }
0x3638   :  { %v2873_v30 = vpop.f32.mrf.mxu0 }
0x3639   :  { %v2880_v11 = vadd.f32 %v2873_v30, %v299_v47 }
0x363a   :  { %v2875_v33 = vpop.f32.mrf.mxu0 }
0x363b   :  { %v2881_v9 = vadd.f32 %v2875_v33, %v300_v31  ;;  %v3237_v48 = vmul.f32 -1.442695, %v2880_v11 }
0x363d   :  { %v3238_v10 = vmul.f32 -1.442695, %v2881_v9 }
0x363f   :  { %3528 = vpow2.f32 %v3238_v10 }
0x364c   :  { %v3529_v12 = vpop.eup %3528 }
0x364d   :  { %v2889_v14 = vadd.f32 1.0, %v3529_v12 }
0x364f   :  { %3530 = vrcp.f32 %v2889_v14 }
0x3650   :  { %3532 = vpow2.f32 %v3237_v48 }
0x365c   :  { %v3531_v15 = vpop.eup %3530 }
0x365d   :  { %v2894_v16 = vmul.f32 2.0, %v3531_v15  ;;  %v3533_v13 = vpop.eup %3532 }
0x365e   :  { %v2888_v49 = vadd.f32 1.0, %v3533_v13 }
0x365f   :  { %v3239_v17 = vadd.f32 -1.0, %v2894_v16 }
0x3660   :  { %3534 = vrcp.f32 %v2888_v49 }
0x3661   :  { %2898 = vrot.lane.b32.xlu1 %v3239_v17, %s3579_s1 }
0x366d   :  { %v3535_v53 = vpop.eup %3534 }
0x366e   :  { %v2896_v61 = vmul.f32 %v3535_v53, %v2797_v24  ;;  %v15_v24 = vstv %s4602_s9 }
0x366f   :  { %16 = vst [vmem:[#allocation3] sm:$0x1] %v15_v24 }
0x3676   :  { %v3247_v33 = vld [vmem:[#allocation3] ss:$0 sm:$0xff] }
0x36d3   :  { %v2899_v54 = vpop.permute.xlu1 %2898 }
0x36d4   :  { %v2901_v55 = vmul.f32 %v3535_v53, %v2899_v54 }
0x36d6   :  { %2903 = vrot.lane.b32.xlu0 %v2901_v55, %s3579_s1 }
0x3748   :  { %v2904_v62 = vpop.permute.xlu0 %2903 }
0x3749   :  { %v2906_v63 = vadd.f32 %v2904_v62, %v2896_v61 }
0x374b   :  { %3536 = vtanh.f32 %v2906_v63 }
0x3758   :  { %v3537_v36 = vpop.eup %3536 }
0x3759   :  { %2909 = vrot.lane.b32.xlu1 %v3537_v36, %s3579_s1 }
0x375d   :  { %3010 = vrot.lane.b32.xlu1 %v2906_v63, %s3579_s1 }
0x37cb   :  { %v2910_v37 = vpop.permute.xlu1 %2909 }
0x37cc   :  { %v2912_v38 = vmul.f32 %v3531_v15, %v2910_v37 }
0x37ce   :  { %3279 = vmatmul.mubr.msk.f32.vlgmr.msra.gmra.mxu1 %vm405_vm1, %v2912_v38 }
0x37cf   :  { %v3011_v1 = vpop.permute.xlu1 %3010 }
0x388e   :  { %v2997_v40 = vpop.f32.mrf.mxu1 }
0x388f   :  { %v2998_v34 = vadd.f32 %v3240_v39, %v2997_v40 }
0x3890   :  { %v3280_v41 = vpop.f32.mrf.mxu1 }
0x3891   :  { %v3242_v42 = vmul.f32 -1.442695, %v2998_v34 }
0x3893   :  { %3538 = vpow2.f32 %v3242_v42 }
0x38a0   :  { %v3539_v43 = vpop.eup %3538 }
0x38a1   :  { %v3004_v44 = vadd.f32 1.0, %v3539_v43 }
0x38a3   :  { %3540 = vrcp.f32 %v3004_v44 }
0x38b0   :  { %v3541_v45 = vpop.eup %3540 }
0x38b1   :  { %v3007_v46 = vmul.f32 2.0, %v3541_v45  ;;  %v3013_v2 = vmul.f32 %v3541_v45, %v3011_v1 }
0x38b3   :  { %v3243_v50 = vadd.f32 -1.0, %v3007_v46 }
0x38b5   :  { %3015 = vrot.lane.b32.xlu0 %v3243_v50, %s3582_s4 }
0x3927   :  { %v3016_v51 = vpop.permute.xlu0 %3015 }
0x3928   :  { %v3018_v0 = vmul.f32 %v3541_v45, %v3016_v51 }
0x392a   :  { %3020 = vrot.lane.b32.xlu0 %v3018_v0, %s3582_s4 }
0x399c   :  { %v3021_v3 = vpop.permute.xlu0 %3020 }
0x399d   :  { %v3023_v4 = vadd.f32 %v3021_v3, %v3013_v2 }
0x399f   :  { %3542 = vtanh.f32 %v3023_v4 }
0x39ac   :  { %v3543_v20 = vpop.eup %3542 }
0x39ad   :  { %3026 = vrot.lane.b32.xlu1 %v3543_v20, %s3582_s4 }
0x3a1f   :  { %v3027_v21 = vpop.permute.xlu1 %3026 }
0x3a20   :  { %v3029_v22 = vmul.f32 %v3541_v45, %v3027_v21 }
0x3a22   :  { %3042 = vrot.lane.b32.xlu0 %v3029_v22, %s3579_s1 }
0x3a94   :  { %v3043_v23 = vpop.permute.xlu0 %3042 }
0x3a95   :  { %3290 = vmatmul.mubr.msk.f32.vlgmr.msra.gmra.mxu0 %vm3044_vm3, %v3043_v23 }
0x3b55   :  { %v3113_v52 = vpop.f32.mrf.mxu0 }
0x3b56   :  { %v3114_v26 = vadd.f32 %v3244_v25, %v3113_v52 }
0x3b57   :  { %v3291_v27 = vpop.f32.mrf.mxu0 }
0x3b58   :  { %3544 = vtanh.f32 %v3114_v26 }
0x3b65   :  { %v3545_v29 = vpop.eup %3544 }
0x3b66   :  { %v3125_v30 = vmul.f32 %v3545_v29, %v3246_v28 }
0x3b68   :  { %v3127_v31 = vsel %vm3126_vm4, %v3125_v30, 0.0 }
0x3b69   :  { %3128 = vadd.xlane.f32.xlu1 %v3127_v31 }
0x3bf2   :  { %v3129_v9 = vpop.xlane.xlu1 %3128 }
0x3bf3   :  { %v3137_v10 = vadd.f32 %v3247_v33, %v3129_v9 }
0x3bf5   :  { %v3138_v12 = vmul.f32 3.0, %v3137_v10 }
0x3bf7   :  { %3140 = vst.msk [vmem:[%s4605_s10] sm:$0xff] %vm3139_vm5, %v3138_v12 }

</bundles_post_ra>
